<compile_context>
chip_gen: v6e
topology: v6e:2x2x1
jax: 0.10.0
libtpu: 0.0.40
codegen_flags: <defaults>
</compile_context>

<pallas_src>
import functools
import math

import jax
import jax.numpy as jnp
from jax import lax
from jax.experimental import pallas as pl
from jax.experimental.pallas import tpu as pltpu


def _round_up(x, m):
    return (x + m - 1) // m * m


def _vmem_limit_bytes():
    # Derive per generation (~half of physical VMEM: 32 MiB on v7x, 64 MiB on
    # v5e/v6e) instead of hard-coding 48 MiB (75% of v7x's 64 MiB).
    try:
        cap = pltpu.get_tpu_info().vmem_capacity_bytes
    except Exception:  # pragma: no cover - conservative fallback
        cap = 64 * 1024 * 1024
    return int(min(cap // 2, 64 * 1024 * 1024))


def _choose_row_tile(Ho, Wop):
    """Output rows per grid step.

    TH*Wop is kept a multiple of 128 so every y block and every transposed
    kernel-2 output block is lane-dense (unmasked vst), and ~128-512 flattened
    rows per tile keeps the f32 accumulator small and stored exactly once."""
    base = 128 // math.gcd(Wop, 128)      # smallest TH with TH*Wop % 128 == 0
    mult = max(1, 256 // (base * Wop))    # aim for ~256-512 flattened rows
    TH = base * mult
    TH = min(TH, _round_up(Ho, base))     # don't exceed (rounded-up) height
    return TH


def _conv_stats_kernel(x_ref, w_ref, y_ref, sum_ref, ssq_ref, *,
                       Kn, TH, Wop, Wo, Ho, need_mask):
    """One row-tile of one image per grid step: implicit-im2col conv
    (Kn*Kn dense stride-1 shifted-window bf16 matmuls, f32 accumulation) plus
    masked per-tile per-channel sum / sum-of-squares partials for training-mode
    BatchNorm.  The accumulator is per-tile and stored exactly once."""
    t = pl.program_id(1)
    cpad = w_ref.shape[-1]
    rows = TH * Wop
    r0 = pl.multiple_of(t * TH, TH)       # first output row of this tile

    acc = jnp.zeros((rows, cpad), jnp.float32)
    for ph in range(Kn):
        for pw in range(Kn):
            win = x_ref[0, pl.ds(r0 + ph, TH), pw:pw + Wop, :]
            a = win.reshape(rows, win.shape[-1])          # (rows, Cin2) bf16
            acc += jnp.dot(a, w_ref[ph * Kn + pw],
                           preferred_element_type=jnp.float32)
    y_ref[0] = acc.astype(y_ref.dtype)                    # single store

    # BN statistics from the f32 accumulator.  Padded output rows/cols must be
    # excluded: their windows can overlap real pixels and produce nonzero acc.
    if need_mask:
        a3 = acc.reshape(TH, Wop, cpad)
        col = lax.broadcasted_iota(jnp.int32, (TH, Wop, cpad), 1)
        row = lax.broadcasted_iota(jnp.int32, (TH, Wop, cpad), 0)
        a3 = jnp.where((col < Wo) & (row + r0 < Ho), a3, 0.0)
        sum_ref[0, 0] = jnp.sum(jnp.sum(a3, axis=1), axis=0, keepdims=True)
        ssq_ref[0, 0] = jnp.sum(jnp.sum(a3 * a3, axis=1), axis=0, keepdims=True)
    else:
        sum_ref[0, 0] = jnp.sum(acc, axis=0, keepdims=True)
        ssq_ref[0, 0] = jnp.sum(acc * acc, axis=0, keepdims=True)


def _bn_relu_t_kernel(y_ref, scale_ref, shift_ref, o_ref, *, Cout8):
    """Fused BN affine (precomputed per-channel scale/shift) + ReLU on one row
    tile; writes the channels-major transpose, keeping only the first Cout8
    channels so the HBM write is Cout8/Cpad of the naive size and the epilogue
    needs no XLA transpose pass."""
    z = jnp.maximum(y_ref[0].astype(jnp.float32) * scale_ref[...]
                    + shift_ref[...], 0.0)
    o_ref[0] = z.T[:Cout8, :]                             # (Cout8, TH*Wop)


def resnet_conv_set_forward(x_nchw, weight, bias, gamma, beta, *, stride,
                            eps=1e-5):
    """Forward of ResnetConvSet: conv2d(pad=K//2, stride) -> BN(train) -> ReLU."""
    del bias  # Exactly absorbed by training-mode BatchNorm's batch mean.

    N, Cin, H, W = x_nchw.shape
    Cout, _, K, _ = weight.shape
    s = stride
    pad = K // 2
    Ho = (H + 2 * pad - K) // s + 1
    Wo = (W + 2 * pad - K) // s + 1

    Kn = (K - 1) // s + 1          # taps per axis after space-to-depth
    Cin2 = s * s * Cin             # contraction depth after space-to-depth
    Wop = _round_up(Wo, 8)         # sublane-aligned output width
    TH = _choose_row_tile(Ho, Wop)
    Hop = _round_up(Ho, TH)
    T = Hop // TH
    Cpad = _round_up(Cout, 128)    # lane-dense channel dim for the matmuls
    Cout8 = _round_up(Cout, 8)     # sublane-aligned channel dim post-transpose
    HWp = Hop * Wop

    # --- glue: bf16 first, NCHW->NHWC, zero-pad, space-to-depth ---------------
    xb = jnp.transpose(x_nchw.astype(jnp.bfloat16), (0, 2, 3, 1))      # NHWC
    Hp = max(s * (Hop + Kn - 1), _round_up(pad + H, s))
    Wp = max(s * (Wop + Kn - 1), _round_up(pad + W, s))
    xp = jnp.pad(xb, ((0, 0), (pad, Hp - H - pad), (pad, Wp - W - pad), (0, 0)))
    Hp2, Wp2 = Hp // s, Wp // s
    x2 = xp.reshape(N, Hp2, s, Wp2, s, Cin)
    x2 = jnp.transpose(x2, (0, 1, 3, 2, 4, 5)).reshape(N, Hp2, Wp2, Cin2)

    # Weights (Cout,Cin,K,K) -> space-to-depth taps (Kn*Kn, Cin2, Cpad), bf16.
    wt = jnp.transpose(weight, (2, 3, 1, 0))                           # (K,K,Cin,Cout)
    Ks = s * Kn
    wt = jnp.pad(wt, ((0, Ks - K), (0, Ks - K), (0, 0), (0, 0)))
    w2 = wt.reshape(Kn, s, Kn, s, Cin, Cout).transpose(0, 2, 1, 3, 4, 5)
    w2 = w2.reshape(Kn * Kn, Cin2, Cout)
    w2 = jnp.pad(w2, ((0, 0), (0, 0), (0, Cpad - Cout))).astype(jnp.bfloat16)

    vmem = _vmem_limit_bytes()
    need_mask = (Wo != Wop) or (Ho != Hop)

    # --- kernel 1: row-tiled implicit-im2col conv + partial BN statistics -----
    kernel1 = functools.partial(_conv_stats_kernel, Kn=Kn, TH=TH, Wop=Wop,
                                Wo=Wo, Ho=Ho, need_mask=need_mask)
    y, psum, pssq = pl.pallas_call(
        kernel1,
        out_shape=(jax.ShapeDtypeStruct((N, HWp, Cpad), jnp.bfloat16),
                   jax.ShapeDtypeStruct((N, T, 1, Cpad), jnp.float32),
                   jax.ShapeDtypeStruct((N, T, 1, Cpad), jnp.float32)),
        grid_spec=pltpu.PrefetchScalarGridSpec(
            num_scalar_prefetch=0,
            grid=(N, T),
            in_specs=[
                # Whole (small, bf16, space-to-depth'd) image; block index is
                # constant in t so it is DMA'd only when n changes.
                pl.BlockSpec((1, Hp2, Wp2, Cin2), lambda n, t: (n, 0, 0, 0)),
                # Grid-invariant weights (fetched once, never re-fetched).
                pl.BlockSpec((Kn * Kn, Cin2, Cpad), lambda n, t: (0, 0, 0)),
            ],
            out_specs=[
                pl.BlockSpec((1, TH * Wop, Cpad), lambda n, t: (n, t, 0)),
                pl.BlockSpec((1, 1, 1, Cpad), lambda n, t: (n, t, 0, 0)),
                pl.BlockSpec((1, 1, 1, Cpad), lambda n, t: (n, t, 0, 0)),
            ]),
        compiler_params=pltpu.CompilerParams(
            dimension_semantics=("parallel", "parallel"),
            vmem_limit_bytes=vmem),
    )(x2, w2)

    # --- tiny per-channel math: training-mode BN stats over valid region ------
    M = N * Ho * Wo
    csum = jnp.sum(psum, axis=(0, 1, 2))                  # (Cpad,)
    cssq = jnp.sum(pssq, axis=(0, 1, 2))
    mean = csum / M
    # Single-pass E[x^2]-E[x]^2 in f32 (fine at these scales).
    # TODO(synk): centered/Welford partials if |mean| >> std at very large M.
    var = jnp.maximum(cssq / M - mean * mean, 0.0)
    inv_std = lax.rsqrt(var + eps)
    g = jnp.pad(gamma.astype(jnp.float32), (0, Cpad - Cout))
    b = jnp.pad(beta.astype(jnp.float32), (0, Cpad - Cout))
    scale = (g * inv_std).reshape(1, Cpad)
    shift = (b - mean * g * inv_std).reshape(1, Cpad)

    # --- kernel 2: fused BN affine + ReLU + channels-major (Cout8) store ------
    kernel2 = functools.partial(_bn_relu_t_kernel, Cout8=Cout8)
    out = pl.pallas_call(
        kernel2,
        out_shape=jax.ShapeDtypeStruct((N, Cout8, HWp), jnp.float32),
        grid_spec=pltpu.PrefetchScalarGridSpec(
            num_scalar_prefetch=0,
            grid=(N, T),
            in_specs=[
                pl.BlockSpec((1, TH * Wop, Cpad), lambda n, t: (n, t, 0)),
                pl.BlockSpec((1, Cpad), lambda n, t: (0, 0)),
                pl.BlockSpec((1, Cpad), lambda n, t: (0, 0)),
            ],
            out_specs=pl.BlockSpec((1, Cout8, TH * Wop), lambda n, t: (n, 0, t)),
        ),
        compiler_params=pltpu.CompilerParams(
            dimension_semantics=("parallel", "parallel"),
            vmem_limit_bytes=vmem),
    )(y, scale, shift)

    # Channels-major output: only a slice + free reshape to reach NCHW.
    out = out.reshape(N, Cout8, Hop, Wop)[:, :Cout, :Ho, :Wo]
    return out


def _reference(x, weight, bias, gamma, beta, *, stride, eps=1e-5):
    """Pure-JAX reference: conv -> training-mode BN -> ReLU.  The kernel feeds
    the MXU bf16 operands, so round the conv inputs to bf16 for an
    apples-to-apples reference; bias is included to confirm BN cancels it."""
    Cout = weight.shape[0]
    K = weight.shape[-1]
    xq = x.astype(jnp.bfloat16).astype(jnp.float32)
    wq = weight.astype(jnp.bfloat16).astype(jnp.float32)
    y = lax.conv_general_dilated(
        xq, wq, (stride, stride), [(K // 2, K // 2)] * 2,
        dimension_numbers=("NCHW", "OIHW", "NCHW"))
    y = y + bias.reshape(1, Cout, 1, 1)
    mean = jnp.mean(y, axis=(0, 2, 3), keepdims=True)
    var = jnp.mean((y - mean) ** 2, axis=(0, 2, 3), keepdims=True)
    z = (y - mean) * lax.rsqrt(var + eps)
    z = z * gamma.reshape(1, Cout, 1, 1) + beta.reshape(1, Cout, 1, 1)
    return jnp.maximum(z, 0.0)


if __name__ == "__main__":
    key = jax.random.PRNGKey(0)
    configs = [
        # (N, Cin, H,  W,  Cout, K, stride)
        (2, 4, 16, 16, 8, 3, 1),    # aligned shapes, single row tile
        (2, 3, 13, 13, 10, 3, 2),   # stride-2 (space-to-depth), masked stats
        (2, 4, 21, 21, 6, 3, 1),    # multi row-tile, masked rows+cols, Cout8 slice
    ]
    for idx, (N, Cin, H, W, Cout, K, stride) in enumerate(configs):
        key, k1, k2, k3, k4, k5 = jax.random.split(key, 6)
        x = jax.random.normal(k1, (N, Cin, H, W), jnp.float32)
        fan_in = Cin * K * K
        weight = jax.random.normal(k2, (Cout, Cin, K, K), jnp.float32) / jnp.sqrt(fan_in)
        bias = jax.random.normal(k3, (Cout,), jnp.float32) * 0.1
        gamma = 1.0 + 0.1 * jax.random.normal(k4, (Cout,), jnp.float32)
        beta = 0.1 * jax.random.normal(k5, (Cout,), jnp.float32)

        out = resnet_conv_set_forward(x, weight, bias, gamma, beta, stride=stride)
        out = jax.block_until_ready(out)

        pad = K // 2
        Ho = (H + 2 * pad - K) // stride + 1
        Wo = (W + 2 * pad - K) // stride + 1
        assert out.shape == (N, Cout, Ho, Wo), (idx, out.shape)

        ref = _reference(x, weight, bias, gamma, beta, stride=stride)
        err = float(jnp.max(jnp.abs(out - ref)))
        # bf16 intermediate y => ~2^-9 relative rounding of the pre-BN conv
        # output propagated through the ~unit-scale normalization.
        assert err < 3e-2, (idx, err)

    print("KERNEL_OK")
</pallas_src>

<mosaic_0001>
module attributes {stable_mosaic.version = 11 : i64} {
  func.func @_conv_stats_kernel(%arg0: i32, %arg1: i32, %arg2: memref<1x18x18x4xbf16, #tpu.memory_space<vmem>>, %arg3: memref<9x4x128xbf16, #tpu.memory_space<vmem>>, %arg4: memref<1x256x128xbf16, #tpu.memory_space<vmem>>, %arg5: memref<1x1x1x128xf32, #tpu.memory_space<vmem>>, %arg6: memref<1x1x1x128xf32, #tpu.memory_space<vmem>>) attributes {dimension_semantics = [#tpu.dimension_semantics<parallel>, #tpu.dimension_semantics<parallel>], iteration_bounds = array<i64: 2, 1>, scalar_prefetch = 0 : i64, scratch_operands = 0 : i64, tpu.core_type = #tpu.core_type<tc>, window_params = [{transform_indices = @transform_0, window_bounds = array<i64: 1, 18, 18, 4>}, {pipeline_mode = #tpu.pipeline_mode<synchronous>, transform_indices = @transform_1, window_bounds = array<i64: 9, 4, 128>}, {transform_indices = @transform_2, window_bounds = array<i64: 1, 256, 128>}, {transform_indices = @transform_3, window_bounds = array<i64: 1, 1, 1, 128>}, {transform_indices = @transform_4, window_bounds = array<i64: 1, 1, 1, 128>}]} {
    %c16_i32 = arith.constant 16 : i32
    %0 = arith.muli %arg1, %c16_i32 : i32
    %1 = tpu.assume_multiple %0, 16 : i32
    %cst = arith.constant 0.000000e+00 : f32
    %2 = vector.broadcast %cst : f32 to vector<256x128xf32>
    %c0_i32 = arith.constant 0 : i32
    %3 = arith.addi %1, %c0_i32 : i32
    %c0 = arith.constant 0 : index
    %4 = arith.index_cast %3 : i32 to index
    %c0_0 = arith.constant 0 : index
    %c0_1 = arith.constant 0 : index
    %5 = vector.load %arg2[%c0, %4, %c0_0, %c0_1] : memref<1x18x18x4xbf16, #tpu.memory_space<vmem>>, vector<1x16x16x4xbf16>
    %6 = vector.shape_cast %5 : vector<1x16x16x4xbf16> to vector<16x16x4xbf16>
    %7 = vector.shape_cast %6 : vector<16x16x4xbf16> to vector<256x4xbf16>
    %c0_2 = arith.constant 0 : index
    %c0_3 = arith.constant 0 : index
    %c0_4 = arith.constant 0 : index
    %8 = vector.load %arg3[%c0_2, %c0_3, %c0_4] : memref<9x4x128xbf16, #tpu.memory_space<vmem>>, vector<1x4x128xbf16>
    %9 = vector.shape_cast %8 : vector<1x4x128xbf16> to vector<4x128xbf16>
    %cst_5 = arith.constant dense<0.000000e+00> : vector<256x128xf32>
    %10 = tpu.matmul %7, %9, %cst_5 {dimension_numbers = #tpu.dot_dimension_numbers<[1], [0], [0], [1], [0, 0, 1, 1], [], []>} : vector<256x4xbf16>, vector<4x128xbf16>, vector<256x128xf32> -> vector<256x128xf32>
    %11 = arith.addf %2, %10 : vector<256x128xf32>
    %c0_i32_6 = arith.constant 0 : i32
    %12 = arith.addi %1, %c0_i32_6 : i32
    %c0_7 = arith.constant 0 : index
    %13 = arith.index_cast %12 : i32 to index
    %c1 = arith.constant 1 : index
    %c0_8 = arith.constant 0 : index
    %14 = vector.load %arg2[%c0_7, %13, %c1, %c0_8] : memref<1x18x18x4xbf16, #tpu.memory_space<vmem>>, vector<1x16x16x4xbf16>
    %15 = vector.shape_cast %14 : vector<1x16x16x4xbf16> to vector<16x16x4xbf16>
    %16 = vector.shape_cast %15 : vector<16x16x4xbf16> to vector<256x4xbf16>
    %c1_9 = arith.constant 1 : index
    %c0_10 = arith.constant 0 : index
    %c0_11 = arith.constant 0 : index
    %17 = vector.load %arg3[%c1_9, %c0_10, %c0_11] : memref<9x4x128xbf16, #tpu.memory_space<vmem>>, vector<1x4x128xbf16>
    %18 = vector.shape_cast %17 : vector<1x4x128xbf16> to vector<4x128xbf16>
    %cst_12 = arith.constant dense<0.000000e+00> : vector<256x128xf32>
    %19 = tpu.matmul %16, %18, %cst_12 {dimension_numbers = #tpu.dot_dimension_numbers<[1], [0], [0], [1], [0, 0, 1, 1], [], []>} : vector<256x4xbf16>, vector<4x128xbf16>, vector<256x128xf32> -> vector<256x128xf32>
    %20 = arith.addf %11, %19 : vector<256x128xf32>
    %c0_i32_13 = arith.constant 0 : i32
    %21 = arith.addi %1, %c0_i32_13 : i32
    %c0_14 = arith.constant 0 : index
    %22 = arith.index_cast %21 : i32 to index
    %c2 = arith.constant 2 : index
    %c0_15 = arith.constant 0 : index
    %23 = vector.load %arg2[%c0_14, %22, %c2, %c0_15] : memref<1x18x18x4xbf16, #tpu.memory_space<vmem>>, vector<1x16x16x4xbf16>
    %24 = vector.shape_cast %23 : vector<1x16x16x4xbf16> to vector<16x16x4xbf16>
    %25 = vector.shape_cast %24 : vector<16x16x4xbf16> to vector<256x4xbf16>
    %c2_16 = arith.constant 2 : index
    %c0_17 = arith.constant 0 : index
    %c0_18 = arith.constant 0 : index
    %26 = vector.load %arg3[%c2_16, %c0_17, %c0_18] : memref<9x4x128xbf16, #tpu.memory_space<vmem>>, vector<1x4x128xbf16>
    %27 = vector.shape_cast %26 : vector<1x4x128xbf16> to vector<4x128xbf16>
    %cst_19 = arith.constant dense<0.000000e+00> : vector<256x128xf32>
    %28 = tpu.matmul %25, %27, %cst_19 {dimension_numbers = #tpu.dot_dimension_numbers<[1], [0], [0], [1], [0, 0, 1, 1], [], []>} : vector<256x4xbf16>, vector<4x128xbf16>, vector<256x128xf32> -> vector<256x128xf32>
    %29 = arith.addf %20, %28 : vector<256x128xf32>
    %c1_i32 = arith.constant 1 : i32
    %30 = arith.addi %1, %c1_i32 : i32
    %c0_20 = arith.constant 0 : index
    %31 = arith.index_cast %30 : i32 to index
    %c0_21 = arith.constant 0 : index
    %c0_22 = arith.constant 0 : index
    %32 = vector.load %arg2[%c0_20, %31, %c0_21, %c0_22] : memref<1x18x18x4xbf16, #tpu.memory_space<vmem>>, vector<1x16x16x4xbf16>
    %33 = vector.shape_cast %32 : vector<1x16x16x4xbf16> to vector<16x16x4xbf16>
    %34 = vector.shape_cast %33 : vector<16x16x4xbf16> to vector<256x4xbf16>
    %c3 = arith.constant 3 : index
    %c0_23 = arith.constant 0 : index
    %c0_24 = arith.constant 0 : index
    %35 = vector.load %arg3[%c3, %c0_23, %c0_24] : memref<9x4x128xbf16, #tpu.memory_space<vmem>>, vector<1x4x128xbf16>
    %36 = vector.shape_cast %35 : vector<1x4x128xbf16> to vector<4x128xbf16>
    %cst_25 = arith.constant dense<0.000000e+00> : vector<256x128xf32>
    %37 = tpu.matmul %34, %36, %cst_25 {dimension_numbers = #tpu.dot_dimension_numbers<[1], [0], [0], [1], [0, 0, 1, 1], [], []>} : vector<256x4xbf16>, vector<4x128xbf16>, vector<256x128xf32> -> vector<256x128xf32>
    %38 = arith.addf %29, %37 : vector<256x128xf32>
    %c1_i32_26 = arith.constant 1 : i32
    %39 = arith.addi %1, %c1_i32_26 : i32
    %c0_27 = arith.constant 0 : index
    %40 = arith.index_cast %39 : i32 to index
    %c1_28 = arith.constant 1 : index
    %c0_29 = arith.constant 0 : index
    %41 = vector.load %arg2[%c0_27, %40, %c1_28, %c0_29] : memref<1x18x18x4xbf16, #tpu.memory_space<vmem>>, vector<1x16x16x4xbf16>
    %42 = vector.shape_cast %41 : vector<1x16x16x4xbf16> to vector<16x16x4xbf16>
    %43 = vector.shape_cast %42 : vector<16x16x4xbf16> to vector<256x4xbf16>
    %c4 = arith.constant 4 : index
    %c0_30 = arith.constant 0 : index
    %c0_31 = arith.constant 0 : index
    %44 = vector.load %arg3[%c4, %c0_30, %c0_31] : memref<9x4x128xbf16, #tpu.memory_space<vmem>>, vector<1x4x128xbf16>
    %45 = vector.shape_cast %44 : vector<1x4x128xbf16> to vector<4x128xbf16>
    %cst_32 = arith.constant dense<0.000000e+00> : vector<256x128xf32>
    %46 = tpu.matmul %43, %45, %cst_32 {dimension_numbers = #tpu.dot_dimension_numbers<[1], [0], [0], [1], [0, 0, 1, 1], [], []>} : vector<256x4xbf16>, vector<4x128xbf16>, vector<256x128xf32> -> vector<256x128xf32>
    %47 = arith.addf %38, %46 : vector<256x128xf32>
    %c1_i32_33 = arith.constant 1 : i32
    %48 = arith.addi %1, %c1_i32_33 : i32
    %c0_34 = arith.constant 0 : index
    %49 = arith.index_cast %48 : i32 to index
    %c2_35 = arith.constant 2 : index
    %c0_36 = arith.constant 0 : index
    %50 = vector.load %arg2[%c0_34, %49, %c2_35, %c0_36] : memref<1x18x18x4xbf16, #tpu.memory_space<vmem>>, vector<1x16x16x4xbf16>
    %51 = vector.shape_cast %50 : vector<1x16x16x4xbf16> to vector<16x16x4xbf16>
    %52 = vector.shape_cast %51 : vector<16x16x4xbf16> to vector<256x4xbf16>
    %c5 = arith.constant 5 : index
    %c0_37 = arith.constant 0 : index
    %c0_38 = arith.constant 0 : index
    %53 = vector.load %arg3[%c5, %c0_37, %c0_38] : memref<9x4x128xbf16, #tpu.memory_space<vmem>>, vector<1x4x128xbf16>
    %54 = vector.shape_cast %53 : vector<1x4x128xbf16> to vector<4x128xbf16>
    %cst_39 = arith.constant dense<0.000000e+00> : vector<256x128xf32>
    %55 = tpu.matmul %52, %54, %cst_39 {dimension_numbers = #tpu.dot_dimension_numbers<[1], [0], [0], [1], [0, 0, 1, 1], [], []>} : vector<256x4xbf16>, vector<4x128xbf16>, vector<256x128xf32> -> vector<256x128xf32>
    %56 = arith.addf %47, %55 : vector<256x128xf32>
    %c2_i32 = arith.constant 2 : i32
    %57 = arith.addi %1, %c2_i32 : i32
    %c0_40 = arith.constant 0 : index
    %58 = arith.index_cast %57 : i32 to index
    %c0_41 = arith.constant 0 : index
    %c0_42 = arith.constant 0 : index
    %59 = vector.load %arg2[%c0_40, %58, %c0_41, %c0_42] : memref<1x18x18x4xbf16, #tpu.memory_space<vmem>>, vector<1x16x16x4xbf16>
    %60 = vector.shape_cast %59 : vector<1x16x16x4xbf16> to vector<16x16x4xbf16>
    %61 = vector.shape_cast %60 : vector<16x16x4xbf16> to vector<256x4xbf16>
    %c6 = arith.constant 6 : index
    %c0_43 = arith.constant 0 : index
    %c0_44 = arith.constant 0 : index
    %62 = vector.load %arg3[%c6, %c0_43, %c0_44] : memref<9x4x128xbf16, #tpu.memory_space<vmem>>, vector<1x4x128xbf16>
    %63 = vector.shape_cast %62 : vector<1x4x128xbf16> to vector<4x128xbf16>
    %cst_45 = arith.constant dense<0.000000e+00> : vector<256x128xf32>
    %64 = tpu.matmul %61, %63, %cst_45 {dimension_numbers = #tpu.dot_dimension_numbers<[1], [0], [0], [1], [0, 0, 1, 1], [], []>} : vector<256x4xbf16>, vector<4x128xbf16>, vector<256x128xf32> -> vector<256x128xf32>
    %65 = arith.addf %56, %64 : vector<256x128xf32>
    %c2_i32_46 = arith.constant 2 : i32
    %66 = arith.addi %1, %c2_i32_46 : i32
    %c0_47 = arith.constant 0 : index
    %67 = arith.index_cast %66 : i32 to index
    %c1_48 = arith.constant 1 : index
    %c0_49 = arith.constant 0 : index
    %68 = vector.load %arg2[%c0_47, %67, %c1_48, %c0_49] : memref<1x18x18x4xbf16, #tpu.memory_space<vmem>>, vector<1x16x16x4xbf16>
    %69 = vector.shape_cast %68 : vector<1x16x16x4xbf16> to vector<16x16x4xbf16>
    %70 = vector.shape_cast %69 : vector<16x16x4xbf16> to vector<256x4xbf16>
    %c7 = arith.constant 7 : index
    %c0_50 = arith.constant 0 : index
    %c0_51 = arith.constant 0 : index
    %71 = vector.load %arg3[%c7, %c0_50, %c0_51] : memref<9x4x128xbf16, #tpu.memory_space<vmem>>, vector<1x4x128xbf16>
    %72 = vector.shape_cast %71 : vector<1x4x128xbf16> to vector<4x128xbf16>
    %cst_52 = arith.constant dense<0.000000e+00> : vector<256x128xf32>
    %73 = tpu.matmul %70, %72, %cst_52 {dimension_numbers = #tpu.dot_dimension_numbers<[1], [0], [0], [1], [0, 0, 1, 1], [], []>} : vector<256x4xbf16>, vector<4x128xbf16>, vector<256x128xf32> -> vector<256x128xf32>
    %74 = arith.addf %65, %73 : vector<256x128xf32>
    %c2_i32_53 = arith.constant 2 : i32
    %75 = arith.addi %1, %c2_i32_53 : i32
    %c0_54 = arith.constant 0 : index
    %76 = arith.index_cast %75 : i32 to index
    %c2_55 = arith.constant 2 : index
    %c0_56 = arith.constant 0 : index
    %77 = vector.load %arg2[%c0_54, %76, %c2_55, %c0_56] : memref<1x18x18x4xbf16, #tpu.memory_space<vmem>>, vector<1x16x16x4xbf16>
    %78 = vector.shape_cast %77 : vector<1x16x16x4xbf16> to vector<16x16x4xbf16>
    %79 = vector.shape_cast %78 : vector<16x16x4xbf16> to vector<256x4xbf16>
    %c8 = arith.constant 8 : index
    %c0_57 = arith.constant 0 : index
    %c0_58 = arith.constant 0 : index
    %80 = vector.load %arg3[%c8, %c0_57, %c0_58] : memref<9x4x128xbf16, #tpu.memory_space<vmem>>, vector<1x4x128xbf16>
    %81 = vector.shape_cast %80 : vector<1x4x128xbf16> to vector<4x128xbf16>
    %cst_59 = arith.constant dense<0.000000e+00> : vector<256x128xf32>
    %82 = tpu.matmul %79, %81, %cst_59 {dimension_numbers = #tpu.dot_dimension_numbers<[1], [0], [0], [1], [0, 0, 1, 1], [], []>} : vector<256x4xbf16>, vector<4x128xbf16>, vector<256x128xf32> -> vector<256x128xf32>
    %83 = arith.addf %74, %82 : vector<256x128xf32>
    %84 = arith.truncf %83 : vector<256x128xf32> to vector<256x128xbf16>
    %c0_60 = arith.constant 0 : index
    %c0_61 = arith.constant 0 : index
    %c0_62 = arith.constant 0 : index
    %85 = vector.load %arg4[%c0_60, %c0_61, %c0_62] : memref<1x256x128xbf16, #tpu.memory_space<vmem>>, vector<1x256x128xbf16>
    %86 = vector.shape_cast %85 : vector<1x256x128xbf16> to vector<256x128xbf16>
    %87 = vector.shape_cast %84 : vector<256x128xbf16> to vector<1x256x128xbf16>
    tpu.vector_store %arg4[%c0_60, %c0_61, %c0_62], %87 {strides = array<i32>} : memref<1x256x128xbf16, #tpu.memory_space<vmem>>, vector<1x256x128xbf16>,
    %cst_63 = arith.constant dense<0.000000e+00> : vector<128xf32>
    %88 = vector.multi_reduction <add>, %83, %cst_63 [0] : vector<256x128xf32> to vector<128xf32>
    %89 = vector.shape_cast %88 : vector<128xf32> to vector<1x128xf32>
    %c0_64 = arith.constant 0 : index
    %c0_65 = arith.constant 0 : index
    %c0_66 = arith.constant 0 : index
    %c0_67 = arith.constant 0 : index
    %90 = vector.load %arg5[%c0_64, %c0_65, %c0_66, %c0_67] : memref<1x1x1x128xf32, #tpu.memory_space<vmem>>, vector<1x1x1x128xf32>
    %91 = vector.shape_cast %90 : vector<1x1x1x128xf32> to vector<1x128xf32>
    %92 = vector.shape_cast %89 : vector<1x128xf32> to vector<1x1x1x128xf32>
    tpu.vector_store %arg5[%c0_64, %c0_65, %c0_66, %c0_67], %92 {strides = array<i32>} : memref<1x1x1x128xf32, #tpu.memory_space<vmem>>, vector<1x1x1x128xf32>,
    %93 = arith.mulf %83, %83 : vector<256x128xf32>
    %cst_68 = arith.constant dense<0.000000e+00> : vector<128xf32>
    %94 = vector.multi_reduction <add>, %93, %cst_68 [0] : vector<256x128xf32> to vector<128xf32>
    %95 = vector.shape_cast %94 : vector<128xf32> to vector<1x128xf32>
    %c0_69 = arith.constant 0 : index
    %c0_70 = arith.constant 0 : index
    %c0_71 = arith.constant 0 : index
    %c0_72 = arith.constant 0 : index
    %96 = vector.load %arg6[%c0_69, %c0_70, %c0_71, %c0_72] : memref<1x1x1x128xf32, #tpu.memory_space<vmem>>, vector<1x1x1x128xf32>
    %97 = vector.shape_cast %96 : vector<1x1x1x128xf32> to vector<1x128xf32>
    %98 = vector.shape_cast %95 : vector<1x128xf32> to vector<1x1x1x128xf32>
    tpu.vector_store %arg6[%c0_69, %c0_70, %c0_71, %c0_72], %98 {strides = array<i32>} : memref<1x1x1x128xf32, #tpu.memory_space<vmem>>, vector<1x1x1x128xf32>,
    return
  }
  func.func @transform_0(%arg0: i32, %arg1: i32) -> (i32, i32, i32, i32) {
    %c0_i32 = arith.constant 0 : i32
    %c0_i32_0 = arith.constant 0 : i32
    %c0_i32_1 = arith.constant 0 : i32
    %c0_i32_2 = arith.constant 0 : i32
    return %arg0, %c0_i32, %c0_i32_0, %c0_i32_1 : i32, i32, i32, i32
  }
  func.func @transform_1(%arg0: i32, %arg1: i32) -> (i32, i32, i32) {
    %c0_i32 = arith.constant 0 : i32
    %c0_i32_0 = arith.constant 0 : i32
    %c0_i32_1 = arith.constant 0 : i32
    %c0_i32_2 = arith.constant 0 : i32
    return %c0_i32, %c0_i32_0, %c0_i32_1 : i32, i32, i32
  }
  func.func @transform_2(%arg0: i32, %arg1: i32) -> (i32, i32, i32) {
    %c0_i32 = arith.constant 0 : i32
    %c0_i32_0 = arith.constant 0 : i32
    return %arg0, %arg1, %c0_i32 : i32, i32, i32
  }
  func.func @transform_3(%arg0: i32, %arg1: i32) -> (i32, i32, i32, i32) {
    %c0_i32 = arith.constant 0 : i32
    %c0_i32_0 = arith.constant 0 : i32
    %c0_i32_1 = arith.constant 0 : i32
    return %arg0, %arg1, %c0_i32, %c0_i32_0 : i32, i32, i32, i32
  }
  func.func @transform_4(%arg0: i32, %arg1: i32) -> (i32, i32, i32, i32) {
    %c0_i32 = arith.constant 0 : i32
    %c0_i32_0 = arith.constant 0 : i32
    %c0_i32_1 = arith.constant 0 : i32
    return %arg0, %arg1, %c0_i32, %c0_i32_0 : i32, i32, i32, i32
  }
}

</mosaic_0001>

<bundles_post_ra>
// kernel: tpu_custom_call.1
= control target key start
LH: loop header
LB: loop body
LE: loop exit
PB: predicated region body
PF: predicated region fallthrough
CT: control target
= control target key end

     0   :  { %10 = vsyncpa [#allocation3], 0  ;;  %s9469_s0 = inlined_call_operand.vmem [shape: bf16[2,18,18,4], index: 0, kind: input, shape index: {}]   ;;  %s9470_s1 = inlined_call_operand.vmem [shape: bf16[9,4,128], index: 1, kind: input, shape index: {}]   ;;  %s9471_s2 = inlined_call_operand.hbm [shape: bf16[2,256,128], index: 2, kind: output, shape index: {0}]   ;;  %s9472_s3 = inlined_call_operand.hbm [shape: f32[2,1,1,128], index: 3, kind: output, shape index: {1}]   ;;  %s9473_s4 = inlined_call_operand.hbm [shape: f32[2,1,1,128], index: 4, kind: output, shape index: {2}]  }
   0x1   :  { %12 = vsyncpa [#allocation3 + $0x1], 0 }
   0x2   :  { %13 = vsyncpa [#allocation5], 0 }
   0x3   :  { %15 = vsyncpa [#allocation5 + $0x1], 0  ;;  %s6722_s15 = smov 0   ;;  %s6724_s16 = smov 0  }
   0x4   :  { %s6726_s17 = smov 0   ;;  %s6728_s18 = smov 0  }
   0x5   :  { %s6730_s19 = smov 0   ;;  %s6732_s20 = smov 0  }
   0x6 LB: > { %s5259_s21 = sadd.s32 4294967295, %s6690_s20   ;;  %s9507_s22 = sadd.s32 4294967294, %s6690_s20   ;;  %s6690_s20 = sphi %s6732_s20, %s21_s20   ;;  %s6686_s19 = sphi %s6730_s19, %s9730_s19   ;;  %s6682_s18 = sphi %s6728_s18, %s9729_s18   ;;  %s6678_s17 = sphi %s6726_s17, %s9728_s17   ;;  %s6674_s16 = sphi %s6724_s16, %s9727_s16   ;;  %s6670_s15 = sphi %s6722_s15, %s9726_s15  }
   0x7   : > { %s33_s23 = sadd.s32 1, %s6686_s19  ;;  %s89_s24 = sadd.s32 1, %s6678_s17 }
   0x8   : > { %p35_p0 = scmp.ge.s32.totalorder %s33_s23, 2  ;;  %p99_p1 = scmp.ne.s32.totalorder %s6678_s17, %s6674_s16 }
   0x9   : > { %p100_p2 = scmp.eq.s32.totalorder %s5259_s21, 1  ;;  %p105_p3 = scmp.ne.s32.totalorder %s6674_s16, %s6670_s15 }
   0xa   : > { %s9732_s23 = smov (%p35_p0, %s33_s23), 0  ;;  %p106_p5 = scmp.eq.s32.totalorder %s9507_s22, 1 }
   0xb   : > { %p6764_p4 = por %p100_p2, %p99_p1  ;;  %s84_s26 = ssub.s32 %s6686_s19, %s9732_s23 }
   0xc   : > { %p5263_p6 = scmp.ge.s32.totalorder %s6690_s20, 1  ;;  %p87_p7 = scmp.eq.s32.totalorder %s84_s26, 0 }
   0xd   : > { %p6773_p8 = por %p106_p5, %p105_p3  ;;  %p191_p9 = scmp.lt.s32.totalorder %s6690_s20, 3 }
   0xe   : > { %s6779_s28 = scalar_select %p87_p7, %s6678_s17, %s89_s24  }
   0xf   : > { %p192_p10 = pnand %p5263_p6, %p191_p9 }
  0x11   : > { %195 = sbr.rel (%p192_p10) target bundleno = 627 (0x273), region = 28 }
  0x16   : > { %v5266_v0 = vld [vmem:[%s9470_s1 + $0x2] sm:$0x3]  ;;  %vm771_vm0 = vcmask 1041408   ;;  %p225_p11 = scmp.lt.s32.totalorder %s6682_s18, 1  ;;  %v268_v2 = vld [vmem:[%s9470_s1] sm:$0x3] }
  0x17   : > { %6431 = vmatprep.subr.msk.bf16.mxu1 %vm771_vm0, %v5266_v0  ;;  %6430 = vmatprep.subr.msk.bf16.mxu0 %vm771_vm0, %v5266_v0  ;;  %v773_v1 = vsel %vm771_vm0, %v5266_v0, 0  ;;  %v5347_v3 = vld [vmem:[%s9470_s1 + $0x4] sm:$0x3]  ;;  %vm285_vm1 = vsmask.f32 3328  ;;  %v6803_v4 = vsel %vm771_vm0, %v268_v2, 0 }
  0x18   : > { %6429 = vmatpush3.bf16.msra.mxu1 %v773_v1  ;;  %6123 = vmatpush3.bf16.msra.mxu0 %v773_v1  ;;  %s226_s7 = scalar_select %p225_p11, %s6682_s18, 1  ;;  %vm286_vm2 = vsmask.f32 7440  ;;  %vm722_vm3 = vcmask 31744   ;;  %v6829_v16 = vsel %vm771_vm0, %v5347_v3, 0  ;;  %vm1276_vm5 = vcmask 1042432  }
  0x19   : > { %6432 = vmatprep.subr.msk.bf16.mxu1 %vm771_vm0, %v268_v2  ;;  %6433 = vmatprep.subr.msk.bf16.mxu0 %vm771_vm0, %v5347_v3  ;;  %vm6844_vm4 = vmor %vm285_vm1, %vm286_vm2  ;;  %vm1277_vm6 = vcmask 1046532   ;;  %s9248_s12 = sand.u32 1, %s6674_s16   ;;  %s5873_s24 = sshll.u32 %s6682_s18, 11 }
  0x1a   : > { %s6440_s10 = smul.u32 216, %s226_s7  ;;  %vm7130_vm7 = vmor %vm1276_vm5, %vm1277_vm6  ;;  %s9346_s5 = scalar_lea.hbm %s9471_s2, %s5873_s24 }
  0x1b   : > { %s5070_s6 = scalar_lea.sflag [#allocation3], %s9248_s12  ;;  %s6692_s8 = smov [#allocation2]  }
  0x1c   : > { %s6800_s13 = scalar_lea.vmem %s9469_s0, %s6440_s10  ;;  %s6562_s9 = sshll.u32 %s6692_s8, 4  ;;  %s6563_s9 = int_to_ptr.vmem [resolvable:$false] %s6562_s9 }
  0x1d   : > { %v6806_v5 = vld [vmem:[%s6800_s13] sm:$0xf]  ;;  %v6809_v6 = vld [vmem:[%s6800_s13 + $0x4] sm:$0xf]  ;;  %v6812_v7 = vld [vmem:[%s6800_s13 + $0x8] sm:$0x1] }
  0x1e   : > { %v289_v8 = vshrl.u32 %v6806_v5, 16  ;;  %v292_v9 = vshll.u32 %v6806_v5, 16  ;;  %v298_v10 = vshll.u32 %v6809_v6, 16  ;;  %v302_v11 = vshrl.u32 %v6809_v6, 16  ;;  %v6819_v12 = vld [vmem:[%s6800_s13 + $0x60] sm:$0xf] }
  0x1f   : > { %v308_v13 = vshll.u32 %v6812_v7, 16  ;;  %v6823_v14 = vld [vmem:[%s6800_s13 + $0x64] sm:$0xf]  ;;  %v6826_v15 = vld [vmem:[%s6800_s13 + $0x68] sm:$0x1]  ;;  %v481_v22 = vshrl.u32 %v6819_v12, 16 }
  0x20   : > { %v291_v17 = vrot.slane %v289_v8, 4  ;;  %v294_v18 = vrot.slane %v292_v9, 5  ;;  %v300_v19 = vrot.slane %v298_v10, 5  ;;  %v304_v20 = vrot.slane %v302_v11, 4  ;;  %v6837_v29 = vld [vmem:[%s6800_s13 + $0xc] sm:$0xf] }
  0x21   : > { %v310_v21 = vrot.slane %v308_v13, 5  ;;  %v484_v23 = vshll.u32 %v6819_v12, 16  ;;  %v490_v24 = vshll.u32 %v6823_v14, 16  ;;  %v494_v27 = vshrl.u32 %v6823_v14, 16  ;;  %v6840_v30 = vld [vmem:[%s6800_s13 + $0x10] sm:$0xf] }
  0x22   : > { %v295_v25 = vor.u32 %v294_v18, %v291_v17  ;;  %v305_v26 = vor.u32 %v304_v20, %v300_v19  ;;  %v500_v28 = vshll.u32 %v6826_v15, 16  ;;  %v483_v33 = vrot.slane %v481_v22, 4  ;;  %v6850_v41 = vld [vmem:[%s6800_s13 + $0x14] sm:$0x1]  ;;  %v6861_v53 = vld [vmem:[%s6800_s13 + $0x6c] sm:$0xf] }
  0x23   : > { %v486_v34 = vrot.slane %v484_v23, 5  ;;  %v492_v35 = vrot.slane %v490_v24, 5  ;;  %v496_v38 = vrot.slane %v494_v27, 4  ;;  %v313_v42 = vshrl.u32 %v6837_v29, 16  ;;  %v6865_v58 = vld [vmem:[%s6800_s13 + $0x70] sm:$0xf] }
  0x24   : > { %v296_v36 = vrot.slane %v295_v25, 4  ;;  %v306_v37 = vrot.slane %v305_v26, 4  ;;  %v502_v39 = vrot.slane %v500_v28, 5  ;;  %v316_v43 = vshll.u32 %v6837_v29, 16  ;;  %v6873_v63 = vld [vmem:[%s6800_s13 + $0x74] sm:$0x1] }
  0x25   : > { %v487_v40 = vor.u32 %v486_v34, %v483_v33  ;;  %v322_v44 = vshll.u32 %v6840_v30, 16  ;;  %v497_v47 = vor.u32 %v496_v38, %v492_v35  ;;  %v326_v48 = vshrl.u32 %v6840_v30, 16  ;;  %v6879_v8 = vld [vmem:[%s6800_s13 + $0x18] sm:$0xf]  ;;  %v6892_v25 = vld [vmem:[%s6800_s13 + $0x20] sm:$0x1] }
  0x26   : > { %v301_v45 = vsel %vm6844_vm4, %v296_v36, %v300_v19  ;;  %v311_v46 = vsel %vm6844_vm4, %v306_v37, %v310_v21  ;;  %v315_v51 = vrot.slane %v313_v42, 4  ;;  %v318_v52 = vrot.slane %v316_v43, 5  ;;  %v6886_v21 = vld [vmem:[%s6800_s13 + $0x1c] sm:$0xf]  ;;  %s6564_s10 = scalar_lea.vmem %s6563_s9, 4096 }
  0x27   : > { %v5267_v49 = vcombine.low %v301_v45, %v311_v46  ;;  %v488_v50 = vrot.slane %v487_v40, 4  ;;  %v498_v54 = vrot.slane %v497_v47, 4  ;;  %v324_v55 = vrot.slane %v322_v44, 5  ;;  %v6905_v40 = vld [vmem:[%s9470_s1 + $0x8] sm:$0x3] }
  0x28   : > { %v328_v56 = vrot.slane %v326_v48, 4  ;;  %v332_v57 = vshll.u32 %v6850_v41, 16  ;;  %v319_v60 = vor.u32 %v318_v52, %v315_v51  ;;  %v505_v3 = vshrl.u32 %v6861_v53, 16  ;;  %v6910_v46 = vld [vmem:[%s6800_s13 + $0x7c] sm:$0xf] }
  0x29   : > { %6124 = vmatprep.mubr.msk.bf16.mxu0 %vm722_vm3, %v5267_v49  ;;  %v493_v59 = vsel %vm6844_vm4, %v488_v50, %v492_v35  ;;  %v503_v0 = vsel %vm6844_vm4, %v498_v54, %v502_v39  ;;  %v508_v11 = vshll.u32 %v6861_v53, 16  ;;  %v514_v13 = vshll.u32 %v6865_v58, 16  ;;  %v6899_v35 = vld [vmem:[%s6800_s13 + $0x78] sm:$0xf] }
  0x2a   : > { %v329_v1 = vor.u32 %v328_v56, %v324_v55  ;;  %v334_v2 = vrot.slane %v332_v57, 5  ;;  %v5275_v9 = vcombine.low %v493_v59, %v503_v0  ;;  %v320_v10 = vrot.slane %v319_v60, 4  ;;  %v6917_v56 = vld [vmem:[%s6800_s13 + $0x80] sm:$0x1] }
  0x2b   : > { %v507_v18 = vrot.slane %v505_v3, 4  ;;  %v518_v19 = vshrl.u32 %v6865_v58, 16  ;;  %v524_v20 = vshll.u32 %v6873_v63, 16  ;;  %v510_v23 = vrot.slane %v508_v11, 5  ;;  %9512 = vst [vmem:[#allocation9_spill] sm:$0xff] %v6917_v56 }
  0x2c   : > { %v330_v17 = vrot.slane %v329_v1, 4  ;;  %6140 = vmatprep.mubr.msk.bf16.mxu1 %vm722_vm3, %v5275_v9  ;;  %v325_v22 = vsel %vm6844_vm4, %v320_v10, %v324_v55  ;;  %v516_v24 = vrot.slane %v514_v13, 5  ;;  %v337_v26 = vshrl.u32 %v6879_v8, 16  ;;  %v6923_v1 = vld [vmem:[%s6800_s13 + $0x24] sm:$0xf] }
  0x2d   : > { %v520_v28 = vrot.slane %v518_v19, 4  ;;  %v526_v33 = vrot.slane %v524_v20, 5  ;;  %v340_v34 = vshll.u32 %v6879_v8, 16  ;;  %v511_v37 = vor.u32 %v510_v23, %v507_v18  ;;  %v6931_v10 = vld [vmem:[%s6800_s13 + $0x28] sm:$0xf] }
  0x2e   : > { %v335_v27 = vsel %vm6844_vm4, %v330_v17, %v334_v2  ;;  %v339_v38 = vrot.slane %v337_v26, 4  ;;  %v346_v39 = vshll.u32 %v6886_v21, 16  ;;  %v350_v44 = vshrl.u32 %v6886_v21, 16  ;;  %v6937_v19 = vld [vmem:[%s9470_s1 + $0x6] sm:$0x3] }
  0x2f   : > { %v5268_v36 = vcombine.low %v325_v22, %v335_v27  ;;  %v521_v42 = vor.u32 %v520_v28, %v516_v24  ;;  %v342_v43 = vrot.slane %v340_v34, 5  ;;  %v356_v45 = vshll.u32 %v6892_v25, 16 }
  0x30   : > { %v512_v47 = vrot.slane %v511_v37, 4  ;;  %v348_v48 = vrot.slane %v346_v39, 5  ;;  %v529_v49 = vshrl.u32 %v6899_v35, 16  ;;  %v532_v50 = vshll.u32 %v6899_v35, 16 }
  0x31   : > { %6125 = vmatmul.mubr.msk.bf16.vlgmr.msra.gmra.mxu0 %vm722_vm3, %v5268_v36  ;;  %v522_v51 = vrot.slane %v521_v42, 4  ;;  %v343_v52 = vor.u32 %v342_v43, %v339_v38  ;;  %v352_v54 = vrot.slane %v350_v44, 4  ;;  %v358_v55 = vrot.slane %v356_v45, 5  ;;  %v6949_v36 = vld [vmem:[%s6800_s13 + $0x84] sm:$0xf] }
  0x32   : > { %6191 = vmatpush3.bf16.msra.mxu0 %v6829_v16  ;;  %v517_v57 = vsel %vm6844_vm4, %v512_v47, %v516_v24  ;;  %v531_v59 = vrot.slane %v529_v49, 4  ;;  %v534_v60 = vrot.slane %v532_v50, 5  ;;  %v538_v0 = vshll.u32 %v6910_v46, 16  ;;  %v6942_v24 = vld [vmem:[%s6800_s13 + $0x2c] sm:$0x1] }
  0x33   : > { %6435 = vmatprep.subr.msk.bf16.mxu0 %vm771_vm0, %v6905_v40  ;;  %v527_v16 = vsel %vm6844_vm4, %v522_v51, %v526_v33  ;;  %v344_v2 = vrot.slane %v343_v52, 4  ;;  %v353_v3 = vor.u32 %v352_v54, %v348_v48  ;;  %v542_v9 = vshrl.u32 %v6910_v46, 16  ;;  %v6956_v43 = vld [vmem:[%s6800_s13 + $0x88] sm:$0xf]  ;;  %v6964_v51 = vld [vmem:[%s6800_s13 + $0x8c] sm:$0x1] }
  0x34   : > { %v5276_v11 = vcombine.low %v517_v57, %v527_v16  ;;  %v535_v13 = vor.u32 %v534_v60, %v531_v59  ;;  %v540_v17 = vrot.slane %v538_v0, 5  ;;  %v548_v18 = vshll.u32 %v6917_v56, 16  ;;  %9513 = vst [vmem:[#allocation10_spill] sm:$0xff] %v6964_v51  ;;  %v6972_v60 = vld [vmem:[%s6800_s13 + $0x30] sm:$0xf] }
  0x35   : > { %v349_v20 = vsel %vm6844_vm4, %v344_v2, %v348_v48  ;;  %v354_v22 = vrot.slane %v353_v3, 4  ;;  %v544_v23 = vrot.slane %v542_v9, 4  ;;  %v361_v26 = vshrl.u32 %v6923_v1, 16  ;;  %v6977_v9 = vld [vmem:[%s6800_s13 + $0x34] sm:$0xf] }
  0x36   : > { %6141 = vmatmul.mubr.msk.bf16.vlgmr.msra.gmra.mxu1 %vm722_vm3, %v5276_v11  ;;  %v536_v27 = vrot.slane %v535_v13, 4  ;;  %v550_v28 = vrot.slane %v548_v18, 5  ;;  %v364_v33 = vshll.u32 %v6923_v1, 16  ;;  %v370_v34 = vshll.u32 %v6931_v10, 16 }
  0x37   : > { %6157 = vmatpush3.bf16.msra.mxu1 %v6803_v4  ;;  %v359_v37 = vsel %vm6844_vm4, %v354_v22, %v358_v55  ;;  %v545_v38 = vor.u32 %v544_v23, %v540_v17  ;;  %v363_v39 = vrot.slane %v361_v26, 4  ;;  %v374_v42 = vshrl.u32 %v6931_v10, 16 }
  0x38   : > { %v5269_v44 = vcombine.low %v349_v20, %v359_v37  ;;  %v541_v45 = vsel %vm6844_vm4, %v536_v27, %v540_v17  ;;  %v366_v47 = vrot.slane %v364_v33, 5  ;;  %v372_v48 = vrot.slane %v370_v34, 5  ;;  %6434 = vmatprep.subr.msk.bf16.mxu1 %vm771_vm0, %v6937_v19  ;;  %v6985_v33 = vld [vmem:[%s6800_s13 + $0x38] sm:$0x1] }
  0x39   : > { %v546_v4 = vrot.slane %v545_v38, 4  ;;  %v376_v49 = vrot.slane %v374_v42, 4  ;;  %v380_v50 = vshll.u32 %v6942_v24, 16  ;;  %v553_v52 = vshrl.u32 %v6949_v36, 16  ;;  %v6990_v38 = vld [vmem:[%s6800_s13 + $0x90] sm:$0xf] }
  0x3a   : > { %6128 = vmatprep.mubr.msk.bf16.mxu0 %vm722_vm3, %v5269_v44  ;;  %v367_v54 = vor.u32 %v366_v47, %v363_v39  ;;  %v556_v55 = vshll.u32 %v6949_v36, 16  ;;  %v562_v57 = vshll.u32 %v6956_v43, 16  ;;  %v566_v59 = vshrl.u32 %v6956_v43, 16  ;;  %9514 = vst [vmem:[#allocation11_spill] sm:$0xff] %v6990_v38  ;;  %v6995_v47 = vld [vmem:[%s6800_s13 + $0x94] sm:$0xf] }
  0x3b   : > { %v551_v0 = vsel %vm6844_vm4, %v546_v4, %v550_v28  ;;  %v377_v16 = vor.u32 %v376_v49, %v372_v48  ;;  %v382_v2 = vrot.slane %v380_v50, 5  ;;  %v555_v3 = vrot.slane %v553_v52, 4  ;;  %9515 = vst [vmem:[#allocation12_spill] sm:$0xff] %v6995_v47 }
  0x3c   : > { %v5277_v11 = vcombine.low %v541_v45, %v551_v0  ;;  %v368_v13 = vrot.slane %v367_v54, 4  ;;  %v558_v17 = vrot.slane %v556_v55, 5  ;;  %v564_v18 = vrot.slane %v562_v57, 5 }
  0x3d   : > { %v378_v20 = vrot.slane %v377_v16, 4  ;;  %v568_v22 = vrot.slane %v566_v59, 4  ;;  %v572_v23 = vshll.u32 %v6964_v51, 16  ;;  %v385_v26 = vshrl.u32 %v6972_v60, 16  ;;  %v7004_v16 = vld [vmem:[%s6800_s13 + $0x98] sm:$0x1] }
  0x3e   : > { %6144 = vmatprep.mubr.msk.bf16.mxu1 %vm722_vm3, %v5277_v11  ;;  %v373_v27 = vsel %vm6844_vm4, %v368_v13, %v372_v48  ;;  %v559_v28 = vor.u32 %v558_v17, %v555_v3  ;;  %v388_v34 = vshll.u32 %v6972_v60, 16  ;;  %v394_v37 = vshll.u32 %v6977_v9, 16  ;;  %9516 = vst [vmem:[#allocation13_spill] sm:$0xff] %v7004_v16  ;;  %v7009_v11 = vld [vmem:[%s6800_s13 + $0x3c] sm:$0xf] }
  0x3f   : > { %v383_v39 = vsel %vm6844_vm4, %v378_v20, %v382_v2  ;;  %v569_v42 = vor.u32 %v568_v22, %v564_v18  ;;  %v574_v44 = vrot.slane %v572_v23, 5  ;;  %v387_v45 = vrot.slane %v385_v26, 4  ;;  %v7014_v23 = vld [vmem:[%s6800_s13 + $0x40] sm:$0xf]  ;;  %v1229_v51 = vld [vmem:[%s6800_s13 + $0xc] sm:$0xe] }
  0x40   : > { %v5270_v48 = vcombine.low %v373_v27, %v383_v39  ;;  %v560_v4 = vrot.slane %v559_v28, 4  ;;  %v390_v49 = vrot.slane %v388_v34, 5  ;;  %v396_v50 = vrot.slane %v394_v37, 5 }
  0x41   : > { %v570_v52 = vrot.slane %v569_v42, 4  ;;  %v398_v54 = vshrl.u32 %v6977_v9, 16  ;;  %v404_v55 = vshll.u32 %v6985_v33, 16  ;;  %v577_v57 = vshrl.u32 %v6990_v38, 16 }
  0x42   : > { %6129 = vmatmul.mubr.msk.bf16.gmra.mxu0 %vm722_vm3, %v5270_v48  ;;  %v565_v59 = vsel %vm6844_vm4, %v560_v4, %v564_v18  ;;  %v391_v0 = vor.u32 %v390_v49, %v387_v45  ;;  %v580_v2 = vshll.u32 %v6990_v38, 16  ;;  %v586_v3 = vshll.u32 %v6995_v47, 16  ;;  %v7023_v48 = vld [vmem:[%s6800_s13 + $0x44] sm:$0x1] }
  0x43   : > { %v575_v13 = vsel %vm6844_vm4, %v570_v52, %v574_v44  ;;  %v400_v17 = vrot.slane %v398_v54, 4  ;;  %v406_v20 = vrot.slane %v404_v55, 5  ;;  %v579_v22 = vrot.slane %v577_v57, 4  ;;  %v7028_v52 = vld [vmem:[%s6800_s13 + $0x9c] sm:$0xf] }
  0x44   : > { %v5278_v18 = vcombine.low %v565_v59, %v575_v13  ;;  %v392_v26 = vrot.slane %v391_v0, 4  ;;  %v582_v27 = vrot.slane %v580_v2, 5  ;;  %v588_v28 = vrot.slane %v586_v3, 5  ;;  %9517 = vst [vmem:[#allocation14_spill] sm:$0xff] %v7028_v52  ;;  %v7032_v13 = vld [vmem:[%s6800_s13 + $0xa0] sm:$0xf] }
  0x45   : > { %v401_v34 = vor.u32 %v400_v17, %v396_v50  ;;  %v590_v37 = vshrl.u32 %v6995_v47, 16  ;;  %v596_v39 = vshll.u32 %v7004_v16, 16  ;;  %v409_v42 = vshrl.u32 %v7009_v11, 16  ;;  %9518 = vst [vmem:[#allocation15_spill] sm:$0xff] %v7032_v13 }
  0x46   : > { %6145 = vmatmul.mubr.msk.bf16.gmra.mxu1 %vm722_vm3, %v5278_v18  ;;  %v397_v44 = vsel %vm6844_vm4, %v392_v26, %v396_v50  ;;  %v583_v45 = vor.u32 %v582_v27, %v579_v22  ;;  %v412_v4 = vshll.u32 %v7009_v11, 16  ;;  %v418_v49 = vshll.u32 %v7014_v23, 16  ;;  %v7038_v26 = vld [vmem:[%s6800_s13 + $0xa4] sm:$0x1] }
  0x47   : > { %v402_v54 = vrot.slane %v401_v34, 4  ;;  %v592_v55 = vrot.slane %v590_v37, 4  ;;  %v598_v57 = vrot.slane %v596_v39, 5  ;;  %v411_v59 = vrot.slane %v409_v42, 4  ;;  %9519 = vst [vmem:[#allocation16_spill] sm:$0xff] %v7038_v26 }
  0x48   : > { %v584_v0 = vrot.slane %v583_v45, 4  ;;  %v414_v2 = vrot.slane %v412_v4, 5  ;;  %v420_v3 = vrot.slane %v418_v49, 5  ;;  %v422_v50 = vshrl.u32 %v7014_v23, 16  ;;  %v7042_v34 = vld [vmem:[%s6800_s13 + $0x48] sm:$0xf] }
  0x49   : > { %v407_v17 = vsel %vm6844_vm4, %v402_v54, %v406_v20  ;;  %v593_v22 = vor.u32 %v592_v55, %v588_v28  ;;  %v428_v18 = vshll.u32 %v7023_v48, 16  ;;  %v601_v27 = vshrl.u32 %v7028_v52, 16 }
  0x4a   : > { %v5271_v37 = vcombine.low %v397_v44, %v407_v17  ;;  %v589_v39 = vsel %vm6844_vm4, %v584_v0, %v588_v28  ;;  %v415_v42 = vor.u32 %v414_v2, %v411_v59  ;;  %v424_v45 = vrot.slane %v422_v50, 4  ;;  %v7051_v17 = vld [vmem:[%s6800_s13 + $0x4c] sm:$0xf]  ;;  %v7057_v2 = vld [vmem:[%s6800_s13 + $0x50] sm:$0x1] }
  0x4b   : > { %v594_v4 = vrot.slane %v593_v22, 4  ;;  %v430_v49 = vrot.slane %v428_v18, 5  ;;  %v603_v20 = vrot.slane %v601_v27, 4  ;;  %v604_v54 = vshll.u32 %v7028_v52, 16 }
  0x4c   : > { %6132 = vmatprep.mubr.msk.bf16.mxu0 %vm722_vm3, %v5271_v37  ;;  %v416_v55 = vrot.slane %v415_v42, 4  ;;  %v425_v62 = vor.u32 %v424_v45, %v420_v3  ;;  %v610_v32 = vshll.u32 %v7032_v13, 16  ;;  %v614_v44 = vshrl.u32 %v7032_v13, 16  ;;  %v7063_v42 = vld [vmem:[%s6800_s13 + $0xa8] sm:$0xf] }
  0x4d   : > { %v599_v28 = vsel %vm6844_vm4, %v594_v4, %v598_v57  ;;  %v606_v59 = vrot.slane %v604_v54, 5  ;;  %v620_v0 = vshll.u32 %v7038_v26, 16  ;;  %v433_v50 = vshrl.u32 %v7042_v34, 16  ;;  %9520 = vst [vmem:[#allocation17_spill] sm:$0xff] %v7063_v42 }
  0x4e   : > { %v5279_v22 = vcombine.low %v589_v39, %v599_v28  ;;  %v421_v18 = vsel %vm6844_vm4, %v416_v55, %v420_v3  ;;  %v426_v27 = vrot.slane %v425_v62, 4  ;;  %v612_v37 = vrot.slane %v610_v32, 5 }
  0x4f   : > { %v607_v45 = vor.u32 %v606_v59, %v603_v20  ;;  %v616_v61 = vrot.slane %v614_v44, 4  ;;  %v622_v57 = vrot.slane %v620_v0, 5  ;;  %v435_v4 = vrot.slane %v433_v50, 4  ;;  %v7073_v44 = vld [vmem:[%s6800_s13 + $0xac] sm:$0xf] }
  0x50   : > { %6148 = vmatprep.mubr.msk.bf16.mxu1 %vm722_vm3, %v5279_v22  ;;  %v431_v54 = vsel %vm6844_vm4, %v426_v27, %v430_v49  ;;  %v436_v39 = vshll.u32 %v7042_v34, 16  ;;  %v442_v28 = vshll.u32 %v7051_v17, 16  ;;  %v446_v62 = vshrl.u32 %v7051_v17, 16  ;;  %9521 = vst [vmem:[#allocation18_spill] sm:$0xff] %v7073_v44  ;;  %v7076_v22 = vld [vmem:[%s6800_s13 + $0xb0] sm:$0x1] }
  0x51   : > { %v5272_v3 = vcombine.low %v421_v18, %v431_v54  ;;  %v608_v32 = vrot.slane %v607_v45, 4  ;;  %v617_v55 = vor.u32 %v616_v61, %v612_v37  ;;  %v452_v20 = vshll.u32 %v7057_v2, 16  ;;  %9522 = vst [vmem:[#allocation19_spill] sm:$0xff] %v7076_v22 }
  0x52   : > { %v438_v59 = vrot.slane %v436_v39, 5  ;;  %v444_v0 = vrot.slane %v442_v28, 5  ;;  %v448_v50 = vrot.slane %v446_v62, 4  ;;  %v625_v49 = vshrl.u32 %v7063_v42, 16  ;;  %v7085_v62 = vld [vmem:[%s6800_s13 + $0x54] sm:$0xf] }
  0x53   : > { %6133 = vmatmul.mubr.msk.bf16.gmra.mxu0 %vm722_vm3, %v5272_v3  ;;  %v613_v18 = vsel %vm6844_vm4, %v608_v32, %v612_v37  ;;  %v618_v27 = vrot.slane %v617_v55, 4  ;;  %v454_v61 = vrot.slane %v452_v20, 5  ;;  %v628_v45 = vshll.u32 %v7063_v42, 16  ;;  %v7092_v55 = vld [vmem:[%s6800_s13 + $0x58] sm:$0xf] }
  0x54   : > { %v439_v54 = vor.u32 %v438_v59, %v435_v4  ;;  %v449_v56 = vor.u32 %v448_v50, %v444_v0  ;;  %v627_v39 = vrot.slane %v625_v49, 4  ;;  %v634_v28 = vshll.u32 %v7073_v44, 16  ;;  %v7095_v49 = vld [vmem:[%s6800_s13 + $0x5c] sm:$0x1] }
  0x55   : > { %v623_v3 = vsel %vm6844_vm4, %v618_v27, %v622_v57  ;;  %v630_v26 = vrot.slane %v628_v45, 5  ;;  %v638_v37 = vshrl.u32 %v7073_v44, 16  ;;  %v644_v32 = vshll.u32 %v7076_v22, 16  ;;  %v1228_v22 = vld [vmem:[%s6800_s13] sm:$0xe] }
  0x56   : > { %v5280_v4 = vcombine.low %v613_v18, %v623_v3  ;;  %v440_v20 = vrot.slane %v439_v54, 4  ;;  %v450_v59 = vrot.slane %v449_v56, 4  ;;  %v636_v50 = vrot.slane %v634_v28, 5  ;;  %v7106_v54 = vld [vmem:[%s6800_s13 + $0xb4] sm:$0xf] }
  0x57   : > { %v631_v42 = vor.u32 %v630_v26, %v627_v39  ;;  %v640_v52 = vrot.slane %v638_v37, 4  ;;  %v646_v13 = vrot.slane %v644_v32, 5  ;;  %v457_v57 = vshrl.u32 %v7085_v62, 16  ;;  %9523 = vst [vmem:[#allocation20_spill] sm:$0xff] %v7106_v54  ;;  %v7109_v37 = vld [vmem:[%s6800_s13 + $0xb8] sm:$0xf] }
  0x58   : > { %6149 = vmatmul.mubr.msk.bf16.gmra.mxu1 %vm722_vm3, %v5280_v4  ;;  %v445_v27 = vsel %vm6844_vm4, %v440_v20, %v444_v0  ;;  %v455_v18 = vsel %vm6844_vm4, %v450_v59, %v454_v61  ;;  %v460_v56 = vshll.u32 %v7085_v62, 16  ;;  %v466_v45 = vshll.u32 %v7092_v55, 16  ;;  %v7114_v61 = vld [vmem:[%s6800_s13 + $0xbc] sm:$0x1] }
  0x59   : > { %v5273_v26 = vcombine.low %v445_v27, %v455_v18  ;;  %v632_v39 = vrot.slane %v631_v42, 4  ;;  %v641_v28 = vor.u32 %v640_v52, %v636_v50  ;;  %v459_v3 = vrot.slane %v457_v57, 4 }
  0x5a   : > { %v462_v32 = vrot.slane %v460_v56, 5  ;;  %v468_v4 = vrot.slane %v466_v45, 5  ;;  %v470_v0 = vshrl.u32 %v7092_v55, 16  ;;  %v476_v20 = vshll.u32 %v7095_v49, 16 }
  0x5b   : > { %6136 = vmatprep.mubr.msk.bf16.mxu0 %vm722_vm3, %v5273_v26  ;;  %v637_v59 = vsel %vm6844_vm4, %v632_v39, %v636_v50  ;;  %v642_v27 = vrot.slane %v641_v28, 4  ;;  %v649_v52 = vshrl.u32 %v7106_v54, 16  ;;  %v652_v42 = vshll.u32 %v7106_v54, 16 }
  0x5c   : > { %v463_v57 = vor.u32 %v462_v32, %v459_v3  ;;  %v472_v18 = vrot.slane %v470_v0, 4  ;;  %v478_v56 = vrot.slane %v476_v20, 5  ;;  %v658_v45 = vshll.u32 %v7109_v37, 16 }
  0x5d   : > { %v647_v44 = vsel %vm6844_vm4, %v642_v27, %v646_v13  ;;  %v651_v16 = vrot.slane %v649_v52, 4  ;;  %v654_v26 = vrot.slane %v652_v42, 5  ;;  %v662_v38 = vshrl.u32 %v7109_v37, 16 }
  0x5e   : > { %v5281_v50 = vcombine.low %v637_v59, %v647_v44  ;;  %v464_v39 = vrot.slane %v463_v57, 4  ;;  %v473_v28 = vor.u32 %v472_v18, %v468_v4  ;;  %v660_v47 = vrot.slane %v658_v45, 5  ;;  %v1230_v57 = vld [vmem:[%s6800_s13 + $0x18] sm:$0xe] }
  0x5f   : > { %v655_v54 = vor.u32 %v654_v26, %v651_v16  ;;  %v664_v3 = vrot.slane %v662_v38, 4  ;;  %v668_v32 = vshll.u32 %v7114_v61, 16  ;;  %v5331_v13 = vrot.slane %v1228_v22, 9 }
  0x60   : > { %6152 = vmatprep.mubr.msk.bf16.mxu1 %vm722_vm3, %v5281_v50  ;;  %v469_v44 = vsel %vm6844_vm4, %v464_v39, %v468_v4  ;;  %v474_v20 = vrot.slane %v473_v28, 4  ;;  %v1281_v59 = vrot.slane %v6809_v6, 5  ;;  %v5300_v38 = vcombine.low %v6837_v29, %v6840_v30 }
  0x61   : > { %v656_v16 = vrot.slane %v655_v54, 4  ;;  %v665_v27 = vor.u32 %v664_v3, %v660_v47  ;;  %v670_v52 = vrot.slane %v668_v32, 5  ;;  %v5332_v42 = vrot.slane %v1229_v51, 9 }
  0x62   : > { %v479_v18 = vsel %vm6844_vm4, %v474_v20, %v478_v56  ;;  %v1282_v22 = vsel %vm7130_vm7, %v5331_v13, %v1281_v59  ;;  %v1283_v45 = vrot.slane %v1281_v59, 4  ;;  %v9526_v4 = vrot.slane %v6840_v30, 5 }
  0x63   : > { %v5274_v50 = vcombine.low %v469_v44, %v479_v18  ;;  %v661_v54 = vsel %vm6844_vm4, %v656_v16, %v660_v47  ;;  %v666_v39 = vrot.slane %v665_v27, 4  ;;  %v5299_v51 = vcombine.low %v6806_v5, %v6809_v6  ;;  %v1231_v27 = vld [vmem:[%s6800_s13 + $0x24] sm:$0xe] }
  0x64   : > { %v1290_v26 = vrot.slane %v9526_v4, 4  ;;  %v9527_v28 = vrot.slane %v6812_v7, 5  ;;  %v9528_v3 = vmov %v9526_v4  ;;  %v5301_v13 = vcombine.low %v6879_v8, %v6886_v21  ;;  %v1233_v4 = vld [vmem:[%s6800_s13 + $0x3c] sm:$0xe] }
  0x65   : > { %v1289_v32 = vsel %vm7130_vm7, %v5332_v42, %v9528_v3  ;;  %v5333_v44 = vrot.slane %v1230_v57, 9  ;;  %6137 = vmatmul.mubr.msk.bf16.gmra.mxu0 %vm722_vm3, %v5274_v50  ;;  %v671_v47 = vsel %vm6844_vm4, %v666_v39, %v670_v52  ;;  %v9529_v6 = vrot.slane %v6850_v41, 5  ;;  %v1232_v42 = vld [vmem:[%s6800_s13 + $0x30] sm:$0xe]  ;;  %v1234_v39 = vld [vmem:[%s6800_s13 + $0x48] sm:$0xe] }
  0x66   : > { %v1285_v56 = vsel %vm7130_vm7, %v1283_v45, %v9527_v28  ;;  %v1295_v20 = vrot.slane %v6886_v21, 5  ;;  %v5282_v59 = vcombine.low %v661_v54, %v671_v47  ;;  %v1298_v16 = vrot.slane %v6892_v25, 5  ;;  %v1235_v47 = vld [vmem:[%s6800_s13 + $0x54] sm:$0xe]  ;;  %v7425_v21 = vld [vmem:[%s6800_s13 + $0x2c] sm:$0x1] }
  0x67   : > { %v5348_v5 = vcombine.low %v1282_v22, %v1285_v56  ;;  %v1292_v7 = vsel %vm7130_vm7, %v1290_v26, %v9529_v6  ;;  %v1852_v52 = vsel %vm771_vm0, %v6937_v19, 0  ;;  %v1302_v18 = vrot.slane %v6931_v10, 5 }
  0x68   : > { %v1296_v41 = vsel %vm7130_vm7, %v5333_v44, %v1295_v20  ;;  %v1297_v57 = vrot.slane %v1295_v20, 4  ;;  %6153 = vmatmul.mubr.msk.bf16.gmra.mxu1 %vm722_vm3, %v5282_v59  ;;  %v5349_v22 = vcombine.low %v1289_v32, %v1292_v7  ;;  %v2578_v25 = vsel %vm771_vm0, %v6905_v40, 0 }
  0x69   : > { %6192 = vmatprep.mubr.msk.bf16.mxu0 %vm722_vm3, %v5348_v5  ;;  %v1309_v45 = vrot.slane %v6977_v9, 5  ;;  %6158 = vmatprep.mubr.msk.bf16.mxu1 %vm722_vm3, %v5299_v51  ;;  %v5334_v26 = vrot.slane %v1231_v27, 9  ;;  %v1305_v50 = vrot.slane %v6942_v24, 5  ;;  %v5335_v54 = vrot.slane %v1232_v42, 9  ;;  %v7197_v24 = vld [vmem:[%s9470_s1 + $0xc] sm:$0x3] }
  0x6a   : > { %v1299_v19 = vsel %vm7130_vm7, %v1297_v57, %v1298_v16  ;;  %v1304_v56 = vrot.slane %v1302_v18, 4  ;;  %v1312_v32 = vrot.slane %v6985_v33, 5  ;;  %v5336_v44 = vrot.slane %v1233_v4, 9 }
  0x6b   : > { %v5350_v28 = vcombine.low %v1296_v41, %v1299_v19  ;;  %v1311_v3 = vrot.slane %v1309_v45, 4  ;;  %v1316_v40 = vrot.slane %v7014_v23, 5  ;;  %v1340_v5 = vrot.slane %v6826_v15, 5 }
  0x6c   : > { %v1319_v51 = vrot.slane %v7023_v48, 5  ;;  %v5337_v6 = vrot.slane %v1234_v39, 9  ;;  %v1323_v7 = vrot.slane %v7051_v17, 5  ;;  %v5302_v33 = vcombine.low %v6923_v1, %v6931_v10  ;;  %v1236_v1 = vld [vmem:[%s6800_s13 + $0x60] sm:$0xe] }
  0x6d   : > { %6193 = vmatmul.mubr.msk.bf16.vlgmr.msra.gmra.mxu0 %vm722_vm3, %v5349_v22  ;;  %v1303_v20 = vsel %vm7130_vm7, %v5334_v26, %v1302_v18  ;;  %v1318_v59 = vrot.slane %v1316_v40, 4  ;;  %v1326_v16 = vrot.slane %v7057_v2, 5  ;;  %v1306_v48 = vsel %vm7130_vm7, %v1304_v56, %v1305_v50  ;;  %v7225_v22 = vld [vmem:[%s9470_s1 + $0xa] sm:$0x3]  ;;  %v7250_v50 = vld [vmem:[%s6800_s13 + $0x6c] sm:$0xe] }
  0x6e   : > { %6259 = vmatpush3.bf16.msra.mxu0 %v2578_v25  ;;  %6196 = vmatprep.mubr.msk.bf16.mxu0 %vm722_vm3, %v5350_v28  ;;  %v1310_v27 = vsel %vm7130_vm7, %v5335_v54, %v1309_v45  ;;  %v1313_v42 = vsel %vm7130_vm7, %v1311_v3, %v1312_v32  ;;  %v1325_v41 = vrot.slane %v1323_v7, 4  ;;  %v7215_v10 = vsel %vm7130_vm7, %v5336_v44, %v1316_v40  ;;  %v1239_v39 = vld [vmem:[%s6800_s13 + $0x84] sm:$0xe]  ;;  %v7279_v44 = vld [vmem:[%s6800_s13 + $0x78] sm:$0xe] }
  0x6f   : > { %v7219_v2 = vsel %vm7130_vm7, %v5337_v6, %v1323_v7  ;;  %v5338_v57 = vrot.slane %v1235_v47, 9  ;;  %v1330_v18 = vrot.slane %v7092_v55, 5  ;;  %6437 = vmatprep.subr.msk.bf16.mxu0 %vm771_vm0, %v7197_v24  ;;  %v7235_v25 = vsel %vm7130_vm7, %v1318_v59, %v1319_v51  ;;  %v1240_v40 = vld [vmem:[%s6800_s13 + $0x90] sm:$0xe] }
  0x70   : > { %6159 = vmatmul.mubr.msk.bf16.vlgmr.msra.gmra.mxu1 %vm722_vm3, %v5300_v38  ;;  %v7239_v45 = vsel %vm7130_vm7, %v1325_v41, %v1326_v16  ;;  %v1333_v4 = vrot.slane %v7095_v49, 5  ;;  %v1337_v19 = vrot.slane %v6823_v14, 5  ;;  %v5351_v29 = vcombine.low %v1303_v20, %v1306_v48  ;;  %v9530_v48 = vld [vmem:[#allocation10_spill] sm:$0xff] }
  0x71   : > { %6225 = vmatpush3.bf16.msra.mxu1 %v1852_v52  ;;  %6162 = vmatprep.mubr.msk.bf16.mxu1 %vm722_vm3, %v5301_v13  ;;  %v5303_v30 = vcombine.low %v6972_v60, %v6977_v9  ;;  %v1332_v38 = vrot.slane %v1330_v18, 4  ;;  %v5339_v26 = vrot.slane %v1236_v1, 9  ;;  %v5352_v49 = vcombine.low %v1310_v27, %v1313_v42  ;;  %v1241_v42 = vld [vmem:[%s6800_s13 + $0x9c] sm:$0xe] }
  0x72   : > { %v5304_v52 = vcombine.low %v7009_v11, %v7014_v23  ;;  %v5305_v8 = vcombine.low %v7042_v34, %v7051_v17  ;;  %6436 = vmatprep.subr.msk.bf16.mxu1 %vm771_vm0, %v7225_v22  ;;  %v5353_v60 = vcombine.low %v7215_v10, %v7235_v25  ;;  %v5354_v9 = vcombine.low %v7219_v2, %v7239_v45  ;;  %v9531_v10 = vld [vmem:[#allocation12_spill] sm:$0xff]  ;;  %v9532_v2 = vld [vmem:[#allocation11_spill] sm:$0xff] }
  0x73   : > { %v1339_v54 = vrot.slane %v1337_v19, 4  ;;  %v7269_v28 = vsel %vm7130_vm7, %v5338_v57, %v1330_v18  ;;  %v7273_v56 = vsel %vm7130_vm7, %v1332_v38, %v1333_v4  ;;  %v5340_v32 = vrot.slane %v7250_v50, 9  ;;  %v1242_v18 = vld [vmem:[%s6800_s13 + $0xa8] sm:$0xe]  ;;  %v9534_v38 = vld [vmem:[#allocation15_spill] sm:$0xff] }
  0x74   : > { %v7285_v47 = vsel %vm7130_vm7, %v5339_v26, %v1337_v19  ;;  %v1344_v51 = vrot.slane %v6865_v58, 5  ;;  %v1347_v6 = vrot.slane %v6873_v63, 5  ;;  %v5342_v59 = vrot.slane %v1239_v39, 9  ;;  %v9533_v19 = vld [vmem:[#allocation13_spill] sm:$0xff]  ;;  %v9535_v26 = vld [vmem:[#allocation14_spill] sm:$0xff] }
  0x75   : > { %6197 = vmatmul.mubr.msk.bf16.gmra.mxu0 %vm722_vm3, %v5351_v29  ;;  %v1358_v16 = vrot.slane %v6956_v43, 5  ;;  %v1361_v27 = vrot.slane %v9530_v48, 5  ;;  %v5355_v41 = vcombine.low %v7269_v28, %v7273_v56  ;;  %v7303_v63 = vsel %vm7130_vm7, %v1339_v54, %v1340_v5  ;;  %v9537_v48 = vld [vmem:[#allocation18_spill] sm:$0xff] }
  0x76   : > { %6200 = vmatprep.mubr.msk.bf16.mxu0 %vm722_vm3, %v5352_v49  ;;  %v5341_v1 = vrot.slane %v7279_v44, 9  ;;  %v5343_v4 = vrot.slane %v1240_v40, 9  ;;  %v1365_v15 = vrot.slane %v9531_v10, 5  ;;  %v1346_v5 = vrot.slane %v1344_v51, 4  ;;  %v5445_v57 = vld [vmem:[%s6800_s13 + $0xc] sm:$0xf] }
  0x77   : > { %v7312_v25 = vsel %vm7130_vm7, %v5342_v59, %v1358_v16  ;;  %v1360_v45 = vrot.slane %v1358_v16, 4  ;;  %v1368_v29 = vrot.slane %v9533_v19, 5  ;;  %v5344_v49 = vrot.slane %v1241_v42, 9  ;;  %v9536_v59 = vld [vmem:[#allocation16_spill] sm:$0xff]  ;;  %v9538_v42 = vld [vmem:[#allocation17_spill] sm:$0xff] }
  0x78   : > { %6163 = vmatmul.mubr.msk.bf16.gmra.mxu1 %vm722_vm3, %v5302_v33  ;;  %v1351_v33 = vrot.slane %v6910_v46, 5  ;;  %v7326_v39 = vsel %vm7130_vm7, %v5343_v4, %v1365_v15  ;;  %v1367_v44 = vrot.slane %v1365_v15, 4  ;;  %v1372_v40 = vrot.slane %v9534_v38, 5  ;;  %v9539_v15 = vld [vmem:[#allocation19_spill] sm:$0xff] }
  0x79   : > { %6166 = vmatprep.mubr.msk.bf16.mxu1 %vm722_vm3, %v5303_v30  ;;  %v7322_v54 = vsel %vm7130_vm7, %v1360_v45, %v1361_v27  ;;  %v1375_v16 = vrot.slane %v9536_v59, 5  ;;  %v5345_v45 = vrot.slane %v1242_v18, 9  ;;  %v1379_v4 = vrot.slane %v9537_v48, 5 }
  0x7a   : > { %v7336_v27 = vsel %vm7130_vm7, %v1367_v44, %v1368_v29  ;;  %v1382_v50 = vrot.slane %v9539_v15, 5  ;;  %v7346_v19 = vsel %vm7130_vm7, %v5344_v49, %v1372_v40  ;;  %v1374_v7 = vrot.slane %v1372_v40, 4  ;;  %v9540_v29 = vld [vmem:[#allocation20_spill] sm:$0xff]  ;;  %v9541_v15 = vld [vmem:[#allocation9_spill] sm:$0xff]  ;;  %v7361_v49 = vld [vmem:[%s6800_s13 + $0x10] sm:$0xf] }
  0x7b   : > { %v7353_v18 = vsel %vm7130_vm7, %v5340_v32, %v1344_v51  ;;  %v7358_v59 = vsel %vm7130_vm7, %v5345_v45, %v1379_v4  ;;  %v1381_v30 = vrot.slane %v1379_v4, 4  ;;  %v5448_v40 = vld [vmem:[%s6800_s13 + $0x18] sm:$0xf]  ;;  %v1353_v20 = vrot.slane %v1351_v33, 4 }
  0x7c   : > { %v2096_v44 = vshrl.u32 %v5445_v57, 16  ;;  %v2099_v32 = vshll.u32 %v5445_v57, 16  ;;  %v5356_v51 = vcombine.low %v7285_v47, %v7303_v63  ;;  %v7376_v45 = vsel %vm7130_vm7, %v1346_v5, %v1347_v6  ;;  %v1243_v57 = vld [vmem:[%s6800_s13 + $0xb4] sm:$0xe]  ;;  %v7397_v47 = vld [vmem:[%s6800_s13 + $0x14] sm:$0x1] }
  0x7d   : > { %6201 = vmatmul.mubr.msk.bf16.gmra.mxu0 %vm722_vm3, %v5353_v60  ;;  %v1354_v60 = vrot.slane %v9541_v15, 5  ;;  %v7391_v11 = vsel %vm7130_vm7, %v5341_v1, %v1351_v33  ;;  %v2105_v6 = vshll.u32 %v7361_v49, 16  ;;  %v5449_v63 = vld [vmem:[%s6800_s13 + $0x1c] sm:$0xf]  ;;  %v2109_v17 = vshrl.u32 %v7361_v49, 16 }
  0x7e   : > { %6204 = vmatprep.mubr.msk.bf16.mxu0 %vm722_vm3, %v5354_v9  ;;  %v7366_v9 = vsel %vm7130_vm7, %v1374_v7, %v1375_v16  ;;  %v7382_v7 = vsel %vm7130_vm7, %v1381_v30, %v1382_v50  ;;  %v2098_v5 = vrot.slane %v2096_v44, 4  ;;  %v2101_v34 = vrot.slane %v2099_v32, 5  ;;  %v5451_v15 = vld [vmem:[%s6800_s13 + $0x24] sm:$0xf]  ;;  %v7410_v44 = vld [vmem:[%s6800_s13 + $0x28] sm:$0xf] }
  0x7f   : > { %v2120_v50 = vshrl.u32 %v5448_v40, 16  ;;  %v1355_v1 = vsel %vm7130_vm7, %v1353_v20, %v1354_v60  ;;  %v5346_v33 = vrot.slane %v1243_v57, 9  ;;  %v7405_v30 = vrot.slane %v2105_v6, 5 }
  0x80   : > { %6167 = vmatmul.mubr.msk.bf16.gmra.mxu1 %vm722_vm3, %v5304_v52  ;;  %v1386_v52 = vrot.slane %v7109_v37, 5  ;;  %v2123_v16 = vshll.u32 %v5448_v40, 16  ;;  %v1389_v23 = vrot.slane %v7114_v61, 5  ;;  %v2111_v4 = vrot.slane %v2109_v17, 4 }
  0x81   : > { %6170 = vmatprep.mubr.msk.bf16.mxu1 %vm722_vm3, %v5305_v8  ;;  %v5450_v8 = vld [vmem:[%s6800_s13 + $0x20] sm:$0x1]  ;;  %v2122_v3 = vrot.slane %v2120_v50, 4  ;;  %v2129_v13 = vshll.u32 %v5449_v63, 16  ;;  %v2115_v20 = vshll.u32 %v7397_v47, 16  ;;  %v2133_v57 = vshrl.u32 %v5449_v63, 16 }
  0x82   : > { %v1388_v32 = vrot.slane %v1386_v52, 4  ;;  %v2125_v60 = vrot.slane %v2123_v16, 5  ;;  %v5357_v61 = vcombine.low %v7353_v18, %v7376_v45  ;;  %v5358_v40 = vcombine.low %v7391_v11, %v1355_v1 }
  0x83   : > { %v2102_v6 = vor.u32 %v2101_v34, %v2098_v5  ;;  %v7421_v17 = vrot.slane %v2129_v13, 5  ;;  %v2112_v28 = vor.u32 %v2111_v4, %v7405_v30  ;;  %v2139_v50 = vshll.u32 %v5450_v8, 16  ;;  %v7448_v5 = vld [vmem:[%s6800_s13 + $0x34] sm:$0xf] }
  0x84   : > { %v2126_v56 = vor.u32 %v2125_v60, %v2122_v3  ;;  %v7433_v18 = vsel %vm7130_vm7, %v5346_v33, %v1386_v52  ;;  %v2144_v13 = vshrl.u32 %v5451_v15, 16  ;;  %v2147_v45 = vshll.u32 %v5451_v15, 16  ;;  %v5454_v52 = vld [vmem:[%s6800_s13 + $0x30] sm:$0xf] }
  0x85   : > { %6205 = vmatmul.mubr.msk.bf16.gmra.mxu0 %vm722_vm3, %v5355_v41  ;;  %v2135_v41 = vrot.slane %v2133_v57, 4  ;;  %v2153_v11 = vshll.u32 %v7410_v44, 16  ;;  %v9543_v3 = vcombine.low %v6819_v12, %v6823_v14  ;;  %v7442_v4 = vsel %vm7130_vm7, %v1388_v32, %v1389_v23 }
  0x86   : > { %6208 = vmatprep.mubr.msk.bf16.mxu0 %vm722_vm3, %v5356_v51  ;;  %v9542_v51 = vcombine.low %v7085_v62, %v7092_v55  ;;  %v2117_v62 = vrot.slane %v2115_v20, 5  ;;  %v2157_v63 = vshrl.u32 %v7410_v44, 16  ;;  %v2103_v34 = vrot.slane %v2102_v6, 4 }
  0x87   : > { %v2136_v55 = vor.u32 %v2135_v41, %v7421_v17  ;;  %v2146_v8 = vrot.slane %v2144_v13, 4  ;;  %v2149_v1 = vrot.slane %v2147_v45, 5  ;;  %v7450_v33 = vrot.slane %v2153_v11, 5  ;;  %v7456_v41 = vld [vmem:[%s6800_s13 + $0x38] sm:$0x1] }
  0x88   : > { %6171 = vmatmul.mubr.msk.bf16.gmra.mxu1 %vm722_vm3, %v9542_v51  ;;  %v2113_v12 = vrot.slane %v2112_v28, 4  ;;  %v2127_v14 = vrot.slane %v2126_v56, 4  ;;  %v2141_v16 = vrot.slane %v2139_v50, 5  ;;  %v2159_v23 = vrot.slane %v2157_v63, 4  ;;  %v5457_v13 = vld [vmem:[%s6800_s13 + $0x3c] sm:$0xf] }
  0x89   : > { %6174 = vmatprep.mubr.msk.bf16.mxu1 %vm722_vm3, %v9543_v3  ;;  %v2137_v15 = vrot.slane %v2136_v55, 4  ;;  %v2163_v32 = vshll.u32 %v7425_v21, 16  ;;  %v2168_v20 = vshrl.u32 %v5454_v52, 16  ;;  %v2171_v60 = vshll.u32 %v5454_v52, 16 }
  0x8a   : > { %v2150_v57 = vor.u32 %v2149_v1, %v2146_v8  ;;  %v2160_v6 = vor.u32 %v2159_v23, %v7450_v33  ;;  %v2177_v28 = vshll.u32 %v7448_v5, 16  ;;  %v2181_v56 = vshrl.u32 %v7448_v5, 16  ;;  %v5460_v8 = vld [vmem:[%s6800_s13 + $0x48] sm:$0xf]  ;;  %v7483_v1 = vld [vmem:[%s6800_s13 + $0x4c] sm:$0xf] }
  0x8b   : > { %v2170_v50 = vrot.slane %v2168_v20, 4  ;;  %v2173_v51 = vrot.slane %v2171_v60, 5  ;;  %v9544_v3 = vcombine.low %v6861_v53, %v6865_v58  ;;  %v5363_v55 = vcombine.low %v7433_v18, %v7442_v4 }
  0x8c   : > { %v7462_v45 = vrot.slane %v2177_v28, 5  ;;  %v2183_v11 = vrot.slane %v2181_v56, 4  ;;  %v2118_v63 = vsel %vm6844_vm4, %v2113_v12, %v2117_v62  ;;  %v2132_v52 = vsel %vm6844_vm4, %v2127_v14, %v7421_v17 }
  0x8d   : > { %6209 = vmatmul.mubr.msk.bf16.gmra.mxu0 %vm722_vm3, %v5357_v61  ;;  %v7465_v61 = vld [vmem:[%s6800_s13 + $0x40] sm:$0xf]  ;;  %v9545_v53 = vcombine.low %v6899_v35, %v6910_v46  ;;  %v2142_v58 = vsel %vm6844_vm4, %v2137_v15, %v2141_v16  ;;  %v2151_v23 = vrot.slane %v2150_v57, 4  ;;  %v2174_v20 = vor.u32 %v2173_v51, %v2170_v50  ;;  %v7517_v50 = vld [vmem:[%s6800_s13 + $0x44] sm:$0x1] }
  0x8e   : > { %6212 = vmatprep.mubr.msk.bf16.mxu0 %vm722_vm3, %v5358_v40  ;;  %v2108_v40 = vsel %vm6844_vm4, %v2103_v34, %v7405_v30  ;;  %v2161_v30 = vrot.slane %v2160_v6, 4  ;;  %v2165_v34 = vrot.slane %v2163_v32, 5  ;;  %v2187_v62 = vshll.u32 %v7456_v41, 16  ;;  %v5463_v51 = vld [vmem:[%s6800_s13 + $0x54] sm:$0xf] }
  0x8f   : > { %v2192_v12 = vshrl.u32 %v5457_v13, 16  ;;  %v2195_v17 = vshll.u32 %v5457_v13, 16  ;;  %v7494_v14 = vsel %vm771_vm0, %v7225_v22, 0  ;;  %v2184_v35 = vor.u32 %v2183_v11, %v7462_v45 }
  0x90   : > { %6175 = vmatmul.mubr.msk.bf16.gmra.mxu1 %vm722_vm3, %v9544_v3  ;;  %v2201_v46 = vshll.u32 %v7465_v61, 16  ;;  %v2205_v16 = vshrl.u32 %v7465_v61, 16  ;;  %v7499_v15 = vcombine.low %v2108_v40, %v2118_v63  ;;  %v7503_v32 = vsel %vm771_vm0, %v7197_v24, 0  ;;  %v7526_v40 = vld [vmem:[%s6800_s13 + $0x58] sm:$0xf] }
  0x91   : > { %6178 = vmatprep.mubr.msk.bf16.mxu1 %vm722_vm3, %v9545_v53  ;;  %v2216_v60 = vshrl.u32 %v5460_v8, 16  ;;  %v2219_v57 = vshll.u32 %v5460_v8, 16  ;;  %v9546_v6 = vcombine.low %v7312_v25, %v7322_v54  ;;  %v7509_v22 = vcombine.low %v2132_v52, %v2142_v58  ;;  %v7531_v8 = vld [vmem:[%s6800_s13 + $0x50] sm:$0x1] }
  0x92   : > { %v2156_v28 = vsel %vm6844_vm4, %v2151_v23, %v7450_v33  ;;  %v2166_v56 = vsel %vm6844_vm4, %v2161_v30, %v2165_v34  ;;  %v2225_v24 = vshll.u32 %v7483_v1, 16  ;;  %v9547_v25 = vcombine.low %v7326_v39, %v7336_v27  ;;  %v5466_v34 = vld [vmem:[%s6800_s13 + $0x60] sm:$0xf] }
  0x93   : > { %v2175_v54 = vrot.slane %v2174_v20, 4  ;;  %v2189_v13 = vrot.slane %v2187_v62, 5  ;;  %v2194_v11 = vrot.slane %v2192_v12, 4  ;;  %v2197_v3 = vrot.slane %v2195_v17, 5 }
  0x94   : > { %v2185_v33 = vrot.slane %v2184_v35, 4  ;;  %v7528_v63 = vrot.slane %v2201_v46, 5  ;;  %v2207_v52 = vrot.slane %v2205_v16, 4  ;;  %v2229_v53 = vshrl.u32 %v7483_v1, 16  ;;  %v7548_v35 = vld [vmem:[%s6800_s13 + $0x5c] sm:$0x1] }
  0x95   : > { %6213 = vmatmul.mubr.msk.bf16.gmra.mxu0 %vm722_vm3, %v9546_v6  ;;  %v9548_v39 = vcombine.low %v6949_v36, %v6956_v43  ;;  %v2218_v27 = vrot.slane %v2216_v60, 4  ;;  %v2221_v58 = vrot.slane %v2219_v57, 5  ;;  %v2240_v23 = vshrl.u32 %v5463_v51, 16 }
  0x96   : > { %6216 = vmatprep.mubr.msk.bf16.mxu0 %vm722_vm3, %v9547_v25  ;;  %v2243_v30 = vshll.u32 %v5463_v51, 16  ;;  %v9549_v20 = vcombine.low %v9532_v2, %v9531_v10  ;;  %v7543_v62 = vcombine.low %v2156_v28, %v2166_v56  ;;  %v7545_v12 = vrot.slane %v2225_v24, 5  ;;  %v7561_v28 = vld [vmem:[%s6800_s13 + $0x64] sm:$0xf] }
  0x97   : > { %v2231_v17 = vrot.slane %v2229_v53, 4  ;;  %v2249_v36 = vshll.u32 %v7526_v40, 16  ;;  %v2211_v43 = vshll.u32 %v7517_v50, 16  ;;  %v2242_v46 = vrot.slane %v2240_v23, 4 }
  0x98   : > { %6179 = vmatmul.mubr.msk.bf16.gmra.mxu1 %vm722_vm3, %v9548_v39  ;;  %v2245_v16 = vrot.slane %v2243_v30, 5  ;;  %v2253_v60 = vshrl.u32 %v7526_v40, 16  ;;  %v2180_v10 = vsel %vm6844_vm4, %v2175_v54, %v7462_v45  ;;  %v2190_v2 = vsel %vm6844_vm4, %v2185_v33, %v2189_v13  ;;  %v7583_v30 = vld [vmem:[%s6800_s13 + $0x68] sm:$0x1] }
  0x99   : > { %6182 = vmatprep.mubr.msk.bf16.mxu1 %vm722_vm3, %v9549_v20  ;;  %v2198_v57 = vor.u32 %v2197_v3, %v2194_v11  ;;  %v7558_v6 = vrot.slane %v2249_v36, 5  ;;  %v2208_v56 = vor.u32 %v2207_v52, %v7528_v63  ;;  %v2222_v24 = vor.u32 %v2221_v58, %v2218_v27  ;;  %v5469_v3 = vld [vmem:[%s6800_s13 + $0x6c] sm:$0xf]  ;;  %v7580_v27 = vld [vmem:[%s6800_s13 + $0x70] sm:$0xf] }
  0x9a   : > { %v2235_v51 = vshll.u32 %v7531_v8, 16  ;;  %v2255_v25 = vrot.slane %v2253_v60, 4  ;;  %v9550_v53 = vcombine.low %v7346_v19, %v7366_v9  ;;  %v2232_v45 = vor.u32 %v2231_v17, %v7545_v12 }
  0x9b   : > { %v2246_v54 = vor.u32 %v2245_v16, %v2242_v46  ;;  %v2264_v13 = vshrl.u32 %v5466_v34, 16  ;;  %v2267_v11 = vshll.u32 %v5466_v34, 16  ;;  %v9551_v33 = vcombine.low %v7358_v59, %v7382_v7  ;;  %v5472_v16 = vld [vmem:[%s6800_s13 + $0x78] sm:$0xf] }
  0x9c   : > { %v2256_v52 = vor.u32 %v2255_v25, %v7558_v6  ;;  %v2259_v39 = vshll.u32 %v7548_v35, 16  ;;  %v2273_v19 = vshll.u32 %v7561_v28, 16  ;;  %v2277_v9 = vshrl.u32 %v7561_v28, 16 }
  0x9d   : > { %6217 = vmatmul.mubr.msk.bf16.gmra.mxu0 %vm722_vm3, %v9550_v53  ;;  %v2199_v58 = vrot.slane %v2198_v57, 4  ;;  %v2213_v23 = vrot.slane %v2211_v43, 5  ;;  %v2266_v34 = vrot.slane %v2264_v13, 4  ;;  %v2269_v20 = vrot.slane %v2267_v11, 5 }
  0x9e   : > { %6220 = vmatprep.mubr.msk.bf16.mxu0 %vm722_vm3, %v9551_v33  ;;  %v9552_v59 = vcombine.low %v9535_v26, %v9534_v38  ;;  %v7589_v7 = vcombine.low %v2180_v10, %v2190_v2  ;;  %v2209_v17 = vrot.slane %v2208_v56, 4  ;;  %v2223_v36 = vrot.slane %v2222_v24, 4  ;;  %v7599_v2 = vld [vmem:[%s6800_s13 + $0x7c] sm:$0xf] }
  0x9f   : > { %v7591_v46 = vrot.slane %v2273_v19, 5  ;;  %v9553_v43 = vcombine.low %v9538_v42, %v9537_v48  ;;  %v2233_v60 = vrot.slane %v2232_v45, 4  ;;  %v2237_v57 = vrot.slane %v2235_v51, 5  ;;  %9554 = vst [vmem:[#allocation10_spill] sm:$0xff] %v7599_v2  ;;  %v5475_v19 = vld [vmem:[%s6800_s13 + $0x84] sm:$0xf] }
  0xa0   : > { %6183 = vmatmul.mubr.msk.bf16.gmra.mxu1 %vm722_vm3, %v9552_v59  ;;  %v2247_v25 = vrot.slane %v2246_v54, 4  ;;  %v2279_v38 = vrot.slane %v2277_v9, 4  ;;  %v2257_v26 = vrot.slane %v2256_v52, 4  ;;  %v2261_v53 = vrot.slane %v2259_v39, 5 }
  0xa1   : > { %6186 = vmatprep.mubr.msk.bf16.mxu1 %vm722_vm3, %v9553_v43  ;;  %v2270_v13 = vor.u32 %v2269_v20, %v2266_v34  ;;  %v2288_v10 = vshrl.u32 %v5469_v3, 16  ;;  %v2204_v56 = vsel %vm6844_vm4, %v2199_v58, %v7528_v63  ;;  %v2291_v24 = vshll.u32 %v5469_v3, 16  ;;  %v6524_v63 = vld [vmem:[%s6800_s13 + $0xc] sm:$0xff]   ;;  %v7633_v34 = vld [vmem:[%s6800_s13 + $0x88] sm:$0xf] }
  0xa2   : > { %v2297_v48 = vshll.u32 %v7580_v27, 16  ;;  %v2301_v42 = vshrl.u32 %v7580_v27, 16  ;;  %v2214_v51 = vsel %vm6844_vm4, %v2209_v17, %v2213_v23  ;;  %v2228_v45 = vsel %vm6844_vm4, %v2223_v36, %v7545_v12  ;;  %9555 = vst [vmem:[#allocation12_spill] sm:$0xff] %v7633_v34  ;;  %v7642_v36 = vld [vmem:[%s6800_s13 + $0x74] sm:$0x1] }
  0xa3   : > { %v2280_v54 = vor.u32 %v2279_v38, %v7591_v46  ;;  %v2283_v11 = vshll.u32 %v7583_v30, 16  ;;  %v2238_v3 = vsel %vm6844_vm4, %v2233_v60, %v2237_v57  ;;  %v2252_v33 = vsel %vm6844_vm4, %v2247_v25, %v7558_v6  ;;  %9557 = vst [vmem:[#allocation11_spill] sm:$0xff] %v7642_v36  ;;  %v7652_v38 = vld [vmem:[%s6800_s13 + $0x80] sm:$0x1] }
  0xa4   : > { %v2312_v52 = vshrl.u32 %v5472_v16, 16  ;;  %v2315_v12 = vshll.u32 %v5472_v16, 16  ;;  %v2262_v18 = vsel %vm6844_vm4, %v2257_v26, %v2261_v53  ;;  %v2271_v4 = vrot.slane %v2270_v13, 4  ;;  %9558 = vst [vmem:[#allocation13_spill] sm:$0xff] %v7652_v38  ;;  %v7655_v26 = vld [vmem:[%s6800_s13 + $0x8c] sm:$0x1] }
  0xa5   : > { %6221 = vmatmul.mubr.msk.bf16.gmra.mxu0 %vm722_vm3, %v5363_v55  ;;  %v2290_v55 = vrot.slane %v2288_v10, 4  ;;  %v2321_v39 = vshll.u32 %v7599_v2, 16  ;;  %v2293_v9 = vrot.slane %v2291_v24, 5  ;;  %v7629_v58 = vrot.slane %v2297_v48, 5  ;;  %9559 = vst [vmem:[#allocation15_spill] sm:$0xff] %v7655_v26  ;;  %v6525_v10 = vld [vmem:[%s6800_s13 + $0x18] sm:$0xff]  }
  0xa6   : > { %6260 = vmatprep.mubr.msk.bf16.mxu0 %vm722_vm3, %v7499_v15  ;;  %v2303_v23 = vrot.slane %v2301_v42, 4  ;;  %v2325_v6 = vshrl.u32 %v7599_v2, 16  ;;  %v9556_v15 = vcombine.low %v9540_v29, %v7109_v37  ;;  %v7639_v20 = vcombine.low %v2204_v56, %v2214_v51  ;;  %v5478_v51 = vld [vmem:[%s6800_s13 + $0x90] sm:$0xf] }
  0xa7   : > { %v2281_v59 = vrot.slane %v2280_v54, 4  ;;  %v2285_v17 = vrot.slane %v2283_v11, 5  ;;  %v2314_v16 = vrot.slane %v2312_v52, 4  ;;  %v2317_v43 = vrot.slane %v2315_v12, 5 }
  0xa8   : > { %6187 = vmatmul.mubr.msk.bf16.gmra.mxu1 %vm722_vm3, %v9556_v15  ;;  %v7645_v60 = vrot.slane %v2321_v39, 5  ;;  %v2327_v57 = vrot.slane %v2325_v6, 4  ;;  %v2336_v25 = vshrl.u32 %v5475_v19, 16  ;;  %v7647_v37 = vcombine.low %v2228_v45, %v2238_v3  ;;  %v7666_v45 = vld [vmem:[%s6800_s13 + $0x94] sm:$0xf] }
  0xa9   : > { %6226 = vmatprep.mubr.msk.bf16.mxu1 %vm722_vm3, %v6524_v63  ;;  %v7649_v29 = vcombine.low %v2252_v33, %v2262_v18  ;;  %v2339_v53 = vshll.u32 %v5475_v19, 16  ;;  %v2345_v13 = vshll.u32 %v7633_v34, 16  ;;  %v2276_v56 = vsel %vm6844_vm4, %v2271_v4, %v7591_v46  ;;  %9560 = vst [vmem:[#allocation14_spill] sm:$0xff] %v7666_v45  ;;  %v7674_v33 = vld [vmem:[%s9470_s1 + $0x10] sm:$0x3]  ;;  %v6526_v46 = vld [vmem:[%s6800_s13 + $0x24] sm:$0xff]  }
  0xaa   : > { %v2294_v24 = vor.u32 %v2293_v9, %v2290_v55  ;;  %v2304_v48 = vor.u32 %v2303_v23, %v7629_v58  ;;  %v2307_v42 = vshll.u32 %v7642_v36, 16  ;;  %v2338_v54 = vrot.slane %v2336_v25, 4  ;;  %9561 = vst [vmem:[#allocation16_spill] sm:$0xff] %v7674_v33 }
  0xab   : > { %v2341_v11 = vrot.slane %v2339_v53, 5  ;;  %v7668_v63 = vrot.slane %v2345_v13, 5  ;;  %v2349_v3 = vshrl.u32 %v7633_v34, 16  ;;  %v2286_v52 = vsel %vm6844_vm4, %v2281_v59, %v2285_v17 }
  0xac   : > { %v2318_v12 = vor.u32 %v2317_v43, %v2314_v16  ;;  %v2328_v18 = vor.u32 %v2327_v57, %v7645_v60  ;;  %v2331_v4 = vshll.u32 %v7652_v38, 16  ;;  %v2360_v19 = vshrl.u32 %v5478_v51, 16  ;;  %v7708_v57 = vld [vmem:[%s6800_s13 + $0xa0] sm:$0xf] }
  0xad   : > { %6261 = vmatmul.mubr.msk.bf16.vlgmr.msra.gmra.mxu0 %vm722_vm3, %v7509_v22  ;;  %v2342_v55 = vor.u32 %v2341_v11, %v2338_v54  ;;  %v2351_v39 = vrot.slane %v2349_v3, 4  ;;  %v2363_v9 = vshll.u32 %v5478_v51, 16  ;;  %v5481_v22 = vld [vmem:[%s6800_s13 + $0x9c] sm:$0xf]  ;;  %v7687_v23 = vrot.slane %v2294_v24, 4  ;;  %9563 = vst [vmem:[#allocation17_spill] sm:$0xff] %v7708_v57 }
  0xae   : > { %6327 = vmatpush3.bf16.msra.mxu0 %v7503_v32  ;;  %6264 = vmatprep.mubr.msk.bf16.mxu0 %vm722_vm3, %v7543_v62  ;;  %v7689_v6 = vrot.slane %v2307_v42, 5  ;;  %v2355_v15 = vshll.u32 %v7655_v26, 16  ;;  %v2369_v59 = vshll.u32 %v7666_v45, 16  ;;  %v7696_v32 = vld [vmem:[%s9470_s1 + $0xe] sm:$0x3]  ;;  %v7701_v62 = vcombine.low %v2276_v56, %v2286_v52 }
  0xaf   : > { %9562 = vst [vmem:[#allocation18_spill] sm:$0xff] %v7696_v32  ;;  %6439 = vmatprep.subr.msk.bf16.mxu0 %vm771_vm0, %v7674_v33  ;;  %v7703_v17 = vrot.slane %v2304_v48, 4  ;;  %v2352_v16 = vor.u32 %v2351_v39, %v7668_v63  ;;  %v2373_v43 = vshrl.u32 %v7666_v45, 16  ;;  %v7712_v25 = vrot.slane %v2318_v12, 4  ;;  %v7721_v56 = vld [vmem:[%s6800_s13 + $0x98] sm:$0x1] }
  0xb0   : > { %6227 = vmatmul.mubr.msk.bf16.vlgmr.msra.gmra.mxu1 %vm722_vm3, %v6525_v10  ;;  %v7714_v53 = vrot.slane %v2328_v18, 4  ;;  %v7716_v13 = vrot.slane %v2331_v4, 5  ;;  %v7718_v10 = vrot.slane %v2342_v55, 4  ;;  %9564 = vst [vmem:[#allocation19_spill] sm:$0xff] %v7721_v56  ;;  %v2362_v24 = vrot.slane %v2360_v19, 4  ;;  %v6528_v19 = vld [vmem:[%s6800_s13 + $0x3c] sm:$0xff]  }
  0xb1   : > { %6293 = vmatpush3.bf16.msra.mxu1 %v7494_v14  ;;  %6230 = vmatprep.mubr.msk.bf16.mxu1 %vm722_vm3, %v6526_v46  ;;  %v2365_v48 = vrot.slane %v2363_v9, 5  ;;  %v2384_v42 = vshrl.u32 %v5481_v22, 16  ;;  %v2387_v51 = vshll.u32 %v5481_v22, 16  ;;  %v6527_v14 = vld [vmem:[%s6800_s13 + $0x30] sm:$0xff]   ;;  %v7730_v11 = vrot.slane %v2355_v15, 5 }
  0xb2   : > { %6438 = vmatprep.subr.msk.bf16.mxu1 %vm771_vm0, %v7696_v32  ;;  %v7732_v3 = vrot.slane %v2369_v59, 5  ;;  %v2393_v46 = vshll.u32 %v7708_v57, 16  ;;  %v5484_v52 = vld [vmem:[%s6800_s13 + $0xa8] sm:$0xf]  ;;  %v7736_v12 = vrot.slane %v2352_v16, 4  ;;  %v2375_v18 = vrot.slane %v2373_v43, 4 }
  0xb3   : > { %v2379_v4 = vshll.u32 %v7721_v56, 16  ;;  %v2397_v55 = vshrl.u32 %v7708_v57, 16  ;;  %v7741_v39 = vld [vmem:[%s6800_s13 + $0xac] sm:$0xf]  ;;  %v2366_v59 = vor.u32 %v2365_v48, %v2362_v24  ;;  %v7765_v16 = vld [vmem:[%s6800_s13 + $0xa4] sm:$0x1] }
  0xb4   : > { %9565 = vst [vmem:[#allocation20_spill] sm:$0xff] %v7741_v39  ;;  %9566 = vst [vmem:[#allocation9_spill] sm:$0xff] %v7765_v16  ;;  %v2386_v43 = vrot.slane %v2384_v42, 4  ;;  %v2389_v22 = vrot.slane %v2387_v51, 5  ;;  %v2408_v54 = vshrl.u32 %v5484_v52, 16  ;;  %v7767_v9 = vrot.slane %v2393_v46, 5 }
  0xb5   : > { %6265 = vmatmul.mubr.msk.bf16.gmra.mxu0 %vm722_vm3, %v7589_v7  ;;  %v2399_v32 = vrot.slane %v2397_v55, 4  ;;  %v2411_v15 = vshll.u32 %v5484_v52, 16  ;;  %v2417_v33 = vshll.u32 %v7741_v39, 16  ;;  %v5487_v57 = vld [vmem:[%s6800_s13 + $0xb4] sm:$0xf]  ;;  %v2376_v24 = vor.u32 %v2375_v18, %v7732_v3 }
  0xb6   : > { %6268 = vmatprep.mubr.msk.bf16.mxu0 %vm722_vm3, %v7639_v20  ;;  %v2358_v20 = vsel %vm6844_vm4, %v7736_v12, %v7730_v11  ;;  %v7777_v48 = vrot.slane %v2379_v4, 5  ;;  %v7780_v42 = vld [vmem:[%s6800_s13 + $0xb0] sm:$0x1]  ;;  %v2410_v51 = vrot.slane %v2408_v54, 4  ;;  %v7783_v46 = vld [vmem:[%s6800_s13 + $0xb8] sm:$0xf]  ;;  %v2390_v18 = vor.u32 %v2389_v22, %v2386_v43 }
  0xb7   : > { %9567 = vst [vmem:[#allocation21_spill] sm:$0xff] %v7780_v42  ;;  %9568 = vst [vmem:[#allocation22_spill] sm:$0xff] %v7783_v46  ;;  %v2413_v52 = vrot.slane %v2411_v15, 5  ;;  %v7787_v55 = vrot.slane %v2417_v33, 5  ;;  %v2421_v11 = vshrl.u32 %v7741_v39, 16  ;;  %v7790_v12 = vrot.slane %v2366_v59, 4 }
  0xb8   : > { %6231 = vmatmul.mubr.msk.bf16.gmra.mxu1 %vm722_vm3, %v6527_v14  ;;  %v2403_v14 = vshll.u32 %v7765_v16, 16  ;;  %v7793_v4 = vld [vmem:[%s6800_s13 + $0xbc] sm:$0x1]  ;;  %v2432_v54 = vshrl.u32 %v5487_v57, 16  ;;  %v2435_v7 = vshll.u32 %v5487_v57, 16  ;;  %v2400_v56 = vor.u32 %v2399_v32, %v7767_v9  ;;  %v6529_v16 = vld [vmem:[%s6800_s13 + $0x48] sm:$0xff]  }
  0xb9   : > { %6234 = vmatprep.mubr.msk.bf16.mxu1 %vm722_vm3, %v6528_v19  ;;  %v2423_v45 = vrot.slane %v2421_v11, 4  ;;  %v2427_v19 = vshll.u32 %v7780_v42, 16  ;;  %v2441_v15 = vshll.u32 %v7783_v46, 16  ;;  %v5490_v33 = vld [vmem:[%s6800_s13 + $0xc0] sm:$0xf]  ;;  %v2414_v26 = vor.u32 %v2413_v52, %v2410_v51  ;;  %v6530_v57 = vld [vmem:[%s6800_s13 + $0x54] sm:$0xff]  }
  0xba   : > { %v2434_v39 = vrot.slane %v2432_v54, 4  ;;  %v2437_v34 = vrot.slane %v2435_v7, 5  ;;  %v2445_v59 = vshrl.u32 %v7783_v46, 16  ;;  %v7802_v22 = vld [vmem:[%s6800_s13 + $0xc4] sm:$0xf]  ;;  %v2377_v43 = vrot.slane %v2376_v24, 4 }
  0xbb   : > { %v2405_v32 = vrot.slane %v2403_v14, 5  ;;  %v2424_v11 = vor.u32 %v2423_v45, %v7787_v55  ;;  %v2443_v42 = vrot.slane %v2441_v15, 5  ;;  %v2451_v7 = vshll.u32 %v7793_v4, 16  ;;  %v7814_v45 = vld [vmem:[%s6800_s13 + $0xc8] sm:$0x1] }
  0xbc   : > { %v2438_v51 = vor.u32 %v2437_v34, %v2434_v39  ;;  %v2447_v52 = vrot.slane %v2445_v59, 4  ;;  %v2456_v54 = vshrl.u32 %v5490_v33, 16  ;;  %v2391_v46 = vrot.slane %v2390_v18, 4 }
  0xbd   : > { %6269 = vmatmul.mubr.msk.bf16.gmra.mxu0 %vm722_vm3, %v7647_v37  ;;  %v2401_v38 = vrot.slane %v2400_v56, 4  ;;  %v2459_v2 = vshll.u32 %v5490_v33, 16  ;;  %v2465_v37 = vshll.u32 %v7802_v22, 16  ;;  %v2415_v24 = vrot.slane %v2414_v26, 4 }
  0xbe   : > { %6272 = vmatprep.mubr.msk.bf16.mxu0 %vm722_vm3, %v7649_v29  ;;  %v2429_v14 = vrot.slane %v2427_v19, 5  ;;  %v2448_v36 = vor.u32 %v2447_v52, %v2443_v42  ;;  %v2458_v15 = vrot.slane %v2456_v54, 4  ;;  %v2425_v34 = vrot.slane %v2424_v11, 4 }
  0xbf   : > { %v2461_v29 = vrot.slane %v2459_v2, 5  ;;  %v7817_v39 = vrot.slane %v2465_v37, 5  ;;  %v2469_v56 = vshrl.u32 %v7802_v22, 16  ;;  %v9569_v26 = vsel %vm6844_vm4, %v7703_v17, %v7689_v6 }
  0xc0   : > { %6235 = vmatmul.mubr.msk.bf16.gmra.mxu1 %vm722_vm3, %v6529_v16  ;;  %v9570_v16 = vsel %vm6844_vm4, %v7687_v23, %v7629_v58  ;;  %v2439_v19 = vrot.slane %v2438_v51, 4  ;;  %v2449_v33 = vrot.slane %v2448_v36, 4  ;;  %v2453_v2 = vrot.slane %v2451_v7, 5  ;;  %v6531_v23 = vld [vmem:[%s6800_s13 + $0x60] sm:$0xff]  }
  0xc1   : > { %6238 = vmatprep.mubr.msk.bf16.mxu1 %vm722_vm3, %v6530_v57  ;;  %v5502_v18 = vcombine.low %v9570_v16, %v9569_v26  ;;  %v9571_v59 = vsel %vm6844_vm4, %v7714_v53, %v7716_v13  ;;  %v9572_v6 = vsel %vm6844_vm4, %v7712_v25, %v7645_v60  ;;  %v2462_v57 = vor.u32 %v2461_v29, %v2458_v15  ;;  %v5528_v13 = vld [vmem:[%s6800_s13 + $0x24] sm:$0xe]  ;;  %v5531_v26 = vld [vmem:[%s6800_s13 + $0x48] sm:$0xe] }
  0xc2   : > { %v5503_v17 = vcombine.low %v9572_v6, %v9571_v59  ;;  %v2471_v11 = vrot.slane %v2469_v56, 4  ;;  %v2475_v58 = vshll.u32 %v7814_v45, 16  ;;  %v9573_v36 = vsel %vm6844_vm4, %v7718_v10, %v7668_v63  ;;  %v6532_v63 = vld [vmem:[%s6800_s13 + $0x6c] sm:$0xff]   ;;  %v5532_v6 = vld [vmem:[%s6800_s13 + $0x54] sm:$0xe] }
  0xc3   : > { %v5504_v51 = vcombine.low %v9573_v36, %v2358_v20  ;;  %v2372_v53 = vsel %vm6844_vm4, %v7790_v12, %v7732_v3  ;;  %v2382_v60 = vsel %vm6844_vm4, %v2377_v43, %v7777_v48  ;;  %v2396_v25 = vsel %vm6844_vm4, %v2391_v46, %v7767_v9  ;;  %v7870_v12 = vld [vmem:[%s6800_s13 + $0xc] sm:$0xe] }
  0xc4   : > { %v2406_v10 = vsel %vm6844_vm4, %v2401_v38, %v2405_v32  ;;  %v2420_v3 = vsel %vm6844_vm4, %v2415_v24, %v7787_v55  ;;  %v2430_v20 = vsel %vm6844_vm4, %v2425_v34, %v2429_v14  ;;  %v2472_v48 = vor.u32 %v2471_v11, %v7817_v39  ;;  %v5529_v55 = vld [vmem:[%s6800_s13 + $0x30] sm:$0xe]  ;;  %v5530_v14 = vld [vmem:[%s6800_s13 + $0x3c] sm:$0xe] }
  0xc5   : > { %6273 = vmatmul.mubr.msk.bf16.gmra.mxu0 %vm722_vm3, %v7701_v62  ;;  %v2444_v62 = vsel %vm6844_vm4, %v2439_v19, %v2443_v42  ;;  %v2454_v38 = vsel %vm6844_vm4, %v2449_v33, %v2453_v2  ;;  %v7877_v9 = vrot.slane %v2462_v57, 4  ;;  %v2839_v46 = vrot.slane %v7361_v49, 5  ;;  %v6533_v57 = vld [vmem:[%s6800_s13 + $0x78] sm:$0xff]  }
  0xc6   : > { %6276 = vmatprep.mubr.msk.bf16.mxu0 %vm722_vm3, %v5502_v18  ;;  %v7881_v43 = vcombine.low %v2372_v53, %v2382_v60  ;;  %v7883_v32 = vrot.slane %v2472_v48, 4  ;;  %v7885_v52 = vrot.slane %v2475_v58, 5  ;;  %v5544_v7 = vrot.slane %v5528_v13, 9  ;;  %v6534_v53 = vld [vmem:[%s6800_s13 + $0x84] sm:$0xff]   ;;  %v5533_v13 = vld [vmem:[%s6800_s13 + $0x60] sm:$0xe] }
  0xc7   : > { %v7888_v54 = vcombine.low %v2396_v25, %v2406_v10  ;;  %v7890_v42 = vcombine.low %v2420_v3, %v2430_v20  ;;  %v5542_v37 = vrot.slane %v7870_v12, 9  ;;  %v2853_v24 = vrot.slane %v7410_v44, 5  ;;  %v6540_v49 = vld [vmem:[%s6800_s13 + $0x18] sm:$0xff]  }
  0xc8   : > { %6239 = vmatmul.mubr.msk.bf16.gmra.mxu1 %vm722_vm3, %v6531_v23  ;;  %v7896_v15 = vcombine.low %v2444_v62, %v2454_v38  ;;  %v2842_v34 = vrot.slane %v7397_v47, 5  ;;  %v2856_v29 = vrot.slane %v7425_v21, 5  ;;  %v5545_v56 = vrot.slane %v5529_v55, 9  ;;  %v5535_v55 = vld [vmem:[%s6800_s13 + $0x78] sm:$0xe] }
  0xc9   : > { %6242 = vmatprep.mubr.msk.bf16.mxu1 %vm722_vm3, %v6532_v63  ;;  %v2468_v16 = vsel %vm6844_vm4, %v7877_v9, %v7817_v39  ;;  %v7907_v44 = vrot.slane %v2839_v46, 4  ;;  %v7911_v18 = vsel %vm7130_vm7, %v5544_v7, %v2853_v24  ;;  %v2855_v19 = vrot.slane %v2853_v24, 4 }
  0xca   : > { %v2478_v21 = vsel %vm6844_vm4, %v7883_v32, %v7885_v52  ;;  %v2860_v33 = vrot.slane %v7448_v5, 5  ;;  %v2863_v2 = vrot.slane %v7456_v41, 5  ;;  %v5546_v59 = vrot.slane %v5530_v14, 9  ;;  %v6539_v52 = vld [vmem:[%s6800_s13 + $0xc0] sm:$0xff]  }
  0xcb   : > { %v7923_v11 = vsel %vm7130_vm7, %v2855_v19, %v2856_v29  ;;  %v2867_v58 = vrot.slane %v7465_v61, 5  ;;  %v2870_v23 = vrot.slane %v7517_v50, 5  ;;  %v5547_v36 = vrot.slane %v5531_v26, 9  ;;  %v5536_v19 = vld [vmem:[%s6800_s13 + $0x84] sm:$0xe] }
  0xcc   : > { %v5561_v5 = vcombine.low %v7911_v18, %v7923_v11  ;;  %v7933_v41 = vsel %vm7130_vm7, %v5545_v56, %v2860_v33  ;;  %v2862_v60 = vrot.slane %v2860_v33, 4  ;;  %v2874_v25 = vrot.slane %v7483_v1, 5 }
  0xcd   : > { %6277 = vmatmul.mubr.msk.bf16.gmra.mxu0 %vm722_vm3, %v5503_v17  ;;  %v7940_v61 = vsel %vm7130_vm7, %v5546_v59, %v2867_v58  ;;  %v2869_v50 = vrot.slane %v2867_v58, 4  ;;  %v2877_v17 = vrot.slane %v7531_v8, 5  ;;  %v5548_v63 = vrot.slane %v5532_v6, 9  ;;  %v9574_v59 = vld [vmem:[#allocation11_spill] sm:$0xff] }
  0xce   : > { %6280 = vmatprep.mubr.msk.bf16.mxu0 %vm722_vm3, %v5504_v51  ;;  %v7945_v10 = vsel %vm7130_vm7, %v2862_v60, %v2863_v2  ;;  %v7949_v3 = vsel %vm7130_vm7, %v5547_v36, %v2874_v25  ;;  %v2876_v1 = vrot.slane %v2874_v25, 4  ;;  %v2881_v20 = vrot.slane %v7526_v40, 5  ;;  %v5534_v51 = vld [vmem:[%s6800_s13 + $0x6c] sm:$0xe]  ;;  %v6535_v58 = vld [vmem:[%s6800_s13 + $0x90] sm:$0xff]  }
  0xcf   : > { %v5562_v48 = vcombine.low %v7933_v41, %v7945_v10  ;;  %v7958_v8 = vsel %vm7130_vm7, %v2869_v50, %v2870_v23  ;;  %v2884_v62 = vrot.slane %v7548_v35, 5  ;;  %v5549_v38 = vrot.slane %v5533_v13, 9  ;;  %v9575_v36 = vld [vmem:[#allocation10_spill] sm:$0xff]  ;;  %v9576_v50 = vld [vmem:[#allocation13_spill] sm:$0xff] }
  0xd0   : > { %6243 = vmatmul.mubr.msk.bf16.gmra.mxu1 %vm722_vm3, %v6533_v57  ;;  %v5563_v40 = vcombine.low %v7940_v61, %v7958_v8  ;;  %v7967_v7 = vsel %vm7130_vm7, %v2876_v1, %v2877_v17  ;;  %v7971_v24 = vsel %vm7130_vm7, %v5548_v63, %v2881_v20  ;;  %v2883_v14 = vrot.slane %v2881_v20, 4  ;;  %v5537_v60 = vld [vmem:[%s6800_s13 + $0x90] sm:$0xe] }
  0xd1   : > { %6246 = vmatprep.mubr.msk.bf16.mxu1 %vm722_vm3, %v6534_v53  ;;  %v5564_v35 = vcombine.low %v7949_v3, %v7967_v7  ;;  %v2888_v29 = vrot.slane %v7561_v28, 5  ;;  %v2891_v56 = vrot.slane %v7583_v30, 5  ;;  %v5550_v26 = vrot.slane %v5534_v51, 9  ;;  %v9577_v51 = vld [vmem:[#allocation12_spill] sm:$0xff]  ;;  %v5668_v3 = vld [vmem:[%s6800_s13 + $0x48] sm:$0xf] }
  0xd2   : > { %v7980_v33 = vsel %vm7130_vm7, %v2883_v14, %v2884_v62  ;;  %v2895_v2 = vrot.slane %v7580_v27, 5  ;;  %v2898_v6 = vrot.slane %v9574_v59, 5  ;;  %v5551_v57 = vrot.slane %v5535_v55, 9  ;;  %v6536_v27 = vld [vmem:[%s6800_s13 + $0x9c] sm:$0xff]   ;;  %v9585_v55 = vld [vmem:[#allocation22_spill] sm:$0xff] }
  0xd3   : > { %v5565_v23 = vcombine.low %v7971_v24, %v7980_v33  ;;  %v7989_v28 = vsel %vm7130_vm7, %v5549_v38, %v2888_v29  ;;  %v2890_v30 = vrot.slane %v2888_v29, 4  ;;  %v2902_v53 = vrot.slane %v9575_v36, 5  ;;  %v5538_v38 = vld [vmem:[%s6800_s13 + $0x9c] sm:$0xe]  ;;  %v9580_v36 = vld [vmem:[#allocation19_spill] sm:$0xff] }
  0xd4   : > { %v7998_v25 = vsel %vm7130_vm7, %v5550_v26, %v2895_v2  ;;  %v2897_v13 = vrot.slane %v2895_v2, 4  ;;  %v2905_v17 = vrot.slane %v9576_v50, 5  ;;  %v5552_v63 = vrot.slane %v5536_v19, 9  ;;  %v5539_v26 = vld [vmem:[%s6800_s13 + $0xa8] sm:$0xe] }
  0xd5   : > { %6281 = vmatmul.mubr.msk.bf16.gmra.mxu0 %vm722_vm3, %v7881_v43  ;;  %v8005_v1 = vsel %vm7130_vm7, %v2890_v30, %v2891_v56  ;;  %v8009_v43 = vsel %vm7130_vm7, %v5551_v57, %v2902_v53  ;;  %v2904_v20 = vrot.slane %v2902_v53, 4  ;;  %v2909_v62 = vrot.slane %v9577_v51, 5  ;;  %v5541_v57 = vld [vmem:[%s6800_s13 + $0xc0] sm:$0xe]  ;;  %v6537_v19 = vld [vmem:[%s6800_s13 + $0xa8] sm:$0xff]  }
  0xd6   : > { %6284 = vmatprep.mubr.msk.bf16.mxu0 %vm722_vm3, %v7888_v54  ;;  %v8017_v14 = vsel %vm7130_vm7, %v2897_v13, %v2898_v6  ;;  %v9578_v54 = vld [vmem:[#allocation15_spill] sm:$0xff]  ;;  %v5553_v56 = vrot.slane %v5537_v60, 9  ;;  %v2919_v53 = vrot.slane %v9580_v36, 5  ;;  %v5554_v60 = vrot.slane %v5538_v38, 9  ;;  %v9583_v38 = vld [vmem:[#allocation20_spill] sm:$0xff] }
  0xd7   : > { %v2912_v29 = vrot.slane %v9578_v54, 5  ;;  %v8026_v2 = vsel %vm7130_vm7, %v2904_v20, %v2905_v17  ;;  %v8030_v59 = vsel %vm7130_vm7, %v5552_v63, %v2909_v62  ;;  %v2911_v6 = vrot.slane %v2909_v62, 4  ;;  %v5540_v13 = vld [vmem:[%s6800_s13 + $0xb4] sm:$0xe]  ;;  %v9581_v17 = vld [vmem:[#allocation17_spill] sm:$0xff] }
  0xd8   : > { %6247 = vmatmul.mubr.msk.bf16.gmra.mxu1 %vm722_vm3, %v6535_v58  ;;  %v9579_v58 = vld [vmem:[#allocation14_spill] sm:$0xff]  ;;  %v2923_v63 = vrot.slane %v9581_v17, 5  ;;  %v9582_v20 = vld [vmem:[#allocation9_spill] sm:$0xff]  ;;  %v5555_v62 = vrot.slane %v5539_v26, 9  ;;  %v2930_v36 = vrot.slane %v9583_v38, 5  ;;  %v5556_v26 = vrot.slane %v5540_v13, 9 }
  0xd9   : > { %6250 = vmatprep.mubr.msk.bf16.mxu1 %vm722_vm3, %v6536_v27  ;;  %v2916_v30 = vrot.slane %v9579_v58, 5  ;;  %v8040_v50 = vsel %vm7130_vm7, %v2911_v6, %v2912_v29  ;;  %v2926_v51 = vrot.slane %v9582_v20, 5  ;;  %v9584_v17 = vld [vmem:[#allocation21_spill] sm:$0xff]  ;;  %v6538_v27 = vld [vmem:[%s6800_s13 + $0xb4] sm:$0xff]   ;;  %v2843_v39 = vsel %vm7130_vm7, %v7907_v44, %v2842_v34  ;;  %v6557_v44 = vld [vmem:[%s6800_s13 + $0x20] sm:$0x1] }
  0xda   : > { %v8055_v29 = vsel %vm7130_vm7, %v5554_v60, %v2923_v63  ;;  %v2925_v6 = vrot.slane %v2923_v63, 4  ;;  %v2933_v20 = vrot.slane %v9584_v17, 5  ;;  %v2932_v38 = vrot.slane %v2930_v36, 4  ;;  %v8257_v7 = vld [vmem:[%s6800_s13 + $0x4c] sm:$0xf] }
  0xdb   : > { %v8048_v54 = vsel %vm7130_vm7, %v5553_v56, %v2916_v30  ;;  %v2918_v58 = vrot.slane %v2916_v30, 4  ;;  %v8067_v30 = vsel %vm7130_vm7, %v5555_v62, %v2930_v36  ;;  %v2937_v60 = vrot.slane %v9585_v55, 5 }
  0xdc   : > { %v5557_v63 = vrot.slane %v5541_v57, 9  ;;  %v8083_v55 = vsel %vm7130_vm7, %v2932_v38, %v2933_v20  ;;  %v2944_v57 = vrot.slane %v7802_v22, 5  ;;  %v2840_v22 = vsel %vm7130_vm7, %v5542_v37, %v2839_v46  ;;  %v6542_v38 = vld [vmem:[%s6800_s13 + $0x30] sm:$0xff]  }
  0xdd   : > { %6285 = vmatmul.mubr.msk.bf16.gmra.mxu0 %vm722_vm3, %v7890_v42  ;;  %v8063_v56 = vsel %vm7130_vm7, %v2918_v58, %v2919_v53  ;;  %v8076_v42 = vsel %vm7130_vm7, %v2925_v6, %v2926_v51  ;;  %v2940_v53 = vrot.slane %v7793_v4, 5  ;;  %v2939_v58 = vrot.slane %v2937_v60, 4 }
  0xde   : > { %6288 = vmatprep.mubr.msk.bf16.mxu0 %vm722_vm3, %v7896_v15  ;;  %v8087_v15 = vsel %vm7130_vm7, %v5556_v26, %v2937_v60  ;;  %v2947_v51 = vrot.slane %v7814_v45, 5  ;;  %v5527_v45 = vld [vmem:[%s6800_s13 + $0x18] sm:$0xe]  ;;  %v8127_v9 = vsel %vm7130_vm7, %v5557_v63, %v2944_v57  ;;  %v2946_v46 = vrot.slane %v2944_v57, 4  ;;  %v6541_v26 = vld [vmem:[%s6800_s13 + $0x24] sm:$0xff]   ;;  %v9586_v60 = vld [vmem:[#allocation16_spill] sm:$0xff] }
  0xdf   : > { %v8115_v32 = vsel %vm7130_vm7, %v2939_v58, %v2940_v53  ;;  %v5543_v37 = vrot.slane %v5527_v45, 9  ;;  %v5559_v34 = vcombine.low %v2840_v22, %v2843_v39  ;;  %v4606_v53 = vsel %vm771_vm0, %v9586_v60, 0  ;;  %v5656_v63 = vld [vmem:[%s6800_s13 + $0x18] sm:$0xf]  ;;  %v5657_v57 = vld [vmem:[%s6800_s13 + $0x1c] sm:$0xf] }
  0xe0   : > { %6251 = vmatmul.mubr.msk.bf16.gmra.mxu1 %vm722_vm3, %v6537_v19  ;;  %v5509_v19 = vcombine.low %v2468_v16, %v2478_v21  ;;  %v8132_v47 = vsel %vm7130_vm7, %v2946_v46, %v2947_v51  ;;  %v2849_v21 = vrot.slane %v6557_v44, 5  ;;  %v5659_v51 = vld [vmem:[%s6800_s13 + $0x24] sm:$0xf]  ;;  %v3654_v45 = vshrl.u32 %v5656_v63, 16  ;;  %v6544_v44 = vld [vmem:[%s6800_s13 + $0x48] sm:$0xff]  }
  0xe1   : > { %6254 = vmatprep.mubr.msk.bf16.mxu1 %vm722_vm3, %v6538_v27  ;;  %v6556_v27 = vld [vmem:[%s6800_s13 + $0x1c] sm:$0xf]  ;;  %v3663_v39 = vshll.u32 %v5657_v57, 16  ;;  %v3678_v46 = vshrl.u32 %v5659_v51, 16  ;;  %v5737_v60 = vld [vmem:[%s6800_s13 + $0x18] sm:$0xe] }
  0xe2   : > { %v2846_v36 = vrot.slane %v6556_v27, 5  ;;  %v3657_v27 = vshll.u32 %v5656_v63, 16  ;;  %v8173_v63 = vld [vmem:[%s6800_s13 + $0x2c] sm:$0x1] }
  0xe3   : > { %v3680_v18 = vrot.slane %v3678_v46, 4 }
  0xe4   : > { %v2848_v16 = vrot.slane %v2846_v36, 4  ;;  %v2847_v17 = vsel %vm7130_vm7, %v5543_v37, %v2846_v36  ;;  %v8157_v36 = vld [vmem:[%s6800_s13 + $0x28] sm:$0xf]  ;;  %v6543_v37 = vld [vmem:[%s6800_s13 + $0x3c] sm:$0xff]  }
  0xe5   : > { %6289 = vmatmul.mubr.msk.bf16.gmra.mxu0 %vm722_vm3, %v5509_v19  ;;  %v9587_v19 = vld [vmem:[#allocation18_spill] sm:$0xff] }
  0xe6   : > { %6328 = vmatprep.mubr.msk.bf16.mxu0 %vm722_vm3, %v6540_v49  ;;  %v2850_v20 = vsel %vm7130_vm7, %v2848_v16, %v2849_v21  ;;  %v4136_v22 = vsel %vm771_vm0, %v9587_v19, 0  ;;  %v3667_v49 = vshrl.u32 %v5657_v57, 16  ;;  %v3691_v16 = vshrl.u32 %v8157_v36, 16  ;;  %v5658_v21 = vld [vmem:[%s6800_s13 + $0x20] sm:$0x1] }
  0xe7   : > { %v5560_v58 = vcombine.low %v2847_v17, %v2850_v20  ;;  %v3656_v17 = vrot.slane %v3654_v45, 4  ;;  %v3659_v20 = vrot.slane %v3657_v27, 5  ;;  %v5662_v19 = vld [vmem:[%s6800_s13 + $0x30] sm:$0xf]  ;;  %v3673_v45 = vshll.u32 %v5658_v21, 16 }
  0xe8   : > { %6255 = vmatmul.mubr.msk.bf16.gmra.mxu1 %vm722_vm3, %v6539_v52  ;;  %v3681_v52 = vshll.u32 %v5659_v51, 16  ;;  %v3693_v51 = vrot.slane %v3691_v16, 4  ;;  %v5753_v27 = vrot.slane %v5737_v60, 9  ;;  %v4400_v46 = vrot.slane %v5658_v21, 5  ;;  %v5738_v16 = vld [vmem:[%s6800_s13 + $0x24] sm:$0xe] }
  0xe9   : > { %6294 = vmatprep.mubr.msk.bf16.mxu1 %vm722_vm3, %v5559_v34  ;;  %v3687_v34 = vshll.u32 %v8157_v36, 16  ;;  %v6545_v21 = vld [vmem:[%s6800_s13 + $0x54] sm:$0xff]   ;;  %v3705_v10 = vshll.u32 %v5662_v19, 16  ;;  %v6546_v60 = vld [vmem:[%s6800_s13 + $0x60] sm:$0xff]  }
  0xea   : > { %v3683_v11 = vrot.slane %v3681_v52, 5  ;;  %v3697_v52 = vshll.u32 %v8173_v63, 16 }
  0xed   : > { %6329 = vmatmul.mubr.msk.bf16.vlgmr.msra.gmra.mxu0 %vm722_vm3, %v6541_v26  ;;  %v8169_v26 = vrot.slane %v3663_v39, 5 }
  0xee   : > { %6395 = vmatpush3.bf16.msra.mxu0 %v4606_v53  ;;  %6332 = vmatprep.mubr.msk.bf16.mxu0 %vm722_vm3, %v6542_v38  ;;  %v3669_v38 = vrot.slane %v3667_v49, 4  ;;  %v4397_v53 = vrot.slane %v5657_v57, 5  ;;  %v8183_v57 = vld [vmem:[%s6800_s13 + $0x34] sm:$0xf] }
  0xf0   : > { %6295 = vmatmul.mubr.msk.bf16.vlgmr.msra.gmra.mxu1 %vm722_vm3, %v5560_v58  ;;  %v8178_v58 = vrot.slane %v3687_v34, 5  ;;  %v3670_v39 = vor.u32 %v3669_v38, %v8169_v26  ;;  %v4399_v49 = vrot.slane %v4397_v53, 4  ;;  %v3684_v34 = vor.u32 %v3683_v11, %v3680_v18 }
  0xf1   : > { %6361 = vmatpush3.bf16.msra.mxu1 %v4136_v22  ;;  %6298 = vmatprep.mubr.msk.bf16.mxu1 %vm722_vm3, %v5561_v5  ;;  %v8176_v5 = vpop.f32.mrf.mxu0  ;;  %v3660_v22 = vor.u32 %v3659_v20, %v3656_v17  ;;  %v3702_v17 = vshrl.u32 %v5662_v19, 16  ;;  %v3715_v38 = vshrl.u32 %v8183_v57, 16  ;;  %v8208_v61 = vsel %vm7130_vm7, %v5753_v27, %v4397_v53  ;;  %v5665_v19 = vld [vmem:[%s6800_s13 + $0x3c] sm:$0xf] }
  0xf2   : > { %v3694_v41 = vor.u32 %v3693_v51, %v8178_v58  ;;  %v3671_v8 = vrot.slane %v3670_v39, 4  ;;  %v3699_v11 = vrot.slane %v3697_v52, 5  ;;  %v5754_v51 = vrot.slane %v5738_v16, 9  ;;  %v8222_v39 = vld [vmem:[%s6800_s13 + $0x38] sm:$0x1] }
  0xf3   : > { %v8200_v20 = vpop.f32.mrf.mxu0  ;;  %v3661_v18 = vrot.slane %v3660_v22, 4  ;;  %v3685_v12 = vrot.slane %v3684_v34, 4  ;;  %v4407_v22 = vrot.slane %v8173_v63, 5  ;;  %v3717_v52 = vrot.slane %v3715_v38, 4 }
  0xf4   : > { %v3695_v27 = vrot.slane %v3694_v41, 4  ;;  %v3726_v34 = vshrl.u32 %v5665_v19, 16  ;;  %v3729_v16 = vshll.u32 %v5665_v19, 16  ;;  %v8235_v41 = vld [vmem:[%s6800_s13 + $0x40] sm:$0xf] }
  0xf5   : > { %6333 = vmatmul.mubr.msk.bf16.gmra.mxu0 %vm722_vm3, %v6543_v37  ;;  %v8219_v53 = vpop.f32.mrf.mxu0  ;;  %v3666_v63 = vsel %vm6844_vm4, %v3661_v18, %v8169_v26  ;;  %v3690_v26 = vsel %vm6844_vm4, %v3685_v12, %v8178_v58  ;;  %v5739_v18 = vld [vmem:[%s6800_s13 + $0x30] sm:$0xe]  ;;  %v3735_v24 = vshll.u32 %v8235_v41, 16  ;;  %v3739_v33 = vshrl.u32 %v8235_v41, 16 }
  0xf6   : > { %6336 = vmatprep.mubr.msk.bf16.mxu0 %vm722_vm3, %v6544_v44  ;;  %v8191_v37 = vpop.f32.mrf.mxu1  ;;  %v4404_v44 = vrot.slane %v8157_v36, 5  ;;  %v3675_v36 = vrot.slane %v3673_v45, 5  ;;  %v3704_v45 = vrot.slane %v3702_v17, 4  ;;  %v3700_v58 = vsel %vm6844_vm4, %v3695_v27, %v3699_v11 }
  0xf7   : > { %9588 = vst [vmem:[#allocation11_spill] sm:$0xff] %v8191_v37  ;;  %v8264_v12 = vpop.f32.mrf.mxu0  ;;  %v3731_v19 = vrot.slane %v3729_v16, 5  ;;  %v3763_v11 = vshrl.u32 %v8257_v7, 16 }
  0xf8   : > { %6299 = vmatmul.mubr.msk.bf16.gmra.mxu1 %vm722_vm3, %v5562_v48  ;;  %v3711_v48 = vshll.u32 %v8183_v57, 16  ;;  %v8215_v6 = vpop.f32.mrf.mxu1  ;;  %v4406_v4 = vrot.slane %v4404_v44, 4  ;;  %v3676_v17 = vsel %vm6844_vm4, %v3671_v8, %v3675_v36  ;;  %v4411_v36 = vrot.slane %v8183_v57, 5  ;;  %v6548_v8 = vld [vmem:[%s6800_s13 + $0x78] sm:$0xff]  }
  0xf9   : > { %6302 = vmatprep.mubr.msk.bf16.mxu1 %vm722_vm3, %v5563_v40  ;;  %v8212_v40 = vsel %vm7130_vm7, %v4399_v49, %v4400_v46  ;;  %9589 = vst [vmem:[#allocation10_spill] sm:$0xff] %v8215_v6  ;;  %v3707_v49 = vrot.slane %v3705_v10, 5  ;;  %v8278_v27 = vcombine.low %v3666_v63, %v3676_v17  ;;  %v8280_v57 = vcombine.low %v3690_v26, %v3700_v58  ;;  %v8294_v17 = vld [vmem:[%s6800_s13 + $0x58] sm:$0xf]  ;;  %v8300_v58 = vld [vmem:[%s6800_s13 + $0x44] sm:$0x1] }
  0xfa   : > { %v8224_v46 = vrot.slane %v3711_v48, 5  ;;  %v8241_v10 = vpop.f32.mrf.mxu1  ;;  %v8248_v48 = vsel %vm7130_vm7, %v5754_v51, %v4404_v44  ;;  %v8252_v38 = vsel %vm7130_vm7, %v4406_v4, %v4407_v22  ;;  %v3728_v51 = vrot.slane %v3726_v34, 4  ;;  %v5671_v34 = vld [vmem:[%s6800_s13 + $0x54] sm:$0xf] }
  0xfb   : > { %9590 = vst [vmem:[#allocation13_spill] sm:$0xff] %v8241_v10  ;;  %v3708_v44 = vor.u32 %v3707_v49, %v3704_v45  ;;  %v3753_v22 = vshll.u32 %v5668_v3, 16  ;;  %v4413_v13 = vrot.slane %v4411_v36, 4  ;;  %v4414_v63 = vrot.slane %v8222_v39, 5  ;;  %v5740_v49 = vld [vmem:[%s6800_s13 + $0x3c] sm:$0xe] }
  0xfc   : > { %v3718_v4 = vor.u32 %v3717_v52, %v8224_v46  ;;  %v8276_v45 = vpop.f32.mrf.mxu1  ;;  %v5755_v52 = vrot.slane %v5739_v18, 9  ;;  %v3732_v18 = vor.u32 %v3731_v19, %v3728_v51  ;;  %v9593_v6 = vcombine.low %v7989_v28, %v8005_v1 }
  0xfd   : > { %6337 = vmatmul.mubr.msk.bf16.gmra.mxu0 %vm722_vm3, %v6545_v21  ;;  %v3759_v21 = vshll.u32 %v8257_v7, 16  ;;  %9591 = vst [vmem:[#allocation12_spill] sm:$0xff] %v8276_v45  ;;  %v3755_v45 = vrot.slane %v3753_v22, 5  ;;  %v3774_v51 = vshrl.u32 %v5671_v34, 16  ;;  %v3777_v19 = vshll.u32 %v5671_v34, 16 }
  0xfe   : > { %6340 = vmatprep.mubr.msk.bf16.mxu0 %vm722_vm3, %v6546_v60  ;;  %v3721_v60 = vshll.u32 %v8222_v39, 16  ;;  %v8297_v26 = vrot.slane %v3718_v4, 4  ;;  %v3765_v39 = vrot.slane %v3763_v11, 4  ;;  %v8335_v22 = vsel %vm7130_vm7, %v4413_v13, %v4414_v63 }
  0xff   : > { %v8305_v10 = vrot.slane %v3759_v21, 5  ;;  %v9595_v21 = vcombine.low %v7998_v25, %v8017_v14  ;;  %v4418_v25 = vrot.slane %v8235_v41, 5  ;;  %v6550_v14 = vld [vmem:[%s6800_s13 + $0x90] sm:$0xff]   ;;  %v5756_v1 = vrot.slane %v5740_v49, 9  ;;  %v5674_v41 = vld [vmem:[%s6800_s13 + $0x60] sm:$0xf] }
 0x100   : > { %6303 = vmatmul.mubr.msk.bf16.gmra.mxu1 %vm722_vm3, %v5564_v35  ;;  %v6547_v35 = vld [vmem:[%s6800_s13 + $0x6c] sm:$0xff]   ;;  %v8290_v62 = vrot.slane %v3721_v60, 5  ;;  %v3776_v37 = vrot.slane %v3774_v51, 4 }
 0x101   : > { %6306 = vmatprep.mubr.msk.bf16.mxu1 %vm722_vm3, %v5565_v23  ;;  %v3750_v23 = vshrl.u32 %v5668_v3, 16  ;;  %v8288_v3 = vrot.slane %v3708_v44, 4  ;;  %v3741_v44 = vrot.slane %v3739_v33, 4  ;;  %v3787_v33 = vshrl.u32 %v8294_v17, 16 }
 0x102   : > { %v8286_v16 = vpop.f32.mrf.mxu0  ;;  %v3766_v13 = vor.u32 %v3765_v39, %v8305_v10  ;;  %v4425_v39 = vrot.slane %v8257_v7, 5  ;;  %v9599_v7 = vcombine.low %v8009_v43, %v8026_v2  ;;  %v9601_v43 = vcombine.low %v8030_v59, %v8040_v50  ;;  %v6551_v2 = vld [vmem:[%s6800_s13 + $0x9c] sm:$0xff]  }
 0x103   : > { %9592 = vst [vmem:[#allocation15_spill] sm:$0xff] %v8286_v16  ;;  %v3752_v60 = vrot.slane %v3750_v23, 4  ;;  %v6549_v23 = vld [vmem:[%s6800_s13 + $0x84] sm:$0xff]   ;;  %v8362_v16 = vld [vmem:[%s6800_s13 + $0x5c] sm:$0x1]  ;;  %v4432_v59 = vrot.slane %v8294_v17, 5 }
 0x104   : > { %v8323_v28 = vpop.f32.mrf.mxu0 }
 0x105   : > { %6341 = vmatmul.mubr.msk.bf16.gmra.mxu0 %vm722_vm3, %v6547_v35  ;;  %v8302_v35 = vrot.slane %v3735_v24, 5  ;;  %v3783_v24 = vshll.u32 %v8294_v17, 16  ;;  %9596 = vst [vmem:[#allocation19_spill] sm:$0xff] %v8323_v28  ;;  %v3779_v28 = vrot.slane %v3777_v19, 5 }
 0x106   : > { %6344 = vmatprep.mubr.msk.bf16.mxu0 %vm722_vm3, %v6548_v8  ;;  %v8311_v4 = vpop.f32.mrf.mxu1  ;;  %v8314_v8 = vld [vmem:[%s6800_s13 + $0x50] sm:$0x1]  ;;  %v8355_v49 = vpop.f32.mrf.mxu0 }
 0x107   : > { %9594 = vst [vmem:[#allocation14_spill] sm:$0xff] %v8311_v4  ;;  %v3742_v34 = vor.u32 %v3741_v44, %v8302_v35  ;;  %v8345_v4 = vrot.slane %v3732_v18, 4  ;;  %v8352_v11 = vrot.slane %v3783_v24, 5  ;;  %v3789_v44 = vrot.slane %v3787_v33, 4  ;;  %9598 = vst [vmem:[#allocation9_spill] sm:$0xff] %v8355_v49 }
 0x108   : > { %6307 = vmatmul.mubr.msk.bf16.gmra.mxu1 %vm722_vm3, %v9593_v6  ;;  %v8331_v6 = vsel %vm7130_vm7, %v5755_v52, %v4411_v36  ;;  %v3756_v36 = vor.u32 %v3755_v45, %v3752_v60  ;;  %v3769_v52 = vshll.u32 %v8314_v8, 16  ;;  %v8350_v63 = vpop.f32.mrf.mxu1  ;;  %v4420_v18 = vrot.slane %v4418_v25, 4  ;;  %v5741_v24 = vld [vmem:[%s6800_s13 + $0x48] sm:$0xe] }
 0x109   : > { %6310 = vmatprep.mubr.msk.bf16.mxu1 %vm722_vm3, %v9595_v21  ;;  %v3745_v21 = vshll.u32 %v8300_v58, 16  ;;  %9597 = vst [vmem:[#allocation17_spill] sm:$0xff] %v8350_v63  ;;  %v4421_v60 = vrot.slane %v8300_v58, 5  ;;  %v3743_v51 = vrot.slane %v3742_v34, 4  ;;  %v3798_v33 = vshrl.u32 %v5674_v41, 16 }
 0x10a   : > { %v8368_v63 = vsel %vm7130_vm7, %v5756_v1, %v4418_v25  ;;  %v3757_v45 = vrot.slane %v3756_v36, 4  ;;  %v3767_v49 = vrot.slane %v3766_v13, 4  ;;  %v3771_v58 = vrot.slane %v3769_v52, 5  ;;  %v8383_v36 = vld [vmem:[%s6800_s13 + $0x64] sm:$0xf]  ;;  %v8390_v13 = vpop.f32.mrf.mxu0 }
 0x10b   : > { %v3747_v19 = vrot.slane %v3745_v21, 5  ;;  %v3738_v34 = vsel %vm6844_vm4, %v8345_v4, %v8302_v35  ;;  %v3780_v21 = vor.u32 %v3779_v28, %v3776_v37  ;;  %v3790_v1 = vor.u32 %v3789_v44, %v8352_v11  ;;  %9602 = vst [vmem:[#allocation21_spill] sm:$0xff] %v8390_v13  ;;  %v5742_v28 = vld [vmem:[%s6800_s13 + $0x54] sm:$0xe]  ;;  %v6555_v13 = vld [vmem:[%s6800_s13 + $0xcc] sm:$0xff]  }
 0x10c   : > { %v3793_v25 = vshll.u32 %v8362_v16, 16  ;;  %v8394_v52 = vsel %vm7130_vm7, %v4420_v18, %v4421_v60  ;;  %v5757_v35 = vrot.slane %v5741_v24, 9  ;;  %v4427_v37 = vrot.slane %v4425_v39, 4 }
 0x10d   : > { %6345 = vmatmul.mubr.msk.bf16.gmra.mxu0 %vm722_vm3, %v6549_v23  ;;  %v3801_v23 = vshll.u32 %v5674_v41, 16  ;;  %v4428_v4 = vrot.slane %v8314_v8, 5  ;;  %v6552_v41 = vld [vmem:[%s6800_s13 + $0xa8] sm:$0xff]   ;;  %v3748_v44 = vsel %vm6844_vm4, %v3743_v51, %v3747_v19  ;;  %v3800_v50 = vrot.slane %v3798_v33, 4 }
 0x10e   : > { %6348 = vmatprep.mubr.msk.bf16.mxu0 %vm722_vm3, %v6550_v14  ;;  %v8374_v14 = vpop.f32.mrf.mxu1  ;;  %v3772_v18 = vsel %vm6844_vm4, %v3767_v49, %v3771_v58  ;;  %v3807_v60 = vshll.u32 %v8383_v36, 16  ;;  %v3811_v8 = vshrl.u32 %v8383_v36, 16  ;;  %v3791_v51 = vrot.slane %v3790_v1, 4  ;;  %v8412_v33 = vld [vmem:[%s6800_s13 + $0x68] sm:$0x1] }
 0x10f   : > { %9600 = vst [vmem:[#allocation20_spill] sm:$0xff] %v8374_v14  ;;  %v3781_v14 = vrot.slane %v3780_v21, 4  ;;  %v3795_v17 = vrot.slane %v3793_v25, 5  ;;  %v5758_v19 = vrot.slane %v5742_v28, 9  ;;  %v9605_v49 = vsel %vm6844_vm4, %v8297_v26, %v8290_v62  ;;  %v5677_v25 = vld [vmem:[%s6800_s13 + $0x6c] sm:$0xf] }
 0x110   : > { %6311 = vmatmul.mubr.msk.bf16.gmra.mxu1 %vm722_vm3, %v9599_v7  ;;  %v3803_v7 = vrot.slane %v3801_v23, 5  ;;  %v8409_v24 = vpop.f32.mrf.mxu1  ;;  %v8433_v21 = vsel %vm7130_vm7, %v5757_v35, %v4425_v39  ;;  %v8437_v1 = vsel %vm7130_vm7, %v4427_v37, %v4428_v4  ;;  %v8440_v62 = vcombine.low %v3738_v34, %v3748_v44  ;;  %v5743_v4 = vld [vmem:[%s6800_s13 + $0x60] sm:$0xe]  ;;  %v5683_v44 = vld [vmem:[%s6800_s13 + $0x84] sm:$0xf] }
 0x111   : > { %6314 = vmatprep.mubr.msk.bf16.mxu1 %vm722_vm3, %v9601_v43  ;;  %v3762_v43 = vsel %vm6844_vm4, %v3757_v45, %v8305_v10  ;;  %9603 = vst [vmem:[#allocation22_spill] sm:$0xff] %v8409_v24  ;;  %v9606_v45 = vsel %vm6844_vm4, %v8288_v3, %v8224_v46  ;;  %v4434_v46 = vrot.slane %v4432_v59, 4  ;;  %v4435_v3 = vrot.slane %v8362_v16, 5 }
 0x112   : > { %v8427_v23 = vcombine.low %v9606_v45, %v9605_v49  ;;  %9607 = vst [vmem:[#allocation18_spill] sm:$0xff] %v8440_v62  ;;  %v3804_v26 = vor.u32 %v3803_v7, %v3800_v50  ;;  %v8447_v28 = vcombine.low %v3762_v43, %v3772_v18  ;;  %v8449_v39 = vrot.slane %v3807_v60, 5 }
 0x113   : > { %v8415_v10 = vpop.f32.mrf.mxu0  ;;  %v8451_v35 = vrot.slane %v3811_v8, 4  ;;  %v3817_v37 = vshll.u32 %v8412_v33, 16  ;;  %v9609_v34 = vcombine.low %v8048_v54, %v8063_v56  ;;  %v3786_v50 = vsel %vm6844_vm4, %v3781_v14, %v8352_v11  ;;  %v5680_v54 = vld [vmem:[%s6800_s13 + $0x78] sm:$0xf] }
 0x114   : > { %9604 = vst [vmem:[#allocation16_spill] sm:$0xff] %v8415_v10  ;;  %9608 = vst [vmem:[#allocation23_spill] sm:$0xff] %v8447_v28  ;;  %v3796_v7 = vsel %vm6844_vm4, %v3791_v51, %v3795_v17  ;;  %v8471_v43 = vsel %vm7130_vm7, %v5758_v19, %v4432_v59  ;;  %v9611_v56 = vcombine.low %v8055_v29, %v8076_v42  ;;  %v3822_v60 = vshrl.u32 %v5677_v25, 16  ;;  %v8483_v51 = vld [vmem:[%s6800_s13 + $0x7c] sm:$0xf]  ;;  %v6554_v59 = vld [vmem:[%s6800_s13 + $0xc0] sm:$0xff]  }
 0x115   : > { %6349 = vmatmul.mubr.msk.bf16.gmra.mxu0 %vm722_vm3, %v6551_v2  ;;  %v8445_v2 = vld [vmem:[%s6800_s13 + $0x70] sm:$0xf]  ;;  %v8478_v18 = vpop.f32.mrf.mxu0  ;;  %v3825_v8 = vshll.u32 %v5677_v25, 16  ;;  %v8488_v17 = vsel %vm7130_vm7, %v4434_v46, %v4435_v3  ;;  %v8490_v29 = vrot.slane %v3804_v26, 4  ;;  %v5759_v42 = vrot.slane %v5743_v4, 9 }
 0x116   : > { %6352 = vmatprep.mubr.msk.bf16.mxu0 %vm722_vm3, %v6552_v41  ;;  %v6553_v41 = vld [vmem:[%s6800_s13 + $0xb4] sm:$0xff]   ;;  %9612 = vst [vmem:[#allocation25_spill] sm:$0xff] %v8478_v18  ;;  %v3831_v11 = vshll.u32 %v8445_v2, 16  ;;  %v3835_v14 = vshrl.u32 %v8445_v2, 16  ;;  %v4439_v19 = vrot.slane %v8383_v36, 5  ;;  %v8493_v49 = vcombine.low %v3786_v50, %v3796_v7 }
 0x117   : > { %v3814_v45 = vor.u32 %v8451_v35, %v8449_v39  ;;  %v8497_v25 = vrot.slane %v3817_v37, 5  ;;  %v3846_v46 = vshrl.u32 %v5680_v54, 16  ;;  %v3849_v3 = vshll.u32 %v5680_v54, 16  ;;  %v8509_v4 = vld [vmem:[%s6800_s13 + $0x88] sm:$0xf]  ;;  %v8512_v35 = vpop.f32.mrf.mxu0 }
 0x118   : > { %6315 = vmatmul.mubr.msk.bf16.gmra.mxu1 %vm722_vm3, %v9609_v34  ;;  %v8459_v16 = vpop.f32.mrf.mxu1  ;;  %9613 = vst [vmem:[#allocation26_spill] sm:$0xff] %v8493_v49  ;;  %v4442_v34 = vrot.slane %v8412_v33, 5  ;;  %v3855_v36 = vshll.u32 %v8483_v51, 16  ;;  %v3859_v26 = vshrl.u32 %v8483_v51, 16  ;;  %9615 = vst [vmem:[#allocation28_spill] sm:$0xff] %v8512_v35  ;;  %v3824_v33 = vrot.slane %v3822_v60, 4 }
 0x119   : > { %9610 = vst [vmem:[#allocation24_spill] sm:$0xff] %v8459_v16  ;;  %6318 = vmatprep.mubr.msk.bf16.mxu1 %vm722_vm3, %v9611_v56  ;;  %v8501_v56 = vld [vmem:[%s6800_s13 + $0x74] sm:$0x1]  ;;  %v3827_v37 = vrot.slane %v3825_v8, 5  ;;  %v8514_v50 = vrot.slane %v3831_v11, 5  ;;  %v3837_v7 = vrot.slane %v3835_v14, 4  ;;  %v9616_v54 = vcombine.low %v8067_v30, %v8083_v55  ;;  %v8542_v49 = vpop.f32.mrf.mxu0 }
 0x11a   : > { %v8504_v58 = vpop.f32.mrf.mxu1  ;;  %v4441_v16 = vrot.slane %v4439_v19, 4  ;;  %v8527_v60 = vld [vmem:[%s6800_s13 + $0x80] sm:$0x1]  ;;  %v8530_v8 = vld [vmem:[%s6800_s13 + $0x6c] sm:$0xe]  ;;  %v3870_v11 = vshrl.u32 %v5683_v44, 16 }
 0x11b   : > { %9614 = vst [vmem:[#allocation27_spill] sm:$0xff] %v8504_v58  ;;  %v8523_v58 = vsel %vm7130_vm7, %v5759_v42, %v4439_v19  ;;  %v3873_v14 = vshll.u32 %v5683_v44, 16  ;;  %v3883_v24 = vshrl.u32 %v8509_v4, 16  ;;  %v3848_v19 = vrot.slane %v3846_v46, 4  ;;  %9618 = vst [vmem:[#allocation30_spill] sm:$0xff] %v8542_v49 }
 0x11c   : > { %v8538_v42 = vpop.f32.mrf.mxu1  ;;  %v3851_v35 = vrot.slane %v3849_v3, 5  ;;  %v8540_v18 = vrot.slane %v3855_v36, 5  ;;  %v3861_v10 = vrot.slane %v3859_v26, 4  ;;  %v9619_v44 = vcombine.low %v8087_v15, %v8115_v32  ;;  %v8561_v32 = vld [vmem:[%s6800_s13 + $0x8c] sm:$0x1] }
 0x11d   : > { %6353 = vmatmul.mubr.msk.bf16.gmra.mxu0 %vm722_vm3, %v6553_v41  ;;  %v3841_v41 = vshll.u32 %v8501_v56, 16  ;;  %9617 = vst [vmem:[#allocation29_spill] sm:$0xff] %v8538_v42  ;;  %v3828_v30 = vor.u32 %v3827_v37, %v3824_v33  ;;  %v3838_v55 = vor.u32 %v3837_v7, %v8514_v50  ;;  %v3865_v46 = vshll.u32 %v8527_v60, 16  ;;  %v5745_v33 = vld [vmem:[%s6800_s13 + $0x78] sm:$0xe] }
 0x11e   : > { %6356 = vmatprep.mubr.msk.bf16.mxu0 %vm722_vm3, %v6554_v59  ;;  %v3879_v59 = vshll.u32 %v8509_v4, 16  ;;  %v8552_v3 = vrot.slane %v3814_v45, 4  ;;  %v8556_v36 = vsel %vm7130_vm7, %v4441_v16, %v4442_v34  ;;  %v5760_v26 = vrot.slane %v8530_v8, 9  ;;  %v8566_v42 = vpop.f32.mrf.mxu1  ;;  %v5686_v8 = vld [vmem:[%s6800_s13 + $0x90] sm:$0xf] }
 0x11f   : > { %v4453_v15 = vrot.slane %v8483_v51, 5  ;;  %v3872_v37 = vrot.slane %v3870_v11, 4  ;;  %v3875_v7 = vrot.slane %v3873_v14, 5  ;;  %9620 = vst [vmem:[#allocation31_spill] sm:$0xff] %v8566_v42  ;;  %v3843_v45 = vrot.slane %v3841_v41, 5 }
 0x120   : > { %6319 = vmatmul.mubr.msk.bf16.gmra.mxu1 %vm722_vm3, %v9616_v54  ;;  %v4446_v54 = vrot.slane %v8445_v2, 5  ;;  %v8564_v2 = vrot.slane %v3879_v59, 5  ;;  %v4449_v49 = vrot.slane %v8501_v56, 5  ;;  %v3852_v16 = vor.u32 %v3851_v35, %v3848_v19  ;;  %v8575_v59 = vld [vmem:[%s6800_s13 + $0x94] sm:$0xf] }
 0x121   : > { %6322 = vmatprep.mubr.msk.bf16.mxu1 %vm722_vm3, %v9619_v44  ;;  %v3885_v44 = vrot.slane %v3883_v24, 4  ;;  %v3862_v34 = vor.u32 %v3861_v10, %v8540_v18  ;;  %v3829_v51 = vrot.slane %v3828_v30, 4  ;;  %v3839_v11 = vrot.slane %v3838_v55, 4 }
 0x122   : > { %v4448_v62 = vrot.slane %v4446_v54, 4  ;;  %v3867_v14 = vrot.slane %v3865_v46, 5  ;;  %v9621_v24 = vcombine.low %v8208_v61, %v8212_v40  ;;  %v5761_v56 = vrot.slane %v5745_v33, 9 }
 0x123   : > { %v4455_v35 = vrot.slane %v4453_v15, 4  ;;  %v4456_v10 = vrot.slane %v8527_v60, 5  ;;  %v3889_v41 = vshll.u32 %v8561_v32, 16  ;;  %v3886_v30 = vor.u32 %v3885_v44, %v8564_v2 }
 0x124   : > { %v3894_v55 = vshrl.u32 %v5686_v8, 16  ;;  %v3897_v46 = vshll.u32 %v5686_v8, 16  ;;  %v9623_v61 = vcombine.low %v8127_v9, %v8132_v47  ;;  %v3853_v40 = vrot.slane %v3852_v16, 4 }
 0x125   : > { %v8571_v28 = vpop.f32.mrf.mxu0  ;;  %6357 = vmatmul.mubr.msk.bf16.gmra.mxu0 %vm722_vm3, %v6555_v13  ;;  %v3876_v13 = vor.u32 %v3875_v7, %v3872_v37  ;;  %v3863_v33 = vrot.slane %v3862_v34, 4  ;;  %v3903_v60 = vshll.u32 %v8575_v59, 16  ;;  %v3820_v37 = vsel %vm6844_vm4, %v8552_v3, %v8497_v25 }
 0x126   : > { %6396 = vmatprep.mubr.msk.bf16.mxu0 %vm722_vm3, %v9621_v24  ;;  %v3907_v24 = vshrl.u32 %v8575_v59, 16  ;;  %v3834_v9 = vsel %vm6844_vm4, %v3829_v51, %v8514_v50  ;;  %v8607_v47 = vsel %vm7130_vm7, %v5760_v26, %v4446_v54  ;;  %v8611_v7 = vsel %vm7130_vm7, %v4448_v62, %v4449_v49  ;;  %v5746_v54 = vld [vmem:[%s6800_s13 + $0x84] sm:$0xe]  ;;  %v9662_v31 = vld [vmem:[#allocation31_spill] sm:$0xff] }
 0x127   : > { %v8583_v19 = vpop.f32.mrf.mxu0  ;;  %v8619_v25 = vsel %vm7130_vm7, %v5761_v56, %v4453_v15  ;;  %v8623_v50 = vsel %vm7130_vm7, %v4455_v35, %v4456_v10  ;;  %v3891_v3 = vrot.slane %v3889_v41, 5  ;;  %v3877_v62 = vrot.slane %v3876_v13, 4  ;;  %v8647_v13 = vld [vmem:[%s6800_s13 + $0x98] sm:$0x1] }
 0x128   : > { %9622 = vst [vmem:[#allocation32_spill] sm:$0xff] %v8583_v19  ;;  %v8586_v42 = vpop.f32.mrf.mxu1  ;;  %6323 = vmatmul.mubr.msk.bf16.gmra.mxu1 %vm722_vm3, %v9623_v61  ;;  %v3887_v49 = vrot.slane %v3886_v30, 4  ;;  %v3896_v16 = vrot.slane %v3894_v55, 4  ;;  %v3899_v34 = vrot.slane %v3897_v46, 5  ;;  %v3858_v15 = vsel %vm6844_vm4, %v3853_v40, %v8540_v18  ;;  %v5689_v30 = vld [vmem:[%s6800_s13 + $0x9c] sm:$0xf] }
 0x129   : > { %v8594_v19 = vpop.f32.mrf.mxu0  ;;  %6362 = vmatprep.mubr.msk.bf16.mxu1 %vm722_vm3, %v8278_v27  ;;  %v3844_v27 = vsel %vm6844_vm4, %v3839_v11, %v3843_v45  ;;  %v3868_v45 = vsel %vm6844_vm4, %v3863_v33, %v3867_v14  ;;  %v8635_v51 = vrot.slane %v3903_v60, 5  ;;  %v3909_v11 = vrot.slane %v3907_v24, 4  ;;  %v8678_v24 = vld [vmem:[%s6800_s13 + $0xa0] sm:$0xf] }
 0x12a   : > { %v8613_v44 = vpop.f32.mrf.mxu1  ;;  %v9624_v35 = vcombine.low %v8248_v48, %v8252_v38  ;;  %v5775_v10 = vcombine.low %v8471_v43, %v8488_v17  ;;  %v5776_v41 = vcombine.low %v8523_v58, %v8556_v36  ;;  %v5762_v18 = vrot.slane %v5746_v54, 9 }
 0x12b   : > { %v8626_v26 = vpop.f32.mrf.mxu0  ;;  %v4460_v14 = vrot.slane %v8509_v4, 5  ;;  %v9625_v48 = vcombine.low %v8331_v6, %v8335_v22  ;;  %v9626_v38 = vsel %vm6844_vm4, %v8490_v29, %v8449_v39  ;;  %v8663_v61 = vcombine.low %v3834_v9, %v3844_v27  ;;  %v5747_v29 = vld [vmem:[%s6800_s13 + $0x90] sm:$0xe]  ;;  %v9633_v4 = vld [vmem:[#allocation9_spill] sm:$0xff] }
 0x12c   : > { %v8628_v8 = vpop.f32.mrf.mxu1  ;;  %v8661_v46 = vcombine.low %v9626_v38, %v3820_v37  ;;  %v8669_v60 = vcombine.low %v3858_v15, %v3868_v45  ;;  %v3882_v6 = vsel %vm6844_vm4, %v3877_v62, %v8564_v2  ;;  %v3892_v22 = vsel %vm6844_vm4, %v3887_v49, %v3891_v3 }
 0x12d   : > { %v6194_v56 = vpop.f32.mrf.mxu0  ;;  %6397 = vmatmul.mubr.msk.bf16.vlgmr.msra.gmra.mxu0 %vm722_vm3, %v9624_v35  ;;  %v3900_v39 = vor.u32 %v3899_v34, %v3896_v16  ;;  %v3910_v9 = vor.u32 %v3909_v11, %v8635_v51  ;;  %v3913_v27 = vshll.u32 %v8647_v13, 16  ;;  %v3918_v54 = vshrl.u32 %v5689_v30, 16 }
 0x12e   : > { %v8650_v55 = vpop.f32.mrf.mxu1  ;;  %6400 = vmatprep.mubr.msk.bf16.mxu0 %vm722_vm3, %v9625_v48  ;;  %v3921_v15 = vshll.u32 %v5689_v30, 16  ;;  %v8689_v3 = vsel %vm7130_vm7, %v5762_v18, %v4460_v14  ;;  %v4462_v62 = vrot.slane %v4460_v14, 4  ;;  %v4463_v49 = vrot.slane %v8561_v32, 5 }
 0x12f   : > { %v1526_v33 = vpop.f32.mrf.mxu0  ;;  %v5763_v16 = vrot.slane %v5747_v29, 9  ;;  %v4467_v34 = vrot.slane %v8575_v59, 5  ;;  %v3927_v11 = vshll.u32 %v8678_v24, 16  ;;  %v3931_v35 = vshrl.u32 %v8678_v24, 16 }
 0x130   : > { %v6160_v37 = vpop.f32.mrf.mxu1  ;;  %6363 = vmatmul.mubr.msk.bf16.vlgmr.msra.gmra.mxu1 %vm722_vm3, %v8280_v57  ;;  %v8698_v48 = vcombine.low %v3882_v6, %v3892_v22  ;;  %v8700_v18 = vrot.slane %v3900_v39, 4  ;;  %v3911_v32 = vrot.slane %v3910_v9, 4  ;;  %v3915_v38 = vrot.slane %v3913_v27, 5  ;;  %v5692_v22 = vld [vmem:[%s6800_s13 + $0xa8] sm:$0xf] }
 0x131   : > { %v1110_v45 = vadd.f32 %v6160_v37, %v8176_v5  ;;  %v6195_v2 = vpop.f32.mrf.mxu0  ;;  %6366 = vmatprep.mubr.msk.bf16.mxu1 %vm722_vm3, %v8427_v23  ;;  %v3920_v29 = vrot.slane %v3918_v54, 4  ;;  %v3923_v59 = vrot.slane %v3921_v15, 5  ;;  %v4470_v6 = vrot.slane %v8647_v13, 5  ;;  %v8726_v27 = vld [vmem:[%s6800_s13 + $0xac] sm:$0xf] }
 0x132   : > { %v1101_v57 = vpop.f32.mrf.mxu1  ;;  %v3933_v9 = vrot.slane %v3931_v35, 4  ;;  %v9630_v35 = vld [vmem:[#allocation15_spill] sm:$0xff] }
 0x133   : > { %v8695_v5 = vadd.f32 %v6194_v56, %v1110_v45  ;;  %v1102_v23 = vadd.f32 %v1101_v57, %v8200_v20  ;;  %v1529_v30 = vpop.f32.mrf.mxu0  ;;  %v9627_v45 = vcombine.low %v8368_v63, %v8394_v52  ;;  %v8711_v20 = vsel %vm7130_vm7, %v4462_v62, %v4463_v49  ;;  %v5748_v62 = vld [vmem:[%s6800_s13 + $0x9c] sm:$0xe] }
 0x134   : > { %v6161_v14 = vpop.f32.mrf.mxu1  ;;  %v4469_v63 = vrot.slane %v4467_v34, 4  ;;  %v8723_v52 = vrot.slane %v3927_v11, 5  ;;  %v4474_v49 = vrot.slane %v8678_v24, 5  ;;  %v3951_v24 = vshll.u32 %v8726_v27, 16 }
 0x135   : > { %v8702_v37 = vadd.f32 %v1526_v33, %v1102_v23  ;;  %v1113_v40 = vadd.f32 %v6161_v14, %v8219_v53  ;;  %v6198_v56 = vpop.f32.mrf.mxu0  ;;  %6401 = vmatmul.mubr.msk.bf16.gmra.mxu0 %vm722_vm3, %v9627_v45  ;;  %v9628_v33 = vcombine.low %v8433_v21, %v8437_v1  ;;  %v8721_v53 = vsel %vm7130_vm7, %v5763_v16, %v4467_v34  ;;  %v5691_v1 = vld [vmem:[%s6800_s13 + $0xa4] sm:$0x1]  ;;  %v9629_v16 = vld [vmem:[#allocation18_spill] sm:$0xff] }
 0x136   : > { %v1104_v39 = vpop.f32.mrf.mxu1  ;;  %v3906_v21 = vsel %vm6844_vm4, %v8700_v18, %v8635_v51  ;;  %v3942_v34 = vshrl.u32 %v5692_v22, 16  ;;  %v9631_v51 = vld [vmem:[#allocation23_spill] sm:$0xff]  ;;  %v3955_v18 = vshrl.u32 %v8726_v27, 16 }
 0x137   : > { %6404 = vmatprep.mubr.msk.bf16.mxu0 %vm722_vm3, %v9628_v33  ;;  %v8728_v54 = vadd.f32 %v6195_v2, %v1113_v40  ;;  %v1105_v13 = vadd.f32 %v1104_v39, %v8264_v12  ;;  %v1542_v15 = vpop.f32.mrf.mxu0  ;;  %v3916_v40 = vsel %vm6844_vm4, %v3911_v32, %v3915_v38  ;;  %v3924_v2 = vor.u32 %v3923_v59, %v3920_v29  ;;  %v9632_v59 = vld [vmem:[#allocation19_spill] sm:$0xff] }
 0x138   : > { %v6164_v57 = vpop.f32.mrf.mxu1  ;;  %6367 = vmatmul.mubr.msk.bf16.gmra.mxu1 %vm722_vm3, %v9629_v16  ;;  %v3945_v12 = vshll.u32 %v5692_v22, 16  ;;  %v8751_v39 = vsel %vm7130_vm7, %v4469_v63, %v4470_v6  ;;  %v3934_v32 = vor.u32 %v3933_v9, %v8723_v52  ;;  %v3937_v38 = vshll.u32 %v5691_v1, 16 }
 0x139   : > { %v8742_v11 = vadd.f32 %v1529_v30, %v1105_v13  ;;  %v1126_v23 = vadd.f32 %v6164_v57, %v9630_v35  ;;  %v6199_v14 = vpop.f32.mrf.mxu0  ;;  %6370 = vmatprep.mubr.msk.bf16.mxu1 %vm722_vm3, %v9631_v51  ;;  %v5764_v30 = vrot.slane %v5748_v62, 9  ;;  %v4476_v13 = vrot.slane %v4474_v49, 4 }
 0x13a   : > { %v1117_v45 = vpop.f32.mrf.mxu1  ;;  %v4477_v57 = vrot.slane %v5691_v1, 5  ;;  %v8759_v51 = vrot.slane %v3924_v2, 4  ;;  %v3944_v6 = vrot.slane %v3942_v34, 4  ;;  %v3947_v63 = vrot.slane %v3945_v12, 5  ;;  %v8769_v1 = vld [vmem:[%s6800_s13 + $0xb0] sm:$0x1] }
 0x13b   : > { %v8754_v29 = vadd.f32 %v6198_v56, %v1126_v23  ;;  %v1118_v22 = vadd.f32 %v1117_v45, %v9632_v59  ;;  %v1545_v33 = vpop.f32.mrf.mxu0  ;;  %v8771_v23 = vrot.slane %v3951_v24, 5  ;;  %v3957_v2 = vrot.slane %v3955_v18, 4  ;;  %v9634_v12 = vld [vmem:[#allocation21_spill] sm:$0xff] }
 0x13c   : > { %v6165_v16 = vpop.f32.mrf.mxu1  ;;  %v8781_v43 = vrot.slane %v3934_v32, 4  ;;  %v8783_v17 = vrot.slane %v3937_v38, 5  ;;  %v8791_v58 = vsel %vm7130_vm7, %v5764_v30, %v4474_v49  ;;  %v8795_v36 = vsel %vm7130_vm7, %v4476_v13, %v4477_v57  ;;  %v8807_v30 = vld [vmem:[%s6800_s13 + $0xb8] sm:$0xf] }
 0x13d   : > { %v8761_v9 = vadd.f32 %v1542_v15, %v1118_v22  ;;  %v1129_v62 = vadd.f32 %v6165_v16, %v9633_v4  ;;  %v6202_v56 = vpop.f32.mrf.mxu0  ;;  %6405 = vmatmul.mubr.msk.bf16.gmra.mxu0 %vm722_vm3, %v5775_v10  ;;  %v8777_v15 = vcombine.low %v3906_v21, %v3916_v40  ;;  %v5749_v10 = vld [vmem:[%s6800_s13 + $0xa8] sm:$0xe]  ;;  %v9635_v40 = vld [vmem:[#allocation26_spill] sm:$0xff]  ;;  %v3948_v32 = vor.u32 %v3947_v63, %v3944_v6  ;;  %v9636_v22 = vld [vmem:[#allocation16_spill] sm:$0xff] }
 0x13e   : > { %v1120_v45 = vpop.f32.mrf.mxu1  ;;  %6408 = vmatprep.mubr.msk.bf16.mxu0 %vm722_vm3, %v5776_v41  ;;  %v5695_v41 = vld [vmem:[%s6800_s13 + $0xb4] sm:$0xf]  ;;  %v3961_v38 = vshll.u32 %v8769_v1, 16  ;;  %v4481_v49 = vrot.slane %v8726_v27, 5  ;;  %v3958_v16 = vor.u32 %v3957_v2, %v8771_v23  ;;  %v3940_v27 = vsel %vm6844_vm4, %v8781_v43, %v8783_v17 }
 0x13f   : > { %v8786_v34 = vadd.f32 %v6199_v14, %v1129_v62  ;;  %v1121_v24 = vadd.f32 %v1120_v45, %v9634_v12  ;;  %v1558_v18 = vpop.f32.mrf.mxu0  ;;  %v5765_v62 = vrot.slane %v5749_v10, 9  ;;  %v3966_v6 = vshrl.u32 %v5695_v41, 16 }
 0x140   : > { %v6168_v21 = vpop.f32.mrf.mxu1  ;;  %6371 = vmatmul.mubr.msk.bf16.gmra.mxu1 %vm722_vm3, %v9635_v40  ;;  %v3969_v63 = vshll.u32 %v5695_v41, 16  ;;  %v3975_v2 = vshll.u32 %v8807_v30, 16  ;;  %v3979_v10 = vshrl.u32 %v8807_v30, 16  ;;  %v5698_v40 = vld [vmem:[%s6800_s13 + $0xc0] sm:$0xf]  ;;  %v3949_v4 = vrot.slane %v3948_v32, 4 }
 0x141   : > { %v8809_v59 = vadd.f32 %v1545_v33, %v1121_v24  ;;  %v1142_v13 = vadd.f32 %v6168_v21, %v9636_v22  ;;  %v6203_v57 = vpop.f32.mrf.mxu0  ;;  %6374 = vmatprep.mubr.msk.bf16.mxu1 %vm722_vm3, %v8661_v46  ;;  %v9638_v24 = vld [vmem:[#allocation25_spill] sm:$0xff]  ;;  %v3963_v43 = vrot.slane %v3961_v38, 5  ;;  %v4483_v17 = vrot.slane %v4481_v49, 4 }
 0x142   : > { %v1133_v45 = vpop.f32.mrf.mxu1  ;;  %v4484_v33 = vrot.slane %v8769_v1, 5  ;;  %v8837_v14 = vsel %vm7130_vm7, %v5765_v62, %v4481_v49  ;;  %v8840_v32 = vld [vmem:[%s6800_s13 + $0xc4] sm:$0xf]  ;;  %v9642_v1 = vcombine.low %v8619_v25, %v8623_v50  ;;  %v8852_v62 = vrot.slane %v3975_v2, 5 }
 0x143   : > { %v8821_v12 = vadd.f32 %v6202_v56, %v1142_v13  ;;  %v1134_v21 = vadd.f32 %v1133_v45, %v9638_v24  ;;  %v1561_v46 = vpop.f32.mrf.mxu0  ;;  %v9640_v56 = vld [vmem:[#allocation28_spill] sm:$0xff]  ;;  %v9641_v45 = vcombine.low %v8607_v47, %v8611_v7  ;;  %v3959_v24 = vrot.slane %v3958_v16, 4  ;;  %v9643_v16 = vld [vmem:[#allocation30_spill] sm:$0xff] }
 0x144   : > { %v6169_v22 = vpop.f32.mrf.mxu1  ;;  %v3990_v47 = vshrl.u32 %v5698_v40, 16  ;;  %v3993_v7 = vshll.u32 %v5698_v40, 16  ;;  %v3954_v25 = vsel %vm6844_vm4, %v3949_v4, %v8771_v23  ;;  %v8861_v50 = vsel %vm7130_vm7, %v4483_v17, %v4484_v33  ;;  %v5750_v40 = vld [vmem:[%s6800_s13 + $0xb4] sm:$0xe] }
 0x145   : > { %9637 = vst [vmem:[#allocation18_spill] sm:$0xff] %v8821_v12  ;;  %v8828_v35 = vadd.f32 %v1558_v18, %v1134_v21  ;;  %v1145_v41 = vadd.f32 %v6169_v22, %v9640_v56  ;;  %v6206_v13 = vpop.f32.mrf.mxu0  ;;  %6409 = vmatmul.mubr.msk.bf16.gmra.mxu0 %vm722_vm3, %v9641_v45  ;;  %v8847_v18 = vld [vmem:[%s6800_s13 + $0xbc] sm:$0x1]  ;;  %v3968_v21 = vrot.slane %v3966_v6, 4  ;;  %v3971_v22 = vrot.slane %v3969_v63, 5 }
 0x146   : > { %v1136_v38 = vpop.f32.mrf.mxu1  ;;  %6412 = vmatprep.mubr.msk.bf16.mxu0 %vm722_vm3, %v9642_v1  ;;  %v4003_v6 = vshrl.u32 %v8840_v32, 16  ;;  %v3985_v23 = vshll.u32 %v8847_v18, 16  ;;  %v4488_v17 = vrot.slane %v8807_v30, 5  ;;  %v9644_v1 = vld [vmem:[#allocation32_spill] sm:$0xff] }
 0x147   : > { %9639 = vst [vmem:[#allocation15_spill] sm:$0xff] %v8828_v35  ;;  %v8849_v56 = vadd.f32 %v6203_v57, %v1145_v41  ;;  %v1137_v45 = vadd.f32 %v1136_v38, %v9643_v16  ;;  %v1574_v49 = vpop.f32.mrf.mxu0  ;;  %v3981_v35 = vrot.slane %v3979_v10, 4  ;;  %v3999_v57 = vshll.u32 %v8840_v32, 16 }
 0x148   : > { %v6172_v12 = vpop.f32.mrf.mxu1  ;;  %6375 = vmatmul.mubr.msk.bf16.gmra.mxu1 %vm722_vm3, %v8663_v61  ;;  %v3964_v61 = vsel %vm6844_vm4, %v3959_v24, %v3963_v43  ;;  %v3972_v33 = vor.u32 %v3971_v22, %v3968_v21  ;;  %v3992_v41 = vrot.slane %v3990_v47, 4  ;;  %v3995_v38 = vrot.slane %v3993_v7, 5 }
 0x149   : > { %v8865_v63 = vadd.f32 %v1561_v46, %v1137_v45  ;;  %v1158_v2 = vadd.f32 %v6172_v12, %v8571_v28  ;;  %v6207_v10 = vpop.f32.mrf.mxu0  ;;  %6378 = vmatprep.mubr.msk.bf16.mxu1 %vm722_vm3, %v8669_v60  ;;  %v9645_v60 = vsel %vm6844_vm4, %v8759_v51, %v8723_v52  ;;  %v3982_v24 = vor.u32 %v3981_v35, %v8852_v62 }
 0x14a   : > { %v1149_v4 = vpop.f32.mrf.mxu1  ;;  %v8883_v43 = vcombine.low %v9645_v60, %v3940_v27  ;;  %v8886_v30 = vcombine.low %v3954_v25, %v3964_v61  ;;  %v8890_v22 = vrot.slane %v3999_v57, 5  ;;  %v4005_v47 = vrot.slane %v4003_v6, 4  ;;  %v5700_v27 = vld [vmem:[%s6800_s13 + $0xc8] sm:$0x1] }
 0x14b   : > { %v8875_v46 = vadd.f32 %v6206_v13, %v1158_v2  ;;  %v1150_v28 = vadd.f32 %v1149_v4, %v9644_v1  ;;  %v1577_v12 = vpop.f32.mrf.mxu0  ;;  %v5782_v13 = vcombine.low %v8837_v14, %v8861_v50  ;;  %v9646_v52 = vcombine.low %v8689_v3, %v8711_v20  ;;  %v5701_v14 = vld [vmem:[%s6800_s13 + $0xcc] sm:$0xf]  ;;  %v8911_v20 = vld [vmem:[%s6800_s13 + $0xd0] sm:$0xf]  ;;  %v5751_v4 = vld [vmem:[%s6800_s13 + $0xc0] sm:$0xe] }
 0x14c   : > { %v6173_v21 = vpop.f32.mrf.mxu1  ;;  %v8899_v35 = vrot.slane %v3985_v23, 5  ;;  %v5766_v51 = vrot.slane %v5750_v40, 9  ;;  %v9647_v50 = vcombine.low %v8721_v53, %v8751_v39  ;;  %v4491_v57 = vrot.slane %v8847_v18, 5 }
 0x14d   : > { %v8892_v7 = vadd.f32 %v1574_v49, %v1150_v28  ;;  %v1161_v16 = vadd.f32 %v6173_v21, %v8594_v19  ;;  %v6210_v45 = vpop.f32.mrf.mxu0  ;;  %6413 = vmatmul.mubr.msk.bf16.gmra.mxu0 %vm722_vm3, %v9646_v52  ;;  %v8907_v49 = vrot.slane %v3972_v33, 4  ;;  %v4490_v19 = vrot.slane %v4488_v17, 4 }
 0x14e   : > { %v1152_v25 = vpop.f32.mrf.mxu1  ;;  %6416 = vmatprep.mubr.msk.bf16.mxu0 %vm722_vm3, %v9647_v50  ;;  %v3996_v3 = vor.u32 %v3995_v38, %v3992_v41  ;;  %v8916_v23 = vrot.slane %v3982_v24, 4  ;;  %v4495_v53 = vrot.slane %v8840_v32, 5  ;;  %v4006_v33 = vor.u32 %v4005_v47, %v8890_v22 }
 0x14f   : > { %v8913_v6 = vadd.f32 %v6207_v10, %v1161_v16  ;;  %v1153_v2 = vadd.f32 %v1152_v25, %v8626_v26  ;;  %v1590_v61 = vpop.f32.mrf.mxu0  ;;  %v4009_v18 = vshll.u32 %v5700_v27, 16  ;;  %v4014_v40 = vshrl.u32 %v5701_v14, 16  ;;  %v9650_v10 = vld [vmem:[#allocation11_spill] sm:$0xff]  ;;  %v9651_v16 = vld [vmem:[#allocation10_spill] sm:$0xff] }
 0x150   : > { %v6176_v39 = vpop.f32.mrf.mxu1  ;;  %6379 = vmatmul.mubr.msk.bf16.gmra.mxu1 %vm722_vm3, %v8698_v48  ;;  %v4017_v41 = vshll.u32 %v5701_v14, 16  ;;  %v4023_v28 = vshll.u32 %v8911_v20, 16  ;;  %v4027_v32 = vshrl.u32 %v8911_v20, 16  ;;  %v4489_v48 = vsel %vm7130_vm7, %v5766_v51, %v4488_v17  ;;  %v9652_v17 = vld [vmem:[#allocation13_spill] sm:$0xff] }
 0x151   : > { %9648 = vst [vmem:[#allocation23_spill] sm:$0xff] %v8913_v6  ;;  %v8923_v38 = vadd.f32 %v1577_v12, %v1153_v2  ;;  %v1174_v1 = vadd.f32 %v6176_v39, %v9650_v10  ;;  %v6211_v26 = vpop.f32.mrf.mxu0  ;;  %6382 = vmatprep.mubr.msk.bf16.mxu1 %vm722_vm3, %v8777_v15  ;;  %v4492_v24 = vsel %vm7130_vm7, %v4490_v19, %v4491_v57  ;;  %v3997_v21 = vrot.slane %v3996_v3, 4 }
 0x152   : > { %v1165_v60 = vpop.f32.mrf.mxu1  ;;  %v5767_v12 = vrot.slane %v5751_v4, 9  ;;  %v4497_v25 = vrot.slane %v4495_v53, 4  ;;  %v4498_v15 = vrot.slane %v5700_v27, 5  ;;  %v4007_v2 = vrot.slane %v4006_v33, 4  ;;  %v5703_v33 = vld [vmem:[%s6800_s13 + $0xd4] sm:$0x1] }
 0x153   : > { %9649 = vst [vmem:[#allocation19_spill] sm:$0xff] %v8923_v38  ;;  %v8934_v47 = vadd.f32 %v6210_v45, %v1174_v1  ;;  %v1166_v52 = vadd.f32 %v1165_v60, %v9651_v16  ;;  %v1593_v14 = vpop.f32.mrf.mxu0  ;;  %v4011_v39 = vrot.slane %v4009_v18, 5  ;;  %v4016_v10 = vrot.slane %v4014_v40, 4  ;;  %v9654_v18 = vld [vmem:[#allocation12_spill] sm:$0xff] }
 0x154   : > { %v6177_v50 = vpop.f32.mrf.mxu1  ;;  %v4019_v38 = vrot.slane %v4017_v41, 5  ;;  %v9653_v45 = vcombine.low %v8791_v58, %v8795_v36  ;;  %v8944_v57 = vrot.slane %v4023_v28, 5  ;;  %v4029_v27 = vrot.slane %v4027_v32, 4 }
 0x155   : > { %v8937_v6 = vadd.f32 %v1590_v61, %v1166_v52  ;;  %v1177_v51 = vadd.f32 %v6177_v50, %v9652_v17  ;;  %v6214_v19 = vpop.f32.mrf.mxu0  ;;  %v3978_v61 = vsel %vm6844_vm4, %v8907_v49, %v8852_v62  ;;  %v3988_v4 = vsel %vm6844_vm4, %v8916_v23, %v8899_v35  ;;  %v5752_v62 = vld [vmem:[%s6800_s13 + $0xcc] sm:$0xe]  ;;  %s5264_s13 = sshll.u32 %s9248_s12, 7 }
 0x156   : > { %6417 = vmatmul.mubr.msk.bf16.gmra.mxu0 %vm722_vm3, %v9653_v45  ;;  %v1168_v3 = vpop.f32.mrf.mxu1  ;;  %v4502_v58 = vrot.slane %v8911_v20, 5  ;;  %v4499_v1 = vsel %vm7130_vm7, %v4497_v25, %v4498_v15  ;;  %v5783_v35 = vcombine.low %v4489_v48, %v4492_v24  ;;  %v4002_v20 = vsel %vm6844_vm4, %v3997_v21, %v8890_v22  ;;  %v9656_v25 = vld [vmem:[#allocation17_spill] sm:$0xff]  ;;  %s9264_s14 = scalar_lea.vmem [#allocation2], %s5264_s13 }
 0x157   : > { %6420 = vmatprep.mubr.msk.bf16.mxu0 %vm722_vm3, %v5782_v13  ;;  %v8957_v36 = vadd.f32 %v6211_v26, %v1177_v51  ;;  %v1169_v40 = vadd.f32 %v1168_v3, %v9654_v18  ;;  %v1606_v41 = vpop.f32.mrf.mxu0  ;;  %v4496_v13 = vsel %vm7130_vm7, %v5767_v12, %v4495_v53  ;;  %v4012_v23 = vsel %vm6844_vm4, %v4007_v2, %v4011_v39  ;;  %v9655_v53 = vld [vmem:[#allocation14_spill] sm:$0xff]  ;;  %s5093_s26 = sshll.u32 %s9264_s14, 4  ;;  %s9348_s26 = int_to_ptr.vmem [resolvable:$true] %s5093_s26 }
 0x158   : > { %v6180_v49 = vpop.f32.mrf.mxu1  ;;  %6383 = vmatmul.mubr.msk.bf16.gmra.mxu1 %vm722_vm3, %v8883_v43  ;;  %v4020_v26 = vor.u32 %v4019_v38, %v4016_v10  ;;  %v4030_v12 = vor.u32 %v4029_v27, %v8944_v57  ;;  %v4033_v43 = vshll.u32 %v5703_v33, 16  ;;  %v5784_v24 = vcombine.low %v4496_v13, %v4499_v1  ;;  %s6558_s7 = scalar_lea.vmem %s9348_s26, 2048  ;;  %p6565_p1 = scmp.lt.s32.totalorder %s9348_s26, %s6563_s9 }
 0x159   : > { %v8972_v28 = vadd.f32 %v1593_v14, %v1169_v40  ;;  %v1190_v32 = vadd.f32 %v6180_v49, %v9655_v53  ;;  %v6215_v60 = vpop.f32.mrf.mxu0  ;;  %6386 = vmatprep.mubr.msk.bf16.mxu1 %vm722_vm3, %v8886_v30  ;;  %v5768_v16 = vrot.slane %v5752_v62, 9  ;;  %v4504_v52 = vrot.slane %v4502_v58, 4  ;;  %v9657_v30 = vld [vmem:[#allocation20_spill] sm:$0xff]  ;;  %p6559_p12 = scmp.ne.s32.totalorder %s9348_s26, %s6558_s7  ;;  %p6566_p2 = scmp.lt.s32.totalorder %s6564_s10, %s6558_s7 }
 0x15a   : > { %v1181_v48 = vpop.f32.mrf.mxu1  ;;  %v4505_v22 = vrot.slane %v5703_v33, 5  ;;  %v5718_v50 = vcombine.low %v3978_v61, %v3988_v4  ;;  %v5719_v2 = vcombine.low %v4002_v20, %v4012_v23  ;;  %v4021_v39 = vrot.slane %v4020_v26, 4  ;;  %v9658_v33 = vld [vmem:[#allocation22_spill] sm:$0xff]  ;;  %v9659_v62 = vld [vmem:[#allocation24_spill] sm:$0xff]  ;;  %v9660_v26 = vld [vmem:[#allocation27_spill] sm:$0xff] }
 0x15b   : > { %v8978_v21 = vadd.f32 %v6214_v19, %v1190_v32  ;;  %v1182_v38 = vadd.f32 %v1181_v48, %v9656_v25  ;;  %v1609_v14 = vpop.f32.mrf.mxu0  ;;  %v4031_v45 = vrot.slane %v4030_v12, 4  ;;  %v4035_v27 = vrot.slane %v4033_v43, 5  ;;  %v9661_v43 = vld [vmem:[#allocation29_spill] sm:$0xff]  ;;  %p6560_p13 = pnand %p6559_p12, %p6764_p4  ;;  %p6567_p3 = por %p6566_p2, %p6565_p1 }
 0x15c   : > { %v6181_v15 = vpop.f32.mrf.mxu1  ;;  %v4503_v19 = vsel %vm7130_vm7, %v5768_v16, %v4502_v58  ;;  %v4506_v61 = vsel %vm7130_vm7, %v4504_v52, %v4505_v22  ;;  %v4026_v13 = vsel %vm6844_vm4, %v4021_v39, %v8944_v57 }
 0x15d   : > { %v8981_v10 = vadd.f32 %v1606_v41, %v1182_v38  ;;  %v1193_v17 = vadd.f32 %v6181_v15, %v9657_v30  ;;  %v6218_v51 = vpop.f32.mrf.mxu0  ;;  %v4036_v0 = vsel %vm6844_vm4, %v4031_v45, %v4035_v27  ;;  %p6561_p0 = pneg %p6560_p13 }
 0x15e   : > { %6421 = vmatmul.mubr.msk.bf16.gmra.mxu0 %vm722_vm3, %v5783_v35  ;;  %v1184_v3 = vpop.f32.mrf.mxu1  ;;  %v5785_v35 = vcombine.low %v4503_v19, %v4506_v61  ;;  %v5720_v12 = vcombine.low %v4026_v13, %v4036_v0 }
 0x15f   : > { %6424 = vmatprep.mubr.msk.bf16.mxu0 %vm722_vm3, %v5784_v24  ;;  %v8990_v4 = vadd.f32 %v6215_v60, %v1193_v17  ;;  %v1185_v18 = vadd.f32 %v1184_v3, %v9658_v33  ;;  %v1622_v40 = vpop.f32.mrf.mxu0  ;;  %p6568_p5 = pnand %p6567_p3, %p6561_p0 }
 0x160   : > { %v6184_v41 = vpop.f32.mrf.mxu1  ;;  %6387 = vmatmul.mubr.msk.bf16.gmra.mxu1 %vm722_vm3, %v5718_v50 }
 0x161   : > { %v8997_v1 = vadd.f32 %v1609_v14, %v1185_v18  ;;  %v1206_v49 = vadd.f32 %v6184_v41, %v9659_v62  ;;  %v6219_v58 = vpop.f32.mrf.mxu0  ;;  %6390 = vmatprep.mubr.msk.bf16.mxu1 %vm722_vm3, %v5719_v2 }
 0x162   : > { %v1197_v20 = vpop.f32.mrf.mxu1 }
 0x163   : > { %v9003_v23 = vadd.f32 %v6218_v51, %v1206_v49  ;;  %v1198_v53 = vadd.f32 %v1197_v20, %v9660_v26  ;;  %v1625_v32 = vpop.f32.mrf.mxu0 }
 0x164   : > { %v6185_v60 = vpop.f32.mrf.mxu1 }
 0x165   : > { %v9006_v57 = vadd.f32 %v1622_v40, %v1198_v53  ;;  %v1209_v48 = vadd.f32 %v6185_v60, %v9661_v43  ;;  %v6222_v24 = vpop.f32.mrf.mxu0 }
 0x166   : > { %6425 = vmatmul.mubr.msk.bf16.gmra.mxu0 %vm722_vm3, %v5785_v35  ;;  %v1200_v16 = vpop.f32.mrf.mxu1 }
 0x167   : > { %v9010_v52 = vadd.f32 %v6219_v58, %v1209_v48  ;;  %v1201_v22 = vadd.f32 %v1200_v16, %v9662_v31  ;;  %v1638_v25 = vpop.f32.mrf.mxu0 }
 0x168   : > { %v6188_v38 = vpop.f32.mrf.mxu1  ;;  %6391 = vmatmul.mubr.msk.bf16.gmra.mxu1 %vm722_vm3, %v5720_v12 }
 0x169   : > { %v9014_v14 = vadd.f32 %v1625_v32, %v1201_v22  ;;  %v1222_v15 = vadd.f32 %v6188_v38, %v8586_v42  ;;  %v6223_v50 = vpop.f32.mrf.mxu0 }
 0x16a   : > { %v1213_v2 = vpop.f32.mrf.mxu1 }
 0x16b   : > { %v9017_v39 = vadd.f32 %v6222_v24, %v1222_v15  ;;  %v1214_v30 = vadd.f32 %v1213_v2, %v8613_v44  ;;  %v1641_v17 = vpop.f32.mrf.mxu0 }
 0x16c   : > { %v6189_v51 = vpop.f32.mrf.mxu1 }
 0x16d   : > { %v9020_v45 = vadd.f32 %v1638_v25, %v1214_v30  ;;  %v1225_v27 = vadd.f32 %v6189_v51, %v8628_v8  ;;  %v6262_v3 = vpop.f32.mrf.mxu0  ;;  %v9663_v30 = vld [vmem:[#allocation18_spill] sm:$0xff] }
 0x16e   : > { %v1216_v19 = vpop.f32.mrf.mxu1 }
 0x16f   : > { %v9023_v61 = vadd.f32 %v6223_v50, %v1225_v27  ;;  %v1217_v33 = vadd.f32 %v1216_v19, %v8650_v55  ;;  %v2614_v18 = vpop.f32.mrf.mxu0 }
 0x170   : > { %v6228_v42 = vpop.f32.mrf.mxu1 }
 0x171   : > { %v9026_v40 = vadd.f32 %v1641_v17, %v1217_v33  ;;  %v2017_v41 = vadd.f32 %v6228_v42, %v8695_v5  ;;  %v6263_v13 = vpop.f32.mrf.mxu0 }
 0x172   : > { %v1888_v44 = vpop.f32.mrf.mxu1 }
 0x173   : > { %v9029_v62 = vadd.f32 %v6262_v3, %v2017_v41  ;;  %v2015_v49 = vadd.f32 %v1888_v44, %v8702_v37  ;;  %v2617_v58 = vpop.f32.mrf.mxu0  ;;  %v9664_v3 = vld [vmem:[#allocation15_spill] sm:$0xff] }
 0x174   : > { %v6229_v8 = vpop.f32.mrf.mxu1 }
 0x175   : > { %v9032_v0 = vadd.f32 %v2614_v18, %v2015_v49  ;;  %v2018_v35 = vadd.f32 %v6229_v8, %v8728_v54  ;;  %v6266_v20 = vpop.f32.mrf.mxu0 }
 0x176   : > { %v1891_v55 = vpop.f32.mrf.mxu1 }
 0x177   : > { %v9035_v26 = vadd.f32 %v6263_v13, %v2018_v35  ;;  %v2016_v53 = vadd.f32 %v1891_v55, %v8742_v11  ;;  %v2630_v32 = vpop.f32.mrf.mxu0 }
 0x178   : > { %v6232_v5 = vpop.f32.mrf.mxu1 }
 0x179   : > { %v9038_v60 = vadd.f32 %v2617_v58, %v2016_v53  ;;  %v2021_v12 = vadd.f32 %v6232_v5, %v8754_v29  ;;  %v6267_v43 = vpop.f32.mrf.mxu0 }
 0x17a   : > { %v1904_v37 = vpop.f32.mrf.mxu1 }
 0x17b   : > { %v9041_v48 = vadd.f32 %v6266_v20, %v2021_v12  ;;  %v2019_v24 = vadd.f32 %v1904_v37, %v8761_v9  ;;  %v2633_v16 = vpop.f32.mrf.mxu0 }
 0x17c   : > { %v6233_v54 = vpop.f32.mrf.mxu1 }
 0x17d   : > { %v9044_v31 = vadd.f32 %v2630_v32, %v2019_v24  ;;  %v2022_v22 = vadd.f32 %v6233_v54, %v8786_v34  ;;  %v6270_v25 = vpop.f32.mrf.mxu0  ;;  %v9666_v54 = vld [vmem:[#allocation19_spill] sm:$0xff] }
 0x17e   : > { %v1907_v11 = vpop.f32.mrf.mxu1 }
 0x17f   : > { %v9047_v38 = vadd.f32 %v6267_v43, %v2022_v22  ;;  %v2020_v15 = vadd.f32 %v1907_v11, %v8809_v59  ;;  %v2646_v50 = vpop.f32.mrf.mxu0  ;;  %v9665_v43 = vld [vmem:[#allocation23_spill] sm:$0xff] }
 0x180   : > { %v6236_v29 = vpop.f32.mrf.mxu1 }
 0x181   : > { %v9050_v2 = vadd.f32 %v2633_v16, %v2020_v15  ;;  %v2025_v17 = vadd.f32 %v6236_v29, %v9663_v30  ;;  %v6271_v51 = vpop.f32.mrf.mxu0 }
 0x182   : > { %v1920_v9 = vpop.f32.mrf.mxu1 }
 0x183   : > { %v9053_v27 = vadd.f32 %v6270_v25, %v2025_v17  ;;  %v2023_v19 = vadd.f32 %v1920_v9, %v9664_v3  ;;  %v2649_v33 = vpop.f32.mrf.mxu0 }
 0x184   : > { %v6237_v34 = vpop.f32.mrf.mxu1 }
 0x185   : > { %v9056_v18 = vadd.f32 %v2646_v50, %v2023_v19  ;;  %v2026_v42 = vadd.f32 %v6237_v34, %v8849_v56  ;;  %v6274_v41 = vpop.f32.mrf.mxu0 }
 0x186   : > { %v1923_v59 = vpop.f32.mrf.mxu1 }
 0x187   : > { %v9059_v13 = vadd.f32 %v6271_v51, %v2026_v42  ;;  %v2024_v44 = vadd.f32 %v1923_v59, %v8865_v63  ;;  %v2662_v49 = vpop.f32.mrf.mxu0 }
 0x188   : > { %v6240_v58 = vpop.f32.mrf.mxu1 }
 0x189   : > { %v9062_v8 = vadd.f32 %v2649_v33, %v2024_v44  ;;  %v2029_v35 = vadd.f32 %v6240_v58, %v8875_v46  ;;  %v6275_v20 = vpop.f32.mrf.mxu0 }
 0x18a   : > { %v1936_v55 = vpop.f32.mrf.mxu1 }
 0x18b   : > { %v9065_v53 = vadd.f32 %v6274_v41, %v2029_v35  ;;  %v2027_v32 = vadd.f32 %v1936_v55, %v8892_v7  ;;  %v2665_v5 = vpop.f32.mrf.mxu0 }
 0x18c   : > { %v6241_v56 = vpop.f32.mrf.mxu1 }
 0x18d   : > { %v9068_v12 = vadd.f32 %v2662_v49, %v2027_v32  ;;  %v2030_v37 = vadd.f32 %v6241_v56, %v9665_v43  ;;  %v6278_v24 = vpop.f32.mrf.mxu0 }
 0x18e   : > { %v1939_v63 = vpop.f32.mrf.mxu1 }
 0x18f   : > { %v9071_v16 = vadd.f32 %v6275_v20, %v2030_v37  ;;  %v2028_v22 = vadd.f32 %v1939_v63, %v9666_v54  ;;  %v2678_v25 = vpop.f32.mrf.mxu0 }
 0x190   : > { %v6244_v46 = vpop.f32.mrf.mxu1 }
 0x191   : > { %v9074_v11 = vadd.f32 %v2665_v5, %v2028_v22  ;;  %v2033_v15 = vadd.f32 %v6244_v46, %v8934_v47  ;;  %v6279_v50 = vpop.f32.mrf.mxu0 }
 0x192   : > { %v1952_v7 = vpop.f32.mrf.mxu1 }
 0x193   : > { %v9077_v29 = vadd.f32 %v6278_v24, %v2033_v15  ;;  %v2031_v30 = vadd.f32 %v1952_v7, %v8937_v6  ;;  %v2681_v17 = vpop.f32.mrf.mxu0 }
 0x194   : > { %v6245_v51 = vpop.f32.mrf.mxu1 }
 0x195   : > { %v9080_v9 = vadd.f32 %v2678_v25, %v2031_v30  ;;  %v2034_v3 = vadd.f32 %v6245_v51, %v8957_v36  ;;  %v6282_v19 = vpop.f32.mrf.mxu0 }
 0x196   : > { %v1955_v33 = vpop.f32.mrf.mxu1 }
 0x197   : > { %v9083_v34 = vadd.f32 %v6279_v50, %v2034_v3  ;;  %v2032_v42 = vadd.f32 %v1955_v33, %v8972_v28  ;;  %v2694_v41 = vpop.f32.mrf.mxu0 }
 0x198   : > { %v6248_v47 = vpop.f32.mrf.mxu1 }
 0x199   : > { %v9086_v59 = vadd.f32 %v2681_v17, %v2032_v42  ;;  %v2037_v44 = vadd.f32 %v6248_v47, %v8978_v21  ;;  %v6283_v49 = vpop.f32.mrf.mxu0 }
 0x19a   : > { %v1968_v6 = vpop.f32.mrf.mxu1 }
 0x19b   : > { %v9089_v58 = vadd.f32 %v6282_v19, %v2037_v44  ;;  %v2035_v35 = vadd.f32 %v1968_v6, %v8981_v10  ;;  %v2697_v20 = vpop.f32.mrf.mxu0 }
 0x19c   : > { %v6249_v36 = vpop.f32.mrf.mxu1 }
 0x19d   : > { %v9092_v55 = vadd.f32 %v2694_v41, %v2035_v35  ;;  %v2038_v32 = vadd.f32 %v6249_v36, %v8990_v4  ;;  %v6286_v5 = vpop.f32.mrf.mxu0 }
 0x19e   : > { %v1971_v28 = vpop.f32.mrf.mxu1 }
 0x19f   : > { %9667 = vst [vmem:[#allocation9_spill] sm:$0xff] %v9092_v55  ;;  %v9095_v56 = vadd.f32 %v6283_v49, %v2038_v32  ;;  %v2036_v43 = vadd.f32 %v1971_v28, %v8997_v1  ;;  %v2710_v37 = vpop.f32.mrf.mxu0 }
 0x1a0   : > { %v6252_v21 = vpop.f32.mrf.mxu1 }
 0x1a1   : > { %9668 = vst [vmem:[#allocation21_spill] sm:$0xff] %v9095_v56  ;;  %v9098_v24 = vadd.f32 %v2697_v20, %v2036_v43  ;;  %v2041_v63 = vadd.f32 %v6252_v21, %v9003_v23  ;;  %v6287_v54 = vpop.f32.mrf.mxu0 }
 0x1a2   : > { %v1984_v10 = vpop.f32.mrf.mxu1 }
 0x1a3   : > { %9669 = vst [vmem:[#allocation26_spill] sm:$0xff] %v9098_v24  ;;  %v9101_v22 = vadd.f32 %v6286_v5, %v2041_v63  ;;  %v2039_v25 = vadd.f32 %v1984_v10, %v9006_v57  ;;  %v2713_v46 = vpop.f32.mrf.mxu0 }
 0x1a4   : > { %v6253_v4 = vpop.f32.mrf.mxu1 }
 0x1a5   : > { %v9104_v15 = vadd.f32 %v2710_v37, %v2039_v25  ;;  %v2042_v50 = vadd.f32 %v6253_v4, %v9010_v52  ;;  %v6290_v7 = vpop.f32.mrf.mxu0 }
 0x1a6   : > { %v1987_v1 = vpop.f32.mrf.mxu1 }
 0x1a7   : > { %9670 = vst [vmem:[#allocation16_spill] sm:$0xff] %v9104_v15  ;;  %v9107_v30 = vadd.f32 %v6287_v54, %v2042_v50  ;;  %v2040_v17 = vadd.f32 %v1987_v1, %v9014_v14  ;;  %v2726_v51 = vpop.f32.mrf.mxu0 }
 0x1a8   : > { %v6256_v23 = vpop.f32.mrf.mxu1 }
 0x1a9   : > { %9671 = vst [vmem:[#allocation25_spill] sm:$0xff] %v9107_v30  ;;  %v9110_v3 = vadd.f32 %v2713_v46, %v2040_v17  ;;  %v2045_v19 = vadd.f32 %v6256_v23, %v9017_v39  ;;  %v6291_v33 = vpop.f32.mrf.mxu0 }
 0x1aa   : > { %v2000_v57 = vpop.f32.mrf.mxu1 }
 0x1ab   : > { %9672 = vst [vmem:[#allocation28_spill] sm:$0xff] %v9110_v3  ;;  %v9113_v42 = vadd.f32 %v6290_v7, %v2045_v19  ;;  %v2043_v41 = vadd.f32 %v2000_v57, %v9020_v45  ;;  %v2729_v47 = vpop.f32.mrf.mxu0 }
 0x1ac   : > { %v6257_v52 = vpop.f32.mrf.mxu1 }
 0x1ad   : > { %v9116_v44 = vadd.f32 %v2726_v51, %v2043_v41  ;;  %v2046_v49 = vadd.f32 %v6257_v52, %v9023_v61  ;;  %v6330_v6 = vpop.f32.mrf.mxu0 }
 0x1ae   : > { %v2003_v14 = vpop.f32.mrf.mxu1 }
 0x1af   : > { %9673 = vst [vmem:[#allocation30_spill] sm:$0xff] %v9116_v44  ;;  %v9119_v35 = vadd.f32 %v6291_v33, %v2046_v49  ;;  %v2044_v20 = vadd.f32 %v2003_v14, %v9026_v40  ;;  %v3446_v36 = vpop.f32.mrf.mxu0 }
 0x1b0   : > { %v6296_v39 = vpop.f32.mrf.mxu1 }
 0x1b1   : > { %9674 = vst [vmem:[#allocation32_spill] sm:$0xff] %v9119_v35  ;;  %v9122_v32 = vadd.f32 %v2729_v47, %v2044_v20  ;;  %v3213_v5 = vadd.f32 %v6296_v39, %v9029_v62  ;;  %v9125_v28 = vpop.f32.mrf.mxu0 }
 0x1b2   : > { %v3084_v45 = vpop.f32.mrf.mxu1 }
 0x1b3   : > { %9675 = vst [vmem:[#allocation11_spill] sm:$0xff] %v9122_v32  ;;  %v9127_v43 = vadd.f32 %v6330_v6, %v3213_v5  ;;  %v3211_v37 = vadd.f32 %v3084_v45, %v9032_v0  ;;  %v9130_v61 = vpop.f32.mrf.mxu0 }
 0x1b4   : > { %v9132_v21 = vpop.f32.mrf.mxu1 }
 0x1b5   : > { %v9134_v63 = vadd.f32 %v3446_v36, %v3211_v37  ;;  %v6334_v40 = vpop.f32.mrf.mxu0 }
 0x1b6   : > { %v9136_v54 = vpop.f32.mrf.mxu1 }
 0x1b7   : > { %v9138_v10 = vpop.f32.mrf.mxu0 }
 0x1b8   : > { %v6300_v25 = vpop.f32.mrf.mxu1 }
 0x1b9   : > { %v3217_v62 = vadd.f32 %v6300_v25, %v9041_v48  ;;  %v9141_v46 = vpop.f32.mrf.mxu0 }
 0x1ba   : > { %v9143_v4 = vpop.f32.mrf.mxu1 }
 0x1bb   : > { %v9145_v50 = vadd.f32 %v6334_v40, %v3217_v62  ;;  %v9147_v0 = vpop.f32.mrf.mxu0 }
 0x1bc   : > { %v9149_v7 = vpop.f32.mrf.mxu1 }
 0x1bd   : > { %v6338_v1 = vpop.f32.mrf.mxu0 }
 0x1be   : > { %v9151_v17 = vpop.f32.mrf.mxu1 }
 0x1bf   : > { %v9153_v51 = vpop.f32.mrf.mxu0 }
 0x1c0   : > { %v6304_v23 = vpop.f32.mrf.mxu1 }
 0x1c1   : > { %v3221_v19 = vadd.f32 %v6304_v23, %v9053_v27  ;;  %v9156_v33 = vpop.f32.mrf.mxu0 }
 0x1c2   : > { %v9158_v48 = vpop.f32.mrf.mxu1 }
 0x1c3   : > { %v9160_v57 = vadd.f32 %v6338_v1, %v3221_v19  ;;  %v9162_v41 = vpop.f32.mrf.mxu0 }
 0x1c4   : > { %v9164_v47 = vpop.f32.mrf.mxu1 }
 0x1c5   : > { %v6342_v52 = vpop.f32.mrf.mxu0 }
 0x1c6   : > { %v9166_v49 = vpop.f32.mrf.mxu1 }
 0x1c7   : > { %v9168_v6 = vpop.f32.mrf.mxu0 }
 0x1c8   : > { %v6308_v14 = vpop.f32.mrf.mxu1 }
 0x1c9   : > { %v3225_v20 = vadd.f32 %v6308_v14, %v9065_v53  ;;  %v9171_v36 = vpop.f32.mrf.mxu0 }
 0x1ca   : > { %v9173_v27 = vpop.f32.mrf.mxu1 }
 0x1cb   : > { %v9175_v39 = vadd.f32 %v6342_v52, %v3225_v20  ;;  %v9177_v5 = vpop.f32.mrf.mxu0 }
 0x1cc   : > { %v9179_v45 = vpop.f32.mrf.mxu1 }
 0x1cd   : > { %v6346_v37 = vpop.f32.mrf.mxu0 }
 0x1ce   : > { %v9181_v40 = vpop.f32.mrf.mxu1 }
 0x1cf   : > { %v9183_v25 = vpop.f32.mrf.mxu0 }
 0x1d0   : > { %v6312_v62 = vpop.f32.mrf.mxu1 }
 0x1d1   : > { %v3229_v1 = vadd.f32 %v6312_v62, %v9077_v29  ;;  %v9186_v23 = vpop.f32.mrf.mxu0 }
 0x1d2   : > { %v9188_v53 = vpop.f32.mrf.mxu1 }
 0x1d3   : > { %v9190_v19 = vadd.f32 %v6346_v37, %v3229_v1  ;;  %v9192_v52 = vpop.f32.mrf.mxu0 }
 0x1d4   : > { %9676 = vst [vmem:[#allocation10_spill] sm:$0xff] %v9192_v52  ;;  %v9194_v14 = vpop.f32.mrf.mxu1 }
 0x1d5   : > { %v6350_v20 = vpop.f32.mrf.mxu0 }
 0x1d6   : > { %v9196_v32 = vpop.f32.mrf.mxu1 }
 0x1d7   : > { %v9198_v35 = vpop.f32.mrf.mxu0 }
 0x1d8   : > { %9677 = vst [vmem:[#allocation13_spill] sm:$0xff] %v9198_v35  ;;  %v6316_v44 = vpop.f32.mrf.mxu1 }
 0x1d9   : > { %v3233_v3 = vadd.f32 %v6316_v44, %v9089_v58  ;;  %v9201_v30 = vpop.f32.mrf.mxu0 }
 0x1da   : > { %9678 = vst [vmem:[#allocation12_spill] sm:$0xff] %v9201_v30  ;;  %v9203_v29 = vpop.f32.mrf.mxu1 }
 0x1db   : > { %v9205_v62 = vadd.f32 %v6350_v20, %v3233_v3  ;;  %v9207_v37 = vpop.f32.mrf.mxu0 }
 0x1dc   : > { %9680 = vst [vmem:[#allocation17_spill] sm:$0xff] %v9207_v37  ;;  %v9209_v1 = vpop.f32.mrf.mxu1 }
 0x1dd   : > { %9679 = vst [vmem:[#allocation14_spill] sm:$0xff] %v9205_v62  ;;  %v6354_v15 = vpop.f32.mrf.mxu0 }
 0x1de   : > { %v9211_v24 = vpop.f32.mrf.mxu1 }
 0x1df   : > { %9681 = vst [vmem:[#allocation20_spill] sm:$0xff] %v9211_v24  ;;  %v9213_v56 = vpop.f32.mrf.mxu0 }
 0x1e0   : > { %9682 = vst [vmem:[#allocation22_spill] sm:$0xff] %v9213_v56  ;;  %v6320_v55 = vpop.f32.mrf.mxu1 }
 0x1e1   : > { %v3237_v35 = vadd.f32 %v6320_v55, %v9101_v22  ;;  %v9216_v52 = vpop.f32.mrf.mxu0 }
 0x1e2   : > { %9683 = vst [vmem:[#allocation24_spill] sm:$0xff] %v9216_v52  ;;  %v9218_v58 = vpop.f32.mrf.mxu1 }
 0x1e3   : > { %9684 = vst [vmem:[#allocation27_spill] sm:$0xff] %v9218_v58  ;;  %v9220_v44 = vadd.f32 %v6354_v15, %v3237_v35  ;;  %v9222_v3 = vpop.f32.mrf.mxu0 }
 0x1e4   : > { %9686 = vst [vmem:[#allocation31_spill] sm:$0xff] %v9222_v3  ;;  %v9224_v20 = vpop.f32.mrf.mxu1 }
 0x1e5   : > { %9685 = vst [vmem:[#allocation29_spill] sm:$0xff] %v9220_v44  ;;  %9687 = vst [vmem:[#allocation18_spill] sm:$0xff] %v9224_v20  ;;  %v6358_v37 = vpop.f32.mrf.mxu0 }
 0x1e6   : > { %v9226_v62 = vpop.f32.mrf.mxu1 }
 0x1e7   : > { %9688 = vst [vmem:[#allocation15_spill] sm:$0xff] %v9226_v62  ;;  %v9228_v30 = vpop.f32.mrf.mxu0 }
 0x1e8   : > { %9689 = vst [vmem:[#allocation23_spill] sm:$0xff] %v9228_v30  ;;  %v6324_v56 = vpop.f32.mrf.mxu1  ;;  %v3214_v30 = vadd.f32 %v9132_v21, %v9035_v26 }
 0x1e9   : > { %v3241_v24 = vadd.f32 %v6324_v56, %v9113_v42  ;;  %v9231_v55 = vpop.f32.mrf.mxu0  ;;  %v3212_v56 = vadd.f32 %v9136_v54, %v9038_v60  ;;  %v3215_v60 = vadd.f32 %v9143_v4, %v9044_v31  ;;  %v3218_v54 = vadd.f32 %v9149_v7, %v9047_v38 }
 0x1ea   : > { %9690 = vst [vmem:[#allocation19_spill] sm:$0xff] %v9231_v55  ;;  %v9233_v22 = vpop.f32.mrf.mxu1 }
 0x1eb   : > { %9691 = vst [vmem:[#allocation33_spill] sm:$0xff] %v9233_v22  ;;  %v9235_v52 = vadd.f32 %v6358_v37, %v3241_v24  ;;  %v9237_v15 = vpop.f32.mrf.mxu0  ;;  %v3576_v24 = vadd.f32 %v9125_v28, %v3214_v30  ;;  %v3574_v26 = vadd.f32 %v9130_v61, %v3212_v56  ;;  %v3580_v31 = vadd.f32 %v9141_v46, %v3218_v54 }
 0x1ec   : > { %9693 = vst [vmem:[#allocation35_spill] sm:$0xff] %v9237_v15  ;;  %v9239_v35 = vpop.f32.mrf.mxu1 }
 0x1ed   : > { %9692 = vst [vmem:[#allocation34_spill] sm:$0xff] %v9235_v52  ;;  %9694 = vst [vmem:[#allocation36_spill] sm:$0xff] %v9239_v35  ;;  %v6398_v3 = vpop.f32.mrf.mxu0 }
 0x1ee   : > { %v9241_v44 = vpop.f32.mrf.mxu1 }
 0x1ef   : > { %9695 = vst [vmem:[#allocation37_spill] sm:$0xff] %v9241_v44  ;;  %v4642_v62 = vpop.f32.mrf.mxu0 }
 0x1f0   : > { %v6364_v20 = vpop.f32.mrf.mxu1 }
 0x1f1   : > { %v6399_v42 = vpop.f32.mrf.mxu0  ;;  %v4301_v37 = vadd.f32 %v6364_v20, %v9127_v43 }
 0x1f2   : > { %v4172_v55 = vpop.f32.mrf.mxu1 }
 0x1f3   : > { %v4299_v15 = vadd.f32 %v4172_v55, %v9134_v63  ;;  %v4645_v52 = vpop.f32.mrf.mxu0  ;;  %v4771_v58 = vadd.f32 %v6398_v3, %v4301_v37  ;;  %v3216_v63 = vadd.f32 %v9151_v17, %v9050_v2 }
 0x1f4   : > { %v6365_v44 = vpop.f32.mrf.mxu1 }
 0x1f5   : > { %v4302_v21 = vadd.f32 %v6365_v44, %v3576_v24  ;;  %v6402_v35 = vpop.f32.mrf.mxu0  ;;  %v4769_v30 = vadd.f32 %v4642_v62, %v4299_v15  ;;  %v3577_v24 = vadd.f32 %v9138_v10, %v3215_v60  ;;  %v3219_v10 = vadd.f32 %v9158_v48, %v9056_v18 }
 0x1f6   : > { %v4175_v22 = vpop.f32.mrf.mxu1  ;;  %v5001_v15 = vmul.f32 %v4771_v58, %v4771_v58 }
 0x1f7   : > { %v4772_v28 = vadd.f32 %v6399_v42, %v4302_v21  ;;  %v4300_v43 = vadd.f32 %v4175_v22, %v3574_v26  ;;  %v4658_v20 = vpop.f32.mrf.mxu0  ;;  %v4999_v7 = vmul.f32 %v4769_v30, %v4769_v30  ;;  %v3222_v21 = vadd.f32 %v9164_v47, %v9059_v13 }
 0x1f8   : > { %v6368_v55 = vpop.f32.mrf.mxu1 }
 0x1f9   : > { %v5882_v61 = vpack.c.bf16 %v4772_v28, %v4771_v58  ;;  %v4770_v44 = vadd.f32 %v4645_v52, %v4300_v43  ;;  %v6403_v56 = vpop.f32.mrf.mxu0  ;;  %v4305_v4 = vadd.f32 %v6368_v55, %v9145_v50  ;;  %v3578_v52 = vadd.f32 %v9147_v0, %v3216_v63 }
 0x1fa   : > { %v4188_v38 = vpop.f32.mrf.mxu1  ;;  %v5002_v60 = vmul.f32 %v4772_v28, %v4772_v28 }
 0x1fb   : > { %5954 = vst [vmem:[%s9264_s14 + $0x8] sm:$0xff] %v5882_v61   ;;  %v5877_v62 = vpack.c.bf16 %v4770_v44, %v4769_v30  ;;  %v4961_v3 = vadd.f32 %v4770_v44, %v4769_v30  ;;  %v5000_v2 = vmul.f32 %v4770_v44, %v4770_v44  ;;  %v4661_v17 = vpop.f32.mrf.mxu0  ;;  %v4303_v22 = vadd.f32 %v4188_v38, %v3577_v24 }
 0x1fc   : > { %v6369_v46 = vpop.f32.mrf.mxu1  ;;  %v4775_v54 = vadd.f32 %v6402_v35, %v4305_v4  ;;  %v3581_v61 = vadd.f32 %v9153_v51, %v3219_v10  ;;  %v3584_v4 = vadd.f32 %v9156_v33, %v3222_v21 }
 0x1fd   : > { %5878 = vst [vmem:[%s9264_s14] sm:$0xff] %v5877_v62   ;;  %v4962_v50 = vadd.f32 %v4961_v3, %v4771_v58  ;;  %v5031_v42 = vadd.f32 %v5000_v2, %v4999_v7  ;;  %v4306_v37 = vadd.f32 %v6369_v46, %v3580_v31  ;;  %v6406_v26 = vpop.f32.mrf.mxu0  ;;  %v4773_v30 = vadd.f32 %v4658_v20, %v4303_v22 }
 0x1fe   : > { %v4191_v43 = vpop.f32.mrf.mxu1  ;;  %v3220_v58 = vadd.f32 %v9166_v49, %v9062_v8  ;;  %v5005_v22 = vmul.f32 %v4775_v54, %v4775_v54 }
 0x1ff   : > { %v5032_v55 = vadd.f32 %v5031_v42, %v5001_v15  ;;  %v4963_v0 = vadd.f32 %v4962_v50, %v4772_v28  ;;  %v4776_v63 = vadd.f32 %v6403_v56, %v4306_v37  ;;  %v4304_v18 = vadd.f32 %v4191_v43, %v3578_v52  ;;  %v4674_v48 = vpop.f32.mrf.mxu0 }
 0x200   : > { %v6372_v44 = vpop.f32.mrf.mxu1  ;;  %v5003_v31 = vmul.f32 %v4773_v30, %v4773_v30  ;;  %v3582_v2 = vadd.f32 %v9162_v41, %v3220_v58  ;;  %v3223_v52 = vadd.f32 %v9173_v27, %v9068_v12 }
 0x201   : > { %v4964_v24 = vadd.f32 %v4963_v0, %v4773_v30  ;;  %v5033_v38 = vadd.f32 %v5032_v55, %v5002_v60  ;;  %v5892_v13 = vpack.c.bf16 %v4776_v63, %v4775_v54  ;;  %v6407_v47 = vpop.f32.mrf.mxu0  ;;  %v4774_v35 = vadd.f32 %v4661_v17, %v4304_v18 }
 0x202   : > { %v4204_v20 = vpop.f32.mrf.mxu1  ;;  %v4309_v56 = vadd.f32 %v6372_v44, %v9160_v57  ;;  %v3226_v17 = vadd.f32 %v9179_v45, %v9071_v16  ;;  %v5006_v41 = vmul.f32 %v4776_v63, %v4776_v63  ;;  %v3585_v27 = vadd.f32 %v9168_v6, %v3223_v52 }
 0x203   : > { %v5034_v28 = vadd.f32 %v5033_v38, %v5003_v31  ;;  %5956 = vst [vmem:[%s9264_s14 + $0x18] sm:$0xff] %v5892_v13   ;;  %v4307_v7 = vadd.f32 %v4204_v20, %v3581_v61  ;;  %v4677_v51 = vpop.f32.mrf.mxu0  ;;  %v5887_v62 = vpack.c.bf16 %v4774_v35, %v4773_v30  ;;  %v4965_v3 = vadd.f32 %v4964_v24, %v4774_v35 }
 0x204   : > { %v5004_v8 = vmul.f32 %v4774_v35, %v4774_v35  ;;  %v6373_v49 = vpop.f32.mrf.mxu1  ;;  %v4779_v42 = vadd.f32 %v6406_v26, %v4309_v56  ;;  %v3224_v16 = vadd.f32 %v9181_v40, %v9074_v11  ;;  %v3588_v0 = vadd.f32 %v9171_v36, %v3226_v17 }
 0x205   : > { %v4310_v33 = vadd.f32 %v6373_v49, %v3584_v4  ;;  %v6410_v10 = vpop.f32.mrf.mxu0  ;;  %5955 = vst [vmem:[%s9264_s14 + $0x10] sm:$0xff] %v5887_v62   ;;  %v4966_v46 = vadd.f32 %v4965_v3, %v4775_v54  ;;  %v4777_v15 = vadd.f32 %v4674_v48, %v4307_v7  ;;  %v3227_v36 = vadd.f32 %v9188_v53, %v9080_v9 }
 0x206   : > { %v5035_v57 = vadd.f32 %v5034_v28, %v5004_v8  ;;  %v4207_v50 = vpop.f32.mrf.mxu1  ;;  %v3586_v40 = vadd.f32 %v9177_v5, %v3224_v16  ;;  %v3230_v13 = vadd.f32 %v9194_v14, %v9083_v34  ;;  %v5009_v20 = vmul.f32 %v4779_v42, %v4779_v42 }
 0x207   : > { %v4780_v37 = vadd.f32 %v6407_v47, %v4310_v33  ;;  %v4308_v21 = vadd.f32 %v4207_v50, %v3582_v2  ;;  %v4690_v60 = vpop.f32.mrf.mxu0  ;;  %v4967_v43 = vadd.f32 %v4966_v46, %v4776_v63  ;;  %v5007_v26 = vmul.f32 %v4777_v15, %v4777_v15 }
 0x208   : > { %v5036_v30 = vadd.f32 %v5035_v57, %v5005_v22  ;;  %v6376_v12 = vpop.f32.mrf.mxu1  ;;  %v3589_v53 = vadd.f32 %v9183_v25, %v3227_v36  ;;  %v3228_v34 = vadd.f32 %v9196_v32, %v9086_v59  ;;  %v3592_v17 = vadd.f32 %v9186_v23, %v3230_v13  ;;  %v9696_v32 = vld [vmem:[#allocation10_spill] sm:$0xff]  ;;  %v9702_v36 = vld [vmem:[#allocation12_spill] sm:$0xff] }
 0x209   : > { %v5902_v45 = vpack.c.bf16 %v4780_v37, %v4779_v42  ;;  %v4778_v55 = vadd.f32 %v4677_v51, %v4308_v21  ;;  %v6411_v54 = vpop.f32.mrf.mxu0  ;;  %v4968_v18 = vadd.f32 %v4967_v43, %v4777_v15  ;;  %v4313_v63 = vadd.f32 %v6376_v12, %v9175_v39 }
 0x20a   : > { %v5037_v48 = vadd.f32 %v5036_v30, %v5006_v41  ;;  %v4220_v61 = vpop.f32.mrf.mxu1  ;;  %v5010_v5 = vmul.f32 %v4780_v37, %v4780_v37  ;;  %v9697_v41 = vld [vmem:[#allocation9_spill] sm:$0xff] }
 0x20b   : > { %5958 = vst [vmem:[%s9264_s14 + $0x28] sm:$0xff] %v5902_v45   ;;  %v5897_v58 = vpack.c.bf16 %v4778_v55, %v4777_v15  ;;  %v5008_v44 = vmul.f32 %v4778_v55, %v4778_v55  ;;  %v4311_v24 = vadd.f32 %v4220_v61, %v3585_v27  ;;  %v4693_v6 = vpop.f32.mrf.mxu0  ;;  %v4969_v38 = vadd.f32 %v4968_v18, %v4778_v55  ;;  %v9698_v30 = vld [vmem:[#allocation21_spill] sm:$0xff] }
 0x20c   : > { %v5038_v31 = vadd.f32 %v5037_v48, %v5007_v26  ;;  %v6377_v11 = vpop.f32.mrf.mxu1  ;;  %v4783_v7 = vadd.f32 %v6410_v10, %v4313_v63  ;;  %v3231_v23 = vadd.f32 %v9203_v29, %v9697_v41  ;;  %v3234_v43 = vadd.f32 %v9209_v1, %v9698_v30  ;;  %v9699_v63 = vld [vmem:[#allocation13_spill] sm:$0xff]  ;;  %v9700_v1 = vld [vmem:[#allocation26_spill] sm:$0xff] }
 0x20d   : > { %5957 = vst [vmem:[%s9264_s14 + $0x20] sm:$0xff] %v5897_v58   ;;  %v4314_v47 = vadd.f32 %v6377_v11, %v3588_v0  ;;  %v6414_v35 = vpop.f32.mrf.mxu0  ;;  %v4970_v4 = vadd.f32 %v4969_v38, %v4779_v42  ;;  %v4781_v39 = vadd.f32 %v4690_v60, %v4311_v24  ;;  %v3590_v60 = vadd.f32 %v9696_v32, %v3228_v34  ;;  %v9706_v34 = vld [vmem:[#allocation27_spill] sm:$0xff] }
 0x20e   : > { %v5039_v28 = vadd.f32 %v5038_v31, %v5008_v44  ;;  %v4223_v56 = vpop.f32.mrf.mxu1  ;;  %v5013_v16 = vmul.f32 %v4783_v7, %v4783_v7  ;;  %v3593_v24 = vadd.f32 %v9699_v63, %v3231_v23  ;;  %v3596_v13 = vadd.f32 %v9702_v36, %v3234_v43  ;;  %v9709_v23 = vld [vmem:[#allocation22_spill] sm:$0xff]  ;;  %v9710_v43 = vld [vmem:[#allocation28_spill] sm:$0xff]  ;;  %v9716_v36 = vld [vmem:[#allocation33_spill] sm:$0xff] }
 0x20f   : > { %v4784_v51 = vadd.f32 %v6411_v54, %v4314_v47  ;;  %v4312_v62 = vadd.f32 %v4223_v56, %v3586_v40  ;;  %v4706_v3 = vpop.f32.mrf.mxu0  ;;  %v4971_v49 = vadd.f32 %v4970_v4, %v4780_v37  ;;  %v5011_v10 = vmul.f32 %v4781_v39, %v4781_v39  ;;  %v9703_v56 = vld [vmem:[#allocation14_spill] sm:$0xff] }
 0x210   : > { %v5040_v8 = vadd.f32 %v5039_v28, %v5009_v20  ;;  %v6380_v9 = vpop.f32.mrf.mxu1 }
 0x211   : > { %v5912_v14 = vpack.c.bf16 %v4784_v51, %v4783_v7  ;;  %v4782_v2 = vadd.f32 %v4693_v6, %v4312_v62  ;;  %v6415_v52 = vpop.f32.mrf.mxu0  ;;  %v4972_v33 = vadd.f32 %v4971_v49, %v4781_v39  ;;  %v4317_v50 = vadd.f32 %v6380_v9, %v9190_v19  ;;  %v9701_v6 = vld [vmem:[#allocation20_spill] sm:$0xff]  ;;  %v9704_v49 = vld [vmem:[#allocation17_spill] sm:$0xff] }
 0x212   : > { %v5041_v22 = vadd.f32 %v5040_v8, %v5010_v5  ;;  %v4236_v46 = vpop.f32.mrf.mxu1  ;;  %v5014_v61 = vmul.f32 %v4784_v51, %v4784_v51  ;;  %v3232_v31 = vadd.f32 %v9701_v6, %v9700_v1 }
 0x213   : > { %5960 = vst [vmem:[%s9264_s14 + $0x38] sm:$0xff] %v5912_v14   ;;  %v5907_v57 = vpack.c.bf16 %v4782_v2, %v4781_v39  ;;  %v5012_v15 = vmul.f32 %v4782_v2, %v4782_v2  ;;  %v4315_v42 = vadd.f32 %v4236_v46, %v3589_v53  ;;  %v4709_v25 = vpop.f32.mrf.mxu0  ;;  %v4973_v21 = vadd.f32 %v4972_v33, %v4782_v2  ;;  %v9705_v53 = vld [vmem:[#allocation16_spill] sm:$0xff]  ;;  %v9707_v2 = vld [vmem:[#allocation25_spill] sm:$0xff] }
 0x214   : > { %v5042_v37 = vadd.f32 %v5041_v22, %v5011_v10  ;;  %v6381_v59 = vpop.f32.mrf.mxu1  ;;  %v4787_v0 = vadd.f32 %v6414_v35, %v4317_v50  ;;  %v3594_v9 = vadd.f32 %v9704_v49, %v3232_v31  ;;  %v3235_v14 = vadd.f32 %v9706_v34, %v9705_v53 }
 0x215   : > { %5959 = vst [vmem:[%s9264_s14 + $0x30] sm:$0xff] %v5907_v57   ;;  %v4318_v12 = vadd.f32 %v6381_v59, %v3592_v17  ;;  %v4974_v45 = vadd.f32 %v4973_v21, %v4783_v7  ;;  %v4785_v19 = vadd.f32 %v4706_v3, %v4315_v42 }
 0x216   : > { %v6418_v27 = vpop.f32.mrf.mxu0  ;;  %v5043_v55 = vadd.f32 %v5042_v37, %v5012_v15  ;;  %v4239_v54 = vpop.f32.mrf.mxu1  ;;  %v5017_v22 = vmul.f32 %v4787_v0, %v4787_v0  ;;  %v3597_v30 = vadd.f32 %v9709_v23, %v3235_v14 }
 0x217   : > { %v4788_v18 = vadd.f32 %v6415_v52, %v4318_v12  ;;  %v4316_v26 = vadd.f32 %v4239_v54, %v3590_v60  ;;  %v4975_v44 = vadd.f32 %v4974_v45, %v4784_v51  ;;  %v5015_v35 = vmul.f32 %v4785_v19, %v4785_v19  ;;  %v9708_v52 = vld [vmem:[#allocation18_spill] sm:$0xff]  ;;  %v9711_v12 = vld [vmem:[#allocation15_spill] sm:$0xff]  ;;  %v9712_v54 = vld [vmem:[#allocation24_spill] sm:$0xff] }
 0x218   : > { %v4722_v48 = vpop.f32.mrf.mxu0  ;;  %v5044_v58 = vadd.f32 %v5043_v55, %v5013_v16  ;;  %v6384_v29 = vpop.f32.mrf.mxu1  ;;  %v3238_v17 = vadd.f32 %v9708_v52, %v9707_v2  ;;  %v3236_v16 = vadd.f32 %v9711_v12, %v9710_v43  ;;  %v9719_v2 = vld [vmem:[#allocation23_spill] sm:$0xff] }
 0x219   : > { %v5922_v38 = vpack.c.bf16 %v4788_v18, %v4787_v0  ;;  %v4786_v11 = vadd.f32 %v4709_v25, %v4316_v26  ;;  %v4976_v47 = vadd.f32 %v4975_v44, %v4785_v19  ;;  %v4321_v7 = vadd.f32 %v6384_v29, %v9703_v56 }
 0x21a   : > { %v6419_v40 = vpop.f32.mrf.mxu0  ;;  %v5045_v20 = vadd.f32 %v5044_v58, %v5014_v61  ;;  %v4252_v4 = vpop.f32.mrf.mxu1  ;;  %v5018_v59 = vmul.f32 %v4788_v18, %v4788_v18 }
 0x21b   : > { %5962 = vst [vmem:[%s9264_s14 + $0x48] sm:$0xff] %v5922_v38   ;;  %v5917_v28 = vpack.c.bf16 %v4786_v11, %v4785_v19  ;;  %v5016_v39 = vmul.f32 %v4786_v11, %v4786_v11  ;;  %v4319_v51 = vadd.f32 %v4252_v4, %v3593_v24  ;;  %v4977_v5 = vadd.f32 %v4976_v47, %v4786_v11  ;;  %v9714_v38 = vld [vmem:[#allocation31_spill] sm:$0xff]  ;;  %v9717_v47 = vld [vmem:[#allocation32_spill] sm:$0xff] }
 0x21c   : > { %v4725_v62 = vpop.f32.mrf.mxu0  ;;  %v5046_v3 = vadd.f32 %v5045_v20, %v5015_v35  ;;  %v6385_v8 = vpop.f32.mrf.mxu1  ;;  %v4791_v42 = vadd.f32 %v6418_v27, %v4321_v7  ;;  %v3598_v11 = vadd.f32 %v9714_v38, %v3236_v16  ;;  %v9718_v35 = vld [vmem:[#allocation36_spill] sm:$0xff]  ;;  %v9724_v16 = vld [vmem:[#allocation35_spill] sm:$0xff] }
 0x21d   : > { %5961 = vst [vmem:[%s9264_s14 + $0x40] sm:$0xff] %v5917_v28   ;;  %v4322_v33 = vadd.f32 %v6385_v8, %v3596_v13  ;;  %v4978_v46 = vadd.f32 %v4977_v5, %v4787_v0  ;;  %v4789_v15 = vadd.f32 %v4722_v48, %v4319_v51  ;;  %v3600_v0 = vadd.f32 %v9712_v54, %v3238_v17  ;;  %v9720_v17 = vld [vmem:[#allocation11_spill] sm:$0xff] }
 0x21e   : > { %v6422_v10 = vpop.f32.mrf.mxu0  ;;  %v5047_v57 = vadd.f32 %v5046_v3, %v5016_v39  ;;  %v4255_v50 = vpop.f32.mrf.mxu1  ;;  %v3242_v20 = vadd.f32 %v9718_v35, %v9717_v47  ;;  %v5021_v39 = vmul.f32 %v4791_v42, %v4791_v42 }
 0x21f   : > { %v4792_v25 = vadd.f32 %v6419_v40, %v4322_v33  ;;  %v4320_v37 = vadd.f32 %v4255_v50, %v3594_v9  ;;  %v4979_v60 = vadd.f32 %v4978_v46, %v4788_v18  ;;  %v5019_v27 = vmul.f32 %v4789_v15, %v4789_v15  ;;  %v9713_v18 = vld [vmem:[#allocation29_spill] sm:$0xff]  ;;  %v9715_v40 = vld [vmem:[#allocation30_spill] sm:$0xff] }
 0x220   : > { %v4738_v21 = vpop.f32.mrf.mxu0  ;;  %v5048_v32 = vadd.f32 %v5047_v57, %v5017_v22  ;;  %v6388_v41 = vpop.f32.mrf.mxu1  ;;  %v3239_v13 = vadd.f32 %v9716_v36, %v9715_v40  ;;  %v9721_v33 = vld [vmem:[#allocation37_spill] sm:$0xff] }
 0x221   : > { %v5932_v45 = vpack.c.bf16 %v4792_v25, %v4791_v42  ;;  %v4790_v55 = vadd.f32 %v4725_v62, %v4320_v37  ;;  %v4980_v26 = vadd.f32 %v4979_v60, %v4789_v15  ;;  %v4325_v29 = vadd.f32 %v6388_v41, %v9713_v18 }
 0x222   : > { %v6423_v19 = vpop.f32.mrf.mxu0  ;;  %v5049_v48 = vadd.f32 %v5048_v32, %v5018_v59  ;;  %v4268_v61 = vpop.f32.mrf.mxu1  ;;  %v5022_v49 = vmul.f32 %v4792_v25, %v4792_v25  ;;  %v3601_v52 = vadd.f32 %v9719_v2, %v3239_v13  ;;  %v3240_v22 = vadd.f32 %v9721_v33, %v9720_v17 }
 0x223   : > { %5964 = vst [vmem:[%s9264_s14 + $0x58] sm:$0xff] %v5932_v45   ;;  %v5927_v58 = vpack.c.bf16 %v4790_v55, %v4789_v15  ;;  %v5020_v44 = vmul.f32 %v4790_v55, %v4790_v55  ;;  %v4323_v63 = vadd.f32 %v4268_v61, %v3597_v30  ;;  %v4981_v6 = vadd.f32 %v4980_v26, %v4790_v55  ;;  %v9722_v15 = vld [vmem:[#allocation19_spill] sm:$0xff] }
 0x224   : > { %v4741_v24 = vpop.f32.mrf.mxu0  ;;  %v5050_v1 = vadd.f32 %v5049_v48, %v5019_v27  ;;  %v6389_v31 = vpop.f32.mrf.mxu1  ;;  %v4795_v3 = vadd.f32 %v6422_v10, %v4325_v29  ;;  %v3604_v50 = vadd.f32 %v9722_v15, %v3242_v20  ;;  %v3602_v45 = vadd.f32 %v9724_v16, %v3240_v22 }
 0x225   : > { %5963 = vst [vmem:[%s9264_s14 + $0x50] sm:$0xff] %v5927_v58   ;;  %v4326_v4 = vadd.f32 %v6389_v31, %v3600_v0  ;;  %v4982_v56 = vadd.f32 %v4981_v6, %v4791_v42  ;;  %v4793_v51 = vadd.f32 %v4738_v21, %v4323_v63 }
 0x226   : > { %v6426_v28 = vpop.f32.mrf.mxu0  ;;  %v5051_v7 = vadd.f32 %v5050_v1, %v5020_v44  ;;  %v4271_v62 = vpop.f32.mrf.mxu1 }
 0x227   : > { %v4796_v5 = vadd.f32 %v6423_v19, %v4326_v4  ;;  %v4324_v8 = vadd.f32 %v4271_v62, %v3598_v11  ;;  %v4983_v53 = vadd.f32 %v4982_v56, %v4792_v25  ;;  %v5023_v10 = vmul.f32 %v4793_v51, %v4793_v51  ;;  %v9723_v25 = vld [vmem:[#allocation34_spill] sm:$0xff] }
 0x228   : > { %v5052_v9 = vadd.f32 %v5051_v7, %v5021_v39  ;;  %v6392_v34 = vpop.f32.mrf.mxu1  ;;  %v4754_v14 = vpop.f32.mrf.mxu0  ;;  %v5025_v19 = vmul.f32 %v4795_v3, %v4795_v3 }
 0x229   : > { %v5942_v46 = vpack.c.bf16 %v4796_v5, %v4795_v3  ;;  %v4794_v57 = vadd.f32 %v4741_v24, %v4324_v8  ;;  %v4984_v42 = vadd.f32 %v4983_v53, %v4793_v51  ;;  %v4329_v60 = vadd.f32 %v6392_v34, %v9723_v25 }
 0x22a   : > { %v5053_v37 = vadd.f32 %v5052_v9, %v5022_v49  ;;  %v4284_v21 = vpop.f32.mrf.mxu1  ;;  %v6427_v12 = vpop.f32.mrf.mxu0  ;;  %v5026_v44 = vmul.f32 %v4796_v5, %v4796_v5 }
 0x22b   : > { %5966 = vst [vmem:[%s9264_s14 + $0x68] sm:$0xff] %v5942_v46   ;;  %v5937_v59 = vpack.c.bf16 %v4794_v57, %v4793_v51  ;;  %v5024_v32 = vmul.f32 %v4794_v57, %v4794_v57  ;;  %v4327_v41 = vadd.f32 %v4284_v21, %v3601_v52  ;;  %v4985_v30 = vadd.f32 %v4984_v42, %v4794_v57 }
 0x22c   : > { %v5054_v23 = vadd.f32 %v5053_v37, %v5023_v10  ;;  %v6393_v43 = vpop.f32.mrf.mxu1  ;;  %v4799_v48 = vadd.f32 %v6426_v28, %v4329_v60  ;;  %v4757_v63 = vpop.f32.mrf.mxu0 }
 0x22d   : > { %5965 = vst [vmem:[%s9264_s14 + $0x60] sm:$0xff] %v5937_v59   ;;  %v4330_v55 = vadd.f32 %v6393_v43, %v3604_v50  ;;  %v4986_v54 = vadd.f32 %v4985_v30, %v4795_v3  ;;  %v4797_v26 = vadd.f32 %v4754_v14, %v4327_v41 }
 0x22e   : > { %v5055_v0 = vadd.f32 %v5054_v23, %v5024_v32  ;;  %v4287_v27 = vpop.f32.mrf.mxu1  ;;  %v5029_v47 = vmul.f32 %v4799_v48, %v4799_v48 }
 0x22f   : > { %v4800_v61 = vadd.f32 %v6427_v12, %v4330_v55  ;;  %v4328_v58 = vadd.f32 %v4287_v27, %v3602_v45  ;;  %v4987_v29 = vadd.f32 %v4986_v54, %v4796_v5  ;;  %v5027_v31 = vmul.f32 %v4797_v26, %v4797_v26 }
 0x230   : > { %v5056_v18 = vadd.f32 %v5055_v0, %v5025_v19 }
 0x231   : > { %v5952_v24 = vpack.c.bf16 %v4800_v61, %v4799_v48  ;;  %v4798_v1 = vadd.f32 %v4757_v63, %v4328_v58  ;;  %v4988_v6 = vadd.f32 %v4987_v29, %v4797_v26 }
 0x232   : > { %v5057_v38 = vadd.f32 %v5056_v18, %v5026_v44 }
 0x233   : > { %5968 = vst [vmem:[%s9264_s14 + $0x78] sm:$0xff] %v5952_v24   ;;  %v5947_v11 = vpack.c.bf16 %v4798_v1, %v4797_v26  ;;  %v5028_v40 = vmul.f32 %v4798_v1, %v4798_v1  ;;  %v4989_v13 = vadd.f32 %v4988_v6, %v4798_v1 }
 0x234   : > { %v5058_v36 = vadd.f32 %v5057_v38, %v5027_v31 }
 0x235   : > { %5967 = vst [vmem:[%s9264_s14 + $0x70] sm:$0xff] %v5947_v11   ;;  %v4990_v35 = vadd.f32 %v4989_v13, %v4799_v48 }
 0x236   : > { %v5059_v20 = vadd.f32 %v5058_v36, %v5028_v40 }
 0x237   : > { %6571 = shalt.err (!%p6568_p5)
}
 0x238   : > { %s6572_s11 = scalar_lea.hbm %s9346_s5, 2048  ;;  %s6576_s24 = scalar_lea.hbm %s9471_s2, 4096 }
 0x239   : > { %p6573_p6 = scmp.ne.s32.totalorder %s9346_s5, %s6572_s11  ;;  %p6577_p10 = scmp.lt.s32.totalorder %s9346_s5, %s9471_s2 }
 0x23a   : > { %p6578_p11 = scmp.lt.s32.totalorder %s6576_s24, %s6572_s11 }
 0x23b   : > { %p6574_p7 = pnand %p6573_p6, %p6764_p4 }
 0x23c   : > { %p6579_p12 = por %p6578_p11, %p6577_p10 }
 0x23d   : > { %p6575_p9 = pneg %p6574_p7 }
 0x23f   : > { %p6580_p13 = pnand %p6579_p12, %p6575_p9 }
 0x241   : > { %6583 = shalt.err (!%p6580_p13)
}
 0x242   : > { %s6693_s7 = smov 64   ;;  %s6694_s8 = smov 4   ;;  %v5030_v4 = vmul.f32 %v4800_v61, %v4800_v61  ;;  %v4991_v28 = vadd.f32 %v4990_v35, %v4800_v61  ;;  %v5060_v39 = vadd.f32 %v5059_v20, %v5029_v47 }
 0x243   : > { %6441 = dma.vmem_to_hbm [thread:$0]  (%p6764_p4), %s9348_s26, 2048, %s9346_s5, %s5070_s6, %s6693_s7, %s6693_s7, %s6694_s8  }
 0x244   : > { %v4992_v56 = vrot.slane %v4991_v28, 4  ;;  %v5061_v7 = vadd.f32 %v5060_v39, %v5030_v4  ;;  %s9377_s9 = sand.u32 1, %s5259_s21   ;;  %s5837_s10 = sshll.u32 %s6682_s18, 4 }
 0x245   : > { %s218_s11 = scalar_lea.vmem [#allocation4], %s9248_s12  ;;  %s224_s5 = scalar_lea.vmem [#allocation6], %s9248_s12 }
 0x246   : > { %v5062_v51 = vrot.slane %v5061_v7, 4  ;;  %v4993_v62 = vadd.f32 %v4992_v56, %v4991_v28  ;;  %s5110_s26 = sshll.u32 %s218_s11, 4  ;;  %s5124_s6 = sshll.u32 %s224_s5, 4  ;;  %s9389_s26 = int_to_ptr.vmem [resolvable:$true] %s5110_s26  ;;  %s9396_s6 = int_to_ptr.vmem [resolvable:$true] %s5124_s6 }
 0x247   : > { %s9387_s24 = scalar_lea.hbm %s9472_s3, %s5837_s10  ;;  %s9394_s29 = scalar_lea.hbm %s9473_s4, %s5837_s10 }
 0x248   : > { %v4994_v3 = vrot.slane %v4993_v62, 2  ;;  %v5063_v5 = vadd.f32 %v5062_v51, %v5061_v7  ;;  %s5075_s30 = scalar_lea.sflag [#allocation5], %s9377_s9  ;;  %s6584_s7 = scalar_lea.vmem %s9389_s26, 16 }
 0x249   : > { %p6585_p0 = scmp.ne.s32.totalorder %s9389_s26, %s6584_s7  ;;  %s6695_s8 = smov [#allocation4]  }
 0x24a   : > { %v4995_v8 = vadd.f32 %v4994_v3, %v4993_v62  ;;  %v5064_v49 = vrot.slane %v5063_v5, 2  ;;  %s6588_s13 = sshll.u32 %s6695_s8, 4  ;;  %s6589_s13 = int_to_ptr.vmem [resolvable:$false] %s6588_s13 }
 0x24b   : > { %p6586_p1 = pnand %p6585_p0, %p6764_p4  ;;  %s6590_s14 = scalar_lea.vmem %s6589_s13, 32 }
 0x24c   : > { %v4996_v9 = vrot.slane %v4995_v8, 1  ;;  %v5065_v53 = vadd.f32 %v5064_v49, %v5063_v5  ;;  %p6591_p3 = scmp.lt.s32.totalorder %s9389_s26, %s6589_s13  ;;  %p6592_p5 = scmp.lt.s32.totalorder %s6590_s14, %s6584_s7 }
 0x24d   : > { %p6587_p2 = pneg %p6586_p1 }
 0x24e   : > { %v4997_v34 = vadd.f32 %v4996_v9, %v4995_v8  ;;  %v5066_v14 = vrot.slane %v5065_v53, 1  ;;  %p6593_p6 = por %p6592_p5, %p6591_p3 }
 0x250   : > { %4998 = vst [vmem:[%s218_s11] sm:$0x1] %v4997_v34  ;;  %v5067_v2 = vadd.f32 %v5066_v14, %v5065_v53  ;;  %p6594_p7 = pnand %p6593_p6, %p6587_p2 }
 0x252   : > { %6597 = shalt.err (!%p6594_p7)
}
 0x253   : > { %s6598_s10 = scalar_lea.hbm %s9387_s24, 16  ;;  %s6602_s21 = scalar_lea.hbm %s9472_s3, 32 }
 0x254   : > { %p6599_p9 = scmp.ne.s32.totalorder %s9387_s24, %s6598_s10  ;;  %p6603_p12 = scmp.lt.s32.totalorder %s9387_s24, %s9472_s3 }
 0x255   : > { %p6604_p13 = scmp.lt.s32.totalorder %s6602_s21, %s6598_s10 }
 0x256   : > { %p6600_p10 = pnand %p6599_p9, %p6764_p4 }
 0x257   : > { %p6605_p0 = por %p6604_p13, %p6603_p12 }
 0x258   : > { %p6601_p11 = pneg %p6600_p10 }
 0x25a   : > { %p6606_p1 = pnand %p6605_p0, %p6601_p11 }
 0x25c   : > { %6609 = shalt.err (!%p6606_p1)
}
 0x25d   : > { %6442 = dma.vmem_to_hbm [thread:$0]  (%p6764_p4), %s9389_s26, 16, %s9387_s24, %s5075_s30   ;;  %5068 = vst [vmem:[%s224_s5] sm:$0x1] %v5067_v2 }
 0x25e   : > { %s6610_s22 = scalar_lea.vmem %s9396_s6, 16  ;;  %s6696_s7 = smov [#allocation6]  }
 0x25f   : > { %p6611_p2 = scmp.ne.s32.totalorder %s9396_s6, %s6610_s22  ;;  %s6614_s13 = sshll.u32 %s6696_s7, 4  ;;  %s6615_s13 = int_to_ptr.vmem [resolvable:$false] %s6614_s13 }
 0x260   : > { %s6616_s14 = scalar_lea.vmem %s6615_s13, 32  ;;  %p6617_p6 = scmp.lt.s32.totalorder %s9396_s6, %s6615_s13 }
 0x261   : > { %p6612_p3 = pnand %p6611_p2, %p6764_p4  ;;  %p6618_p7 = scmp.lt.s32.totalorder %s6616_s14, %s6610_s22 }
 0x263   : > { %p6613_p5 = pneg %p6612_p3  ;;  %p6619_p9 = por %p6618_p7, %p6617_p6 }
 0x265   : > { %p6620_p10 = pnand %p6619_p9, %p6613_p5 }
 0x267   : > { %6623 = shalt.err (!%p6620_p10)
}
 0x268   : > { %s6624_s12 = scalar_lea.hbm %s9394_s29, 16  ;;  %s6628_s24 = scalar_lea.hbm %s9473_s4, 32 }
 0x269   : > { %p6625_p11 = scmp.ne.s32.totalorder %s9394_s29, %s6624_s12  ;;  %p6629_p0 = scmp.lt.s32.totalorder %s9394_s29, %s9473_s4 }
 0x26a   : > { %p6630_p1 = scmp.lt.s32.totalorder %s6628_s24, %s6624_s12 }
 0x26b   : > { %p6626_p12 = pnand %p6625_p11, %p6764_p4 }
 0x26c   : > { %p6631_p2 = por %p6630_p1, %p6629_p0 }
 0x26d   : > { %p6627_p13 = pneg %p6626_p12 }
 0x26f   : > { %p6632_p3 = pnand %p6631_p2, %p6627_p13 }
 0x271   : > { %6635 = shalt.err (!%p6632_p3)
}
 0x272   : > { %6443 = dma.vmem_to_hbm [thread:$0]  (%p6764_p4), %s9396_s6, 16, %s9394_s29, %s5075_s30  }
 0x273 PF: > { %p6457_p5 = scmp.ge.s32.totalorder %s6690_s20, 2  ;;  %s5136_s18 = sand.u32 1, %s6670_s15  }
 0x274   : > { %s5137_s21 = scalar_lea.sflag [#allocation3], %s5136_s18 }
 0x275   : > { %p6448_p6 = pnand %p6457_p5, %p6773_p8 }
 0x277   : > { %p6449_p7 = pneg %p6448_p6 }
 0x279   : > { %6661 = dma.done.wait (%p6449_p7), %s5137_s21, 2048  }
 0x27a   : > { %6663 = vsyncadd (%p6449_p7), %s5137_s21, 4294965248  ;;  %s9725_s8 = sadd.s32 4294967294, %s6690_s20  }
 0x27b   : > { %s5145_s25 = sand.u32 1, %s9725_s8  }
 0x27c   : > { %s5146_s22 = scalar_lea.sflag [#allocation5], %s5145_s25 }
 0x27d   : > { %6665 = dma.done.wait (%p6449_p7), %s5146_s22, 32  }
 0x27e   : > { %6667 = vsyncadd (%p6449_p7), %s5146_s22, 4294967264  ;;  %s21_s20 = sadd.s32 1, %s6690_s20   ;;  %s9726_s15 = smov %s6674_s16 }
 0x27f   : > { %p18_p4 = scmp.ge.s32.totalorder %s21_s20, 4   ;;  %s9727_s16 = smov %s6678_s17 }
 0x280   : > { %s9728_s17 = smov %s6779_s28  ;;  %s9729_s18 = smov %s6686_s19 }
 0x281   : > { %s9730_s19 = smov %s9732_s23  ;;  %20 = sbr.rel (!%p18_p4) target bundleno = 6 (0x6), region = 106 }
 0x286   :  { %5158 = vsyncpa [#allocation3], 1 }
 0x287   :  { %5160 = vsyncpa [#allocation3 + $0x1], 1 }
 0x288   :  { %5161 = vsyncpa [#allocation5], 1 }
 0x289   :  { %5163 = vsyncpa [#allocation5 + $0x1], 1 }

</bundles_post_ra>
